<compile_context>
chip_gen: v7x
topology: tpu7x:2x2x1
jax: 0.10.0
libtpu: 0.0.40
codegen_flags: <defaults>
</compile_context>

<pallas_src>
import functools

import jax
import jax.numpy as jnp
from jax.experimental import pallas as pl
from jax.experimental.pallas import tpu as pltpu


# ---------------------------------------------------------------------------
# Helpers
# ---------------------------------------------------------------------------
def _round_up(x, m):
    return ((x + m - 1) // m) * m


def _im2col_t(a, kh, kw, stride, pad, pad_value=0.0):
    """a: [C, B, H, W] -> P_t [kh*kw*C, B*Ho*Wo] (patch-position major K order)."""
    C, B, H, W = a.shape
    ap = jnp.pad(a, ((0, 0), (0, 0), (pad, pad), (pad, pad)),
                 constant_values=pad_value)
    Ho = (H + 2 * pad - kh) // stride + 1
    Wo = (W + 2 * pad - kw) // stride + 1
    cols = []
    for i in range(kh):
        for j in range(kw):
            cols.append(ap[:, :, i:i + stride * Ho:stride,
                           j:j + stride * Wo:stride])
    pt = jnp.stack(cols, axis=0).reshape(kh * kw * C, B * Ho * Wo)
    return pt, (Ho, Wo)


# ---------------------------------------------------------------------------
# Pallas kernels  (all outputs are [Cout, TM] with M on the 128-lane axis)
# ---------------------------------------------------------------------------
def _conv_kernel(pt_ref, wt_ref, b_ref, o_ref, *, relu):
    acc = jnp.dot(wt_ref[...], pt_ref[...], preferred_element_type=jnp.float32)
    y = acc + b_ref[...]                      # bias (BN scale folded in weights)
    if relu:
        y = jnp.maximum(y, 0.0)
    o_ref[...] = y.astype(o_ref.dtype)


def _conv_res_kernel(pt_ref, wt_ref, b_ref, r_ref, o_ref, *, relu):
    acc = jnp.dot(wt_ref[...], pt_ref[...], preferred_element_type=jnp.float32)
    y = acc + b_ref[...] + r_ref[...]
    if relu:
        y = jnp.maximum(y, 0.0)
    o_ref[...] = y.astype(o_ref.dtype)


def _conv_down_res_kernel(pt_ref, wt_ref, b_ref, ptd_ref, wtd_ref, bd_ref,
                          o_ref, *, relu):
    # fused 1x1 downsample residual + 3x3 conv2 + bias + add + ReLU
    res = jnp.dot(wtd_ref[...], ptd_ref[...],
                  preferred_element_type=jnp.float32) + bd_ref[...]
    acc = jnp.dot(wt_ref[...], pt_ref[...], preferred_element_type=jnp.float32)
    y = acc + b_ref[...] + res
    if relu:
        y = jnp.maximum(y, 0.0)
    o_ref[...] = y.astype(o_ref.dtype)


def _conv_res_gap_kernel(pt_ref, wt_ref, b_ref, r_ref, pool_ref, gap_ref):
    # final conv2: residual + ReLU, then fused global-average-pool epilogue
    acc = jnp.dot(wt_ref[...], pt_ref[...], preferred_element_type=jnp.float32)
    y = jnp.maximum(acc + b_ref[...] + r_ref[...], 0.0)          # [Cout, M]
    gap_ref[...] = jnp.dot(y, pool_ref[...],
                           preferred_element_type=jnp.float32
                           ).astype(gap_ref.dtype)               # [Cout, B]


def _maxpool_kernel(v_ref, o_ref):
    # v_ref: [kh*kw, C, M] -> max over patch axis (lane-dense M)
    o_ref[...] = jnp.max(v_ref[...], axis=0).astype(o_ref.dtype)


# ---------------------------------------------------------------------------
# Wrappers
# ---------------------------------------------------------------------------
def conv_bn(a, layer, *, kh, kw, stride, pad, relu,
            residual=None, down=None, gap_batch=None):
    """a: [Cin, B, H, W].  layer = (wt bf16 [Cout, K], bias f32 [Cout, 1]).

    residual : optional [Cout, M] f32 added before ReLU (identity path).
    down     : optional (down_layer, block_input, stride) -> 1x1/stride
               downsample computed inside the same kernel as the residual.
    gap_batch: if set (== batch B), fuse AdaptiveAvgPool2d(1) in the epilogue
               and return pooled features [Cout, B].
    """
    wt, b = layer
    Cin, B, H, W = a.shape
    Cout, K = wt.shape
    assert K == kh * kw * Cin
    pt, (Ho, Wo) = _im2col_t(a, kh, kw, stride, pad)
    M = B * Ho * Wo

    # Whole-M tiles; keep 2 grid steps when M is large so v7x's 2 TCs both work.
    if M >= 512:
        M_pad = _round_up(M, 256)
        TM = M_pad // 2
        grid_m = 2
    elif M >= 128:
        M_pad = _round_up(M, 128)
        TM = M_pad
        grid_m = 1
    else:
        M_pad = _round_up(M, 8)
        TM = M_pad
        grid_m = 1

    pt = jnp.pad(pt, ((0, 0), (0, M_pad - M))).astype(jnp.bfloat16)

    in_specs = [
        pl.BlockSpec((K, TM), lambda i: (0, i)),
        pl.BlockSpec((Cout, K), lambda i: (0, 0)),
        pl.BlockSpec((Cout, 1), lambda i: (0, 0)),
    ]
    args = [pt, wt, b]

    if gap_batch is not None:
        # Final conv of the net: fused residual + ReLU + global average pool.
        assert residual is not None and grid_m == 1 and M_pad == M
        hw = Ho * Wo
        pool = (jnp.repeat(jnp.eye(gap_batch, dtype=jnp.float32), hw, axis=0)
                / float(hw))                                     # [M, B]
        in_specs += [pl.BlockSpec((Cout, TM), lambda i: (0, i)),
                     pl.BlockSpec((M_pad, gap_batch), lambda i: (0, 0))]
        args += [residual.astype(jnp.float32), pool]
        return pl.pallas_call(
            _conv_res_gap_kernel,
            out_shape=jax.ShapeDtypeStruct((Cout, gap_batch), jnp.float32),
            grid=(grid_m,),
            in_specs=in_specs,
            out_specs=pl.BlockSpec((Cout, gap_batch), lambda i: (0, 0)),
            compiler_params=pltpu.CompilerParams(
                dimension_semantics=("parallel",)),
        )(*args)                                                  # [Cout, B]

    if down is not None:
        (dwt, db), a_in, dstride = down
        Cd = a_in.shape[0]
        ptd = a_in[:, :, ::dstride, ::dstride].reshape(Cd, -1)   # 1x1/stride
        assert ptd.shape[1] == M
        ptd = jnp.pad(ptd, ((0, 0), (0, M_pad - M))).astype(jnp.bfloat16)
        in_specs += [pl.BlockSpec((Cd, TM), lambda i: (0, i)),
                     pl.BlockSpec((Cout, Cd), lambda i: (0, 0)),
                     pl.BlockSpec((Cout, 1), lambda i: (0, 0))]
        args += [ptd, dwt, db]
        kernel = functools.partial(_conv_down_res_kernel, relu=relu)
    elif residual is not None:
        r = jnp.pad(residual.astype(jnp.float32), ((0, 0), (0, M_pad - M)))
        in_specs.append(pl.BlockSpec((Cout, TM), lambda i: (0, i)))
        args.append(r)
        kernel = functools.partial(_conv_res_kernel, relu=relu)
    else:
        kernel = functools.partial(_conv_kernel, relu=relu)

    out = pl.pallas_call(
        kernel,
        out_shape=jax.ShapeDtypeStruct((Cout, M_pad), jnp.float32),
        grid=(grid_m,),
        in_specs=in_specs,
        out_specs=pl.BlockSpec((Cout, TM), lambda i: (0, i)),
        compiler_params=pltpu.CompilerParams(
            dimension_semantics=("parallel",)),
    )(*args)
    return out[:, :M].reshape(Cout, B, Ho, Wo)


def maxpool2d(a, *, kernel=3, stride=2, pad=1):
    """a: [C, B, H, W]; matches nn.MaxPool2d(3, 2, 1) (-inf padding)."""
    C, B, H, W = a.shape
    ap = jnp.pad(a, ((0, 0), (0, 0), (pad, pad), (pad, pad)),
                 constant_values=float("-inf"))
    Ho = (H + 2 * pad - kernel) // stride + 1
    Wo = (W + 2 * pad - kernel) // stride + 1
    cols = []
    for i in range(kernel):
        for j in range(kernel):
            cols.append(ap[:, :, i:i + stride * Ho:stride,
                           j:j + stride * Wo:stride])
    M = B * Ho * Wo
    v = jnp.stack(cols, axis=0).reshape(kernel * kernel, C, M)
    out = pl.pallas_call(
        _maxpool_kernel,
        out_shape=jax.ShapeDtypeStruct((C, M), a.dtype),
        grid=(1,),
        in_specs=[pl.BlockSpec((kernel * kernel, C, M), lambda i: (0, 0, 0))],
        out_specs=pl.BlockSpec((C, M), lambda i: (0, 0)),
        compiler_params=pltpu.CompilerParams(
            dimension_semantics=("parallel",)),
    )(v)
    return out.reshape(C, B, Ho, Wo)


# ---------------------------------------------------------------------------
# ResNet-18-style backbone (channel widths scaled down for a small test)
# ---------------------------------------------------------------------------
def basic_block(a, p, stride, final_gap_batch=None):
    Cin, B, H, W = a.shape
    h = conv_bn(a, p["conv1"], kh=3, kw=3, stride=stride, pad=1, relu=True)
    if p["down"] is not None:
        # downsample 1x1 conv fused into the conv2 kernel
        return conv_bn(h, p["conv2"], kh=3, kw=3, stride=1, pad=1, relu=True,
                       down=(p["down"], a, stride), gap_batch=final_gap_batch)
    identity = a.reshape(Cin, B * H * W)
    return conv_bn(h, p["conv2"], kh=3, kw=3, stride=1, pad=1, relu=True,
                   residual=identity, gap_batch=final_gap_batch)


def backbone_forward(x_nchw, params):
    B = x_nchw.shape[0]
    a = jnp.transpose(x_nchw, (1, 0, 2, 3))            # NCHW -> [C, B, H, W]
    # stem: 7x7/2 conv + BN + ReLU + 3x3/2 maxpool
    a = conv_bn(a, params["stem"], kh=7, kw=7, stride=2, pad=3, relu=True)
    a = maxpool2d(a, kernel=3, stride=2, pad=1)
    # 4 stages x 2 BasicBlocks (resnet18 topology); last block fuses the GAP.
    for stage in range(4):
        for bidx in range(2):
            stride = 2 if (stage > 0 and bidx == 0) else 1
            is_last = (stage == 3 and bidx == 1)
            a = basic_block(a, params[f"layer{stage + 1}"][bidx], stride,
                            final_gap_batch=B if is_last else None)
    return jnp.transpose(a, (1, 0))                     # [Cout, B] -> [B, Cout]


# ---------------------------------------------------------------------------
# Deterministic synthetic parameters (BN folded with eval running stats)
# ---------------------------------------------------------------------------
def _init_conv_bn(key, kh, kw, cin, cout):
    k1, k2, k3, k4, k5 = jax.random.split(key, 5)
    fan_in = kh * kw * cin
    w = jax.random.normal(k1, (kh, kw, cin, cout), jnp.float32) * \
        (2.0 / fan_in) ** 0.5
    gamma = 1.0 + 0.1 * jax.random.normal(k2, (cout,), jnp.float32)
    beta = 0.1 * jax.random.normal(k3, (cout,), jnp.float32)
    mean = 0.1 * jax.random.normal(k4, (cout,), jnp.float32)
    var = jnp.abs(jax.random.normal(k5, (cout,), jnp.float32)) + 0.5
    scale = gamma / jnp.sqrt(var + 1e-5)
    bias = beta - mean * scale
    # Transposed-GEMM layout [Cout, KH*KW*Cin] with BN scale folded in.
    # (Real PyTorch [Cout, Cin, KH, KW] weights would use .transpose(0,2,3,1).)
    wt = jnp.transpose(w, (3, 0, 1, 2)).reshape(cout, kh * kw * cin)
    wt = (wt * scale[:, None]).astype(jnp.bfloat16)
    return (wt, bias.reshape(cout, 1).astype(jnp.float32))


def make_params(key, in_ch=3, widths=(8, 8, 16, 32, 64)):
    keys = iter(jax.random.split(key, 32))
    params = {"stem": _init_conv_bn(next(keys), 7, 7, in_ch, widths[0])}
    cin = widths[0]
    for stage in range(4):
        cout = widths[stage + 1]
        blocks = []
        for b in range(2):
            stride = 2 if (stage > 0 and b == 0) else 1
            need_down = (stride != 1) or (cin != cout)
            blocks.append({
                "conv1": _init_conv_bn(next(keys), 3, 3, cin, cout),
                "conv2": _init_conv_bn(next(keys), 3, 3, cout, cout),
                "down": _init_conv_bn(next(keys), 1, 1, cin, cout)
                        if need_down else None,
            })
            cin = cout
        params[f"layer{stage + 1}"] = blocks
    return params


# ---------------------------------------------------------------------------
if __name__ == "__main__":
    key = jax.random.PRNGKey(0)
    pkey, xkey = jax.random.split(key)
    params = make_params(pkey)
    # Small NCHW input (RGB), 64x64 so the /32 total stride leaves a 2x2 map
    # for the (fused) global pool.
    x = jax.random.normal(xkey, (2, 3, 64, 64), jnp.float32)

    feat = jax.jit(backbone_forward)(x, params)
    feat = jax.block_until_ready(feat)

    assert feat.shape == (2, 64), feat.shape          # [B, out_features]
    assert bool(jnp.all(jnp.isfinite(feat)))
    print("KERNEL_OK")
</pallas_src>

<mosaic_0001>
module attributes {stable_mosaic.version = 11 : i64} {
  func.func @_conv_kernel(%arg0: i32, %arg1: memref<147x1024xbf16, #tpu.memory_space<vmem>>, %arg2: memref<8x147xbf16, #tpu.memory_space<vmem>>, %arg3: memref<8x1xf32, #tpu.memory_space<vmem>>, %arg4: memref<8x1024xf32, #tpu.memory_space<vmem>>) attributes {dimension_semantics = [#tpu.dimension_semantics<parallel>], iteration_bounds = array<i64: 2>, scalar_prefetch = 0 : i64, scratch_operands = 0 : i64, tpu.core_type = #tpu.core_type<tc>, window_params = [{transform_indices = @transform_0, window_bounds = array<i64: 147, 1024>}, {pipeline_mode = #tpu.pipeline_mode<synchronous>, transform_indices = @transform_1, window_bounds = array<i64: 8, 147>}, {pipeline_mode = #tpu.pipeline_mode<synchronous>, transform_indices = @transform_2, window_bounds = array<i64: 8, 1>}, {transform_indices = @transform_3, window_bounds = array<i64: 8, 1024>}]} {
    %c0 = arith.constant 0 : index
    %c0_0 = arith.constant 0 : index
    %0 = vector.load %arg2[%c0, %c0_0] : memref<8x147xbf16, #tpu.memory_space<vmem>>, vector<8x147xbf16>
    %c0_1 = arith.constant 0 : index
    %c0_2 = arith.constant 0 : index
    %1 = vector.load %arg1[%c0_1, %c0_2] : memref<147x1024xbf16, #tpu.memory_space<vmem>>, vector<147x1024xbf16>
    %cst = arith.constant dense<0.000000e+00> : vector<8x1024xf32>
    %2 = tpu.matmul %0, %1, %cst {dimension_numbers = #tpu.dot_dimension_numbers<[1], [0], [0], [1], [0, 0, 1, 1], [], []>} : vector<8x147xbf16>, vector<147x1024xbf16>, vector<8x1024xf32> -> vector<8x1024xf32>
    %c0_3 = arith.constant 0 : index
    %c0_4 = arith.constant 0 : index
    %3 = vector.load %arg3[%c0_3, %c0_4] : memref<8x1xf32, #tpu.memory_space<vmem>>, vector<8x1xf32>
    %4 = vector.broadcast %3 : vector<8x1xf32> to vector<8x1024xf32>
    %5 = arith.addf %2, %4 : vector<8x1024xf32>
    %cst_5 = arith.constant 0.000000e+00 : f32
    %6 = vector.broadcast %cst_5 : f32 to vector<8x1024xf32>
    %7 = arith.maximumf %5, %6 : vector<8x1024xf32>
    %c0_6 = arith.constant 0 : index
    %c0_7 = arith.constant 0 : index
    %8 = vector.load %arg4[%c0_6, %c0_7] : memref<8x1024xf32, #tpu.memory_space<vmem>>, vector<8x1024xf32>
    tpu.vector_store %arg4[%c0_6, %c0_7], %7 {strides = array<i32>} : memref<8x1024xf32, #tpu.memory_space<vmem>>, vector<8x1024xf32>,
    return
  }
  func.func @transform_0(%arg0: i32) -> (i32, i32) {
    %c0_i32 = arith.constant 0 : i32
    %c0_i32_0 = arith.constant 0 : i32
    return %c0_i32, %arg0 : i32, i32
  }
  func.func @transform_1(%arg0: i32) -> (i32, i32) {
    %c0_i32 = arith.constant 0 : i32
    %c0_i32_0 = arith.constant 0 : i32
    %c0_i32_1 = arith.constant 0 : i32
    return %c0_i32, %c0_i32_0 : i32, i32
  }
  func.func @transform_2(%arg0: i32) -> (i32, i32) {
    %c0_i32 = arith.constant 0 : i32
    %c0_i32_0 = arith.constant 0 : i32
    %c0_i32_1 = arith.constant 0 : i32
    return %c0_i32, %c0_i32_0 : i32, i32
  }
  func.func @transform_3(%arg0: i32) -> (i32, i32) {
    %c0_i32 = arith.constant 0 : i32
    %c0_i32_0 = arith.constant 0 : i32
    return %c0_i32, %arg0 : i32, i32
  }
}

module attributes {stable_mosaic.version = 11 : i64} {
  func.func @_maxpool_kernel(%arg0: i32, %arg1: memref<9x8x512xf32, #tpu.memory_space<vmem>>, %arg2: memref<8x512xf32, #tpu.memory_space<vmem>>) attributes {dimension_semantics = [#tpu.dimension_semantics<parallel>], iteration_bounds = array<i64: 1>, scalar_prefetch = 0 : i64, scratch_operands = 0 : i64, tpu.core_type = #tpu.core_type<tc>, window_params = [{pipeline_mode = #tpu.pipeline_mode<synchronous>, transform_indices = @transform_0, window_bounds = array<i64: 9, 8, 512>}, {pipeline_mode = #tpu.pipeline_mode<synchronous>, transform_indices = @transform_1, window_bounds = array<i64: 8, 512>}]} {
    %c0 = arith.constant 0 : index
    %c0_0 = arith.constant 0 : index
    %c0_1 = arith.constant 0 : index
    %0 = vector.load %arg1[%c0, %c0_0, %c0_1] : memref<9x8x512xf32, #tpu.memory_space<vmem>>, vector<9x8x512xf32>
    %cst = arith.constant dense<0xFF800000> : vector<8x512xf32>
    %1 = vector.multi_reduction <maximumf>, %0, %cst [0] : vector<9x8x512xf32> to vector<8x512xf32>
    %c0_2 = arith.constant 0 : index
    %c0_3 = arith.constant 0 : index
    %2 = vector.load %arg2[%c0_2, %c0_3] : memref<8x512xf32, #tpu.memory_space<vmem>>, vector<8x512xf32>
    tpu.vector_store %arg2[%c0_2, %c0_3], %1 {strides = array<i32>} : memref<8x512xf32, #tpu.memory_space<vmem>>, vector<8x512xf32>,
    return
  }
  func.func @transform_0(%arg0: i32) -> (i32, i32, i32) {
    %c0_i32 = arith.constant 0 : i32
    %c0_i32_0 = arith.constant 0 : i32
    %c0_i32_1 = arith.constant 0 : i32
    %c0_i32_2 = arith.constant 0 : i32
    return %c0_i32, %c0_i32_0, %c0_i32_1 : i32, i32, i32
  }
  func.func @transform_1(%arg0: i32) -> (i32, i32) {
    %c0_i32 = arith.constant 0 : i32
    %c0_i32_0 = arith.constant 0 : i32
    %c0_i32_1 = arith.constant 0 : i32
    return %c0_i32, %c0_i32_0 : i32, i32
  }
}

module attributes {stable_mosaic.version = 11 : i64} {
  func.func @_conv_res_kernel(%arg0: i32, %arg1: memref<72x256xbf16, #tpu.memory_space<vmem>>, %arg2: memref<8x72xbf16, #tpu.memory_space<vmem>>, %arg3: memref<8x1xf32, #tpu.memory_space<vmem>>, %arg4: memref<8x256xf32, #tpu.memory_space<vmem>>, %arg5: memref<8x256xf32, #tpu.memory_space<vmem>>) attributes {dimension_semantics = [#tpu.dimension_semantics<parallel>], iteration_bounds = array<i64: 2>, scalar_prefetch = 0 : i64, scratch_operands = 0 : i64, tpu.core_type = #tpu.core_type<tc>, window_params = [{transform_indices = @transform_0, window_bounds = array<i64: 72, 256>}, {pipeline_mode = #tpu.pipeline_mode<synchronous>, transform_indices = @transform_1, window_bounds = array<i64: 8, 72>}, {pipeline_mode = #tpu.pipeline_mode<synchronous>, transform_indices = @transform_2, window_bounds = array<i64: 8, 1>}, {transform_indices = @transform_3, window_bounds = array<i64: 8, 256>}, {transform_indices = @transform_4, window_bounds = array<i64: 8, 256>}]} {
    %c0 = arith.constant 0 : index
    %c0_0 = arith.constant 0 : index
    %0 = vector.load %arg2[%c0, %c0_0] : memref<8x72xbf16, #tpu.memory_space<vmem>>, vector<8x72xbf16>
    %c0_1 = arith.constant 0 : index
    %c0_2 = arith.constant 0 : index
    %1 = vector.load %arg1[%c0_1, %c0_2] : memref<72x256xbf16, #tpu.memory_space<vmem>>, vector<72x256xbf16>
    %cst = arith.constant dense<0.000000e+00> : vector<8x256xf32>
    %2 = tpu.matmul %0, %1, %cst {dimension_numbers = #tpu.dot_dimension_numbers<[1], [0], [0], [1], [0, 0, 1, 1], [], []>} : vector<8x72xbf16>, vector<72x256xbf16>, vector<8x256xf32> -> vector<8x256xf32>
    %c0_3 = arith.constant 0 : index
    %c0_4 = arith.constant 0 : index
    %3 = vector.load %arg3[%c0_3, %c0_4] : memref<8x1xf32, #tpu.memory_space<vmem>>, vector<8x1xf32>
    %4 = vector.broadcast %3 : vector<8x1xf32> to vector<8x256xf32>
    %5 = arith.addf %2, %4 : vector<8x256xf32>
    %c0_5 = arith.constant 0 : index
    %c0_6 = arith.constant 0 : index
    %6 = vector.load %arg4[%c0_5, %c0_6] : memref<8x256xf32, #tpu.memory_space<vmem>>, vector<8x256xf32>
    %7 = arith.addf %5, %6 : vector<8x256xf32>
    %cst_7 = arith.constant 0.000000e+00 : f32
    %8 = vector.broadcast %cst_7 : f32 to vector<8x256xf32>
    %9 = arith.maximumf %7, %8 : vector<8x256xf32>
    %c0_8 = arith.constant 0 : index
    %c0_9 = arith.constant 0 : index
    %10 = vector.load %arg5[%c0_8, %c0_9] : memref<8x256xf32, #tpu.memory_space<vmem>>, vector<8x256xf32>
    tpu.vector_store %arg5[%c0_8, %c0_9], %9 {strides = array<i32>} : memref<8x256xf32, #tpu.memory_space<vmem>>, vector<8x256xf32>,
    return
  }
  func.func @transform_0(%arg0: i32) -> (i32, i32) {
    %c0_i32 = arith.constant 0 : i32
    %c0_i32_0 = arith.constant 0 : i32
    return %c0_i32, %arg0 : i32, i32
  }
  func.func @transform_1(%arg0: i32) -> (i32, i32) {
    %c0_i32 = arith.constant 0 : i32
    %c0_i32_0 = arith.constant 0 : i32
    %c0_i32_1 = arith.constant 0 : i32
    return %c0_i32, %c0_i32_0 : i32, i32
  }
  func.func @transform_2(%arg0: i32) -> (i32, i32) {
    %c0_i32 = arith.constant 0 : i32
    %c0_i32_0 = arith.constant 0 : i32
    %c0_i32_1 = arith.constant 0 : i32
    return %c0_i32, %c0_i32_0 : i32, i32
  }
  func.func @transform_3(%arg0: i32) -> (i32, i32) {
    %c0_i32 = arith.constant 0 : i32
    %c0_i32_0 = arith.constant 0 : i32
    return %c0_i32, %arg0 : i32, i32
  }
  func.func @transform_4(%arg0: i32) -> (i32, i32) {
    %c0_i32 = arith.constant 0 : i32
    %c0_i32_0 = arith.constant 0 : i32
    return %c0_i32, %arg0 : i32, i32
  }
}

module attributes {stable_mosaic.version = 11 : i64} {
  func.func @_conv_kernel(%arg0: i32, %arg1: memref<72x256xbf16, #tpu.memory_space<vmem>>, %arg2: memref<8x72xbf16, #tpu.memory_space<vmem>>, %arg3: memref<8x1xf32, #tpu.memory_space<vmem>>, %arg4: memref<8x256xf32, #tpu.memory_space<vmem>>) attributes {dimension_semantics = [#tpu.dimension_semantics<parallel>], iteration_bounds = array<i64: 2>, scalar_prefetch = 0 : i64, scratch_operands = 0 : i64, tpu.core_type = #tpu.core_type<tc>, window_params = [{transform_indices = @transform_0, window_bounds = array<i64: 72, 256>}, {pipeline_mode = #tpu.pipeline_mode<synchronous>, transform_indices = @transform_1, window_bounds = array<i64: 8, 72>}, {pipeline_mode = #tpu.pipeline_mode<synchronous>, transform_indices = @transform_2, window_bounds = array<i64: 8, 1>}, {transform_indices = @transform_3, window_bounds = array<i64: 8, 256>}]} {
    %c0 = arith.constant 0 : index
    %c0_0 = arith.constant 0 : index
    %0 = vector.load %arg2[%c0, %c0_0] : memref<8x72xbf16, #tpu.memory_space<vmem>>, vector<8x72xbf16>
    %c0_1 = arith.constant 0 : index
    %c0_2 = arith.constant 0 : index
    %1 = vector.load %arg1[%c0_1, %c0_2] : memref<72x256xbf16, #tpu.memory_space<vmem>>, vector<72x256xbf16>
    %cst = arith.constant dense<0.000000e+00> : vector<8x256xf32>
    %2 = tpu.matmul %0, %1, %cst {dimension_numbers = #tpu.dot_dimension_numbers<[1], [0], [0], [1], [0, 0, 1, 1], [], []>} : vector<8x72xbf16>, vector<72x256xbf16>, vector<8x256xf32> -> vector<8x256xf32>
    %c0_3 = arith.constant 0 : index
    %c0_4 = arith.constant 0 : index
    %3 = vector.load %arg3[%c0_3, %c0_4] : memref<8x1xf32, #tpu.memory_space<vmem>>, vector<8x1xf32>
    %4 = vector.broadcast %3 : vector<8x1xf32> to vector<8x256xf32>
    %5 = arith.addf %2, %4 : vector<8x256xf32>
    %cst_5 = arith.constant 0.000000e+00 : f32
    %6 = vector.broadcast %cst_5 : f32 to vector<8x256xf32>
    %7 = arith.maximumf %5, %6 : vector<8x256xf32>
    %c0_6 = arith.constant 0 : index
    %c0_7 = arith.constant 0 : index
    %8 = vector.load %arg4[%c0_6, %c0_7] : memref<8x256xf32, #tpu.memory_space<vmem>>, vector<8x256xf32>
    tpu.vector_store %arg4[%c0_6, %c0_7], %7 {strides = array<i32>} : memref<8x256xf32, #tpu.memory_space<vmem>>, vector<8x256xf32>,
    return
  }
  func.func @transform_0(%arg0: i32) -> (i32, i32) {
    %c0_i32 = arith.constant 0 : i32
    %c0_i32_0 = arith.constant 0 : i32
    return %c0_i32, %arg0 : i32, i32
  }
  func.func @transform_1(%arg0: i32) -> (i32, i32) {
    %c0_i32 = arith.constant 0 : i32
    %c0_i32_0 = arith.constant 0 : i32
    %c0_i32_1 = arith.constant 0 : i32
    return %c0_i32, %c0_i32_0 : i32, i32
  }
  func.func @transform_2(%arg0: i32) -> (i32, i32) {
    %c0_i32 = arith.constant 0 : i32
    %c0_i32_0 = arith.constant 0 : i32
    %c0_i32_1 = arith.constant 0 : i32
    return %c0_i32, %c0_i32_0 : i32, i32
  }
  func.func @transform_3(%arg0: i32) -> (i32, i32) {
    %c0_i32 = arith.constant 0 : i32
    %c0_i32_0 = arith.constant 0 : i32
    return %c0_i32, %arg0 : i32, i32
  }
}

module attributes {stable_mosaic.version = 11 : i64} {
  func.func @_conv_kernel(%arg0: i32, %arg1: memref<72x128xbf16, #tpu.memory_space<vmem>>, %arg2: memref<16x72xbf16, #tpu.memory_space<vmem>>, %arg3: memref<16x1xf32, #tpu.memory_space<vmem>>, %arg4: memref<16x128xf32, #tpu.memory_space<vmem>>) attributes {dimension_semantics = [#tpu.dimension_semantics<parallel>], iteration_bounds = array<i64: 1>, scalar_prefetch = 0 : i64, scratch_operands = 0 : i64, tpu.core_type = #tpu.core_type<tc>, window_params = [{transform_indices = @transform_0, window_bounds = array<i64: 72, 128>}, {pipeline_mode = #tpu.pipeline_mode<synchronous>, transform_indices = @transform_1, window_bounds = array<i64: 16, 72>}, {pipeline_mode = #tpu.pipeline_mode<synchronous>, transform_indices = @transform_2, window_bounds = array<i64: 16, 1>}, {transform_indices = @transform_3, window_bounds = array<i64: 16, 128>}]} {
    %c0 = arith.constant 0 : index
    %c0_0 = arith.constant 0 : index
    %0 = vector.load %arg2[%c0, %c0_0] : memref<16x72xbf16, #tpu.memory_space<vmem>>, vector<16x72xbf16>
    %c0_1 = arith.constant 0 : index
    %c0_2 = arith.constant 0 : index
    %1 = vector.load %arg1[%c0_1, %c0_2] : memref<72x128xbf16, #tpu.memory_space<vmem>>, vector<72x128xbf16>
    %cst = arith.constant dense<0.000000e+00> : vector<16x128xf32>
    %2 = tpu.matmul %0, %1, %cst {dimension_numbers = #tpu.dot_dimension_numbers<[1], [0], [0], [1], [0, 0, 1, 1], [], []>} : vector<16x72xbf16>, vector<72x128xbf16>, vector<16x128xf32> -> vector<16x128xf32>
    %c0_3 = arith.constant 0 : index
    %c0_4 = arith.constant 0 : index
    %3 = vector.load %arg3[%c0_3, %c0_4] : memref<16x1xf32, #tpu.memory_space<vmem>>, vector<16x1xf32>
    %4 = vector.broadcast %3 : vector<16x1xf32> to vector<16x128xf32>
    %5 = arith.addf %2, %4 : vector<16x128xf32>
    %cst_5 = arith.constant 0.000000e+00 : f32
    %6 = vector.broadcast %cst_5 : f32 to vector<16x128xf32>
    %7 = arith.maximumf %5, %6 : vector<16x128xf32>
    %c0_6 = arith.constant 0 : index
    %c0_7 = arith.constant 0 : index
    %8 = vector.load %arg4[%c0_6, %c0_7] : memref<16x128xf32, #tpu.memory_space<vmem>>, vector<16x128xf32>
    tpu.vector_store %arg4[%c0_6, %c0_7], %7 {strides = array<i32>} : memref<16x128xf32, #tpu.memory_space<vmem>>, vector<16x128xf32>,
    return
  }
  func.func @transform_0(%arg0: i32) -> (i32, i32) {
    %c0_i32 = arith.constant 0 : i32
    %c0_i32_0 = arith.constant 0 : i32
    return %c0_i32, %arg0 : i32, i32
  }
  func.func @transform_1(%arg0: i32) -> (i32, i32) {
    %c0_i32 = arith.constant 0 : i32
    %c0_i32_0 = arith.constant 0 : i32
    %c0_i32_1 = arith.constant 0 : i32
    return %c0_i32, %c0_i32_0 : i32, i32
  }
  func.func @transform_2(%arg0: i32) -> (i32, i32) {
    %c0_i32 = arith.constant 0 : i32
    %c0_i32_0 = arith.constant 0 : i32
    %c0_i32_1 = arith.constant 0 : i32
    return %c0_i32, %c0_i32_0 : i32, i32
  }
  func.func @transform_3(%arg0: i32) -> (i32, i32) {
    %c0_i32 = arith.constant 0 : i32
    %c0_i32_0 = arith.constant 0 : i32
    return %c0_i32, %arg0 : i32, i32
  }
}

module attributes {stable_mosaic.version = 11 : i64} {
  func.func @_conv_down_res_kernel(%arg0: i32, %arg1: memref<144x128xbf16, #tpu.memory_space<vmem>>, %arg2: memref<16x144xbf16, #tpu.memory_space<vmem>>, %arg3: memref<16x1xf32, #tpu.memory_space<vmem>>, %arg4: memref<8x128xbf16, #tpu.memory_space<vmem>>, %arg5: memref<16x8xbf16, #tpu.memory_space<vmem>>, %arg6: memref<16x1xf32, #tpu.memory_space<vmem>>, %arg7: memref<16x128xf32, #tpu.memory_space<vmem>>) attributes {dimension_semantics = [#tpu.dimension_semantics<parallel>], iteration_bounds = array<i64: 1>, scalar_prefetch = 0 : i64, scratch_operands = 0 : i64, tpu.core_type = #tpu.core_type<tc>, window_params = [{transform_indices = @transform_0, window_bounds = array<i64: 144, 128>}, {pipeline_mode = #tpu.pipeline_mode<synchronous>, transform_indices = @transform_1, window_bounds = array<i64: 16, 144>}, {pipeline_mode = #tpu.pipeline_mode<synchronous>, transform_indices = @transform_2, window_bounds = array<i64: 16, 1>}, {transform_indices = @transform_3, window_bounds = array<i64: 8, 128>}, {pipeline_mode = #tpu.pipeline_mode<synchronous>, transform_indices = @transform_4, window_bounds = array<i64: 16, 8>}, {pipeline_mode = #tpu.pipeline_mode<synchronous>, transform_indices = @transform_5, window_bounds = array<i64: 16, 1>}, {transform_indices = @transform_6, window_bounds = array<i64: 16, 128>}]} {
    %c0 = arith.constant 0 : index
    %c0_0 = arith.constant 0 : index
    %0 = vector.load %arg5[%c0, %c0_0] : memref<16x8xbf16, #tpu.memory_space<vmem>>, vector<16x8xbf16>
    %c0_1 = arith.constant 0 : index
    %c0_2 = arith.constant 0 : index
    %1 = vector.load %arg4[%c0_1, %c0_2] : memref<8x128xbf16, #tpu.memory_space<vmem>>, vector<8x128xbf16>
    %cst = arith.constant dense<0.000000e+00> : vector<16x128xf32>
    %2 = tpu.matmul %0, %1, %cst {dimension_numbers = #tpu.dot_dimension_numbers<[1], [0], [0], [1], [0, 0, 1, 1], [], []>} : vector<16x8xbf16>, vector<8x128xbf16>, vector<16x128xf32> -> vector<16x128xf32>
    %c0_3 = arith.constant 0 : index
    %c0_4 = arith.constant 0 : index
    %3 = vector.load %arg6[%c0_3, %c0_4] : memref<16x1xf32, #tpu.memory_space<vmem>>, vector<16x1xf32>
    %4 = vector.broadcast %3 : vector<16x1xf32> to vector<16x128xf32>
    %5 = arith.addf %2, %4 : vector<16x128xf32>
    %c0_5 = arith.constant 0 : index
    %c0_6 = arith.constant 0 : index
    %6 = vector.load %arg2[%c0_5, %c0_6] : memref<16x144xbf16, #tpu.memory_space<vmem>>, vector<16x144xbf16>
    %c0_7 = arith.constant 0 : index
    %c0_8 = arith.constant 0 : index
    %7 = vector.load %arg1[%c0_7, %c0_8] : memref<144x128xbf16, #tpu.memory_space<vmem>>, vector<144x128xbf16>
    %cst_9 = arith.constant dense<0.000000e+00> : vector<16x128xf32>
    %8 = tpu.matmul %6, %7, %cst_9 {dimension_numbers = #tpu.dot_dimension_numbers<[1], [0], [0], [1], [0, 0, 1, 1], [], []>} : vector<16x144xbf16>, vector<144x128xbf16>, vector<16x128xf32> -> vector<16x128xf32>
    %c0_10 = arith.constant 0 : index
    %c0_11 = arith.constant 0 : index
    %9 = vector.load %arg3[%c0_10, %c0_11] : memref<16x1xf32, #tpu.memory_space<vmem>>, vector<16x1xf32>
    %10 = vector.broadcast %9 : vector<16x1xf32> to vector<16x128xf32>
    %11 = arith.addf %8, %10 : vector<16x128xf32>
    %12 = arith.addf %11, %5 : vector<16x128xf32>
    %cst_12 = arith.constant 0.000000e+00 : f32
    %13 = vector.broadcast %cst_12 : f32 to vector<16x128xf32>
    %14 = arith.maximumf %12, %13 : vector<16x128xf32>
    %c0_13 = arith.constant 0 : index
    %c0_14 = arith.constant 0 : index
    %15 = vector.load %arg7[%c0_13, %c0_14] : memref<16x128xf32, #tpu.memory_space<vmem>>, vector<16x128xf32>
    tpu.vector_store %arg7[%c0_13, %c0_14], %14 {strides = array<i32>} : memref<16x128xf32, #tpu.memory_space<vmem>>, vector<16x128xf32>,
    return
  }
  func.func @transform_0(%arg0: i32) -> (i32, i32) {
    %c0_i32 = arith.constant 0 : i32
    %c0_i32_0 = arith.constant 0 : i32
    return %c0_i32, %arg0 : i32, i32
  }
  func.func @transform_1(%arg0: i32) -> (i32, i32) {
    %c0_i32 = arith.constant 0 : i32
    %c0_i32_0 = arith.constant 0 : i32
    %c0_i32_1 = arith.constant 0 : i32
    return %c0_i32, %c0_i32_0 : i32, i32
  }
  func.func @transform_2(%arg0: i32) -> (i32, i32) {
    %c0_i32 = arith.constant 0 : i32
    %c0_i32_0 = arith.constant 0 : i32
    %c0_i32_1 = arith.constant 0 : i32
    return %c0_i32, %c0_i32_0 : i32, i32
  }
  func.func @transform_3(%arg0: i32) -> (i32, i32) {
    %c0_i32 = arith.constant 0 : i32
    %c0_i32_0 = arith.constant 0 : i32
    return %c0_i32, %arg0 : i32, i32
  }
  func.func @transform_4(%arg0: i32) -> (i32, i32) {
    %c0_i32 = arith.constant 0 : i32
    %c0_i32_0 = arith.constant 0 : i32
    %c0_i32_1 = arith.constant 0 : i32
    return %c0_i32, %c0_i32_0 : i32, i32
  }
  func.func @transform_5(%arg0: i32) -> (i32, i32) {
    %c0_i32 = arith.constant 0 : i32
    %c0_i32_0 = arith.constant 0 : i32
    %c0_i32_1 = arith.constant 0 : i32
    return %c0_i32, %c0_i32_0 : i32, i32
  }
  func.func @transform_6(%arg0: i32) -> (i32, i32) {
    %c0_i32 = arith.constant 0 : i32
    %c0_i32_0 = arith.constant 0 : i32
    return %c0_i32, %arg0 : i32, i32
  }
}

module attributes {stable_mosaic.version = 11 : i64} {
  func.func @_conv_kernel(%arg0: i32, %arg1: memref<144x128xbf16, #tpu.memory_space<vmem>>, %arg2: memref<16x144xbf16, #tpu.memory_space<vmem>>, %arg3: memref<16x1xf32, #tpu.memory_space<vmem>>, %arg4: memref<16x128xf32, #tpu.memory_space<vmem>>) attributes {dimension_semantics = [#tpu.dimension_semantics<parallel>], iteration_bounds = array<i64: 1>, scalar_prefetch = 0 : i64, scratch_operands = 0 : i64, tpu.core_type = #tpu.core_type<tc>, window_params = [{transform_indices = @transform_0, window_bounds = array<i64: 144, 128>}, {pipeline_mode = #tpu.pipeline_mode<synchronous>, transform_indices = @transform_1, window_bounds = array<i64: 16, 144>}, {pipeline_mode = #tpu.pipeline_mode<synchronous>, transform_indices = @transform_2, window_bounds = array<i64: 16, 1>}, {transform_indices = @transform_3, window_bounds = array<i64: 16, 128>}]} {
    %c0 = arith.constant 0 : index
    %c0_0 = arith.constant 0 : index
    %0 = vector.load %arg2[%c0, %c0_0] : memref<16x144xbf16, #tpu.memory_space<vmem>>, vector<16x144xbf16>
    %c0_1 = arith.constant 0 : index
    %c0_2 = arith.constant 0 : index
    %1 = vector.load %arg1[%c0_1, %c0_2] : memref<144x128xbf16, #tpu.memory_space<vmem>>, vector<144x128xbf16>
    %cst = arith.constant dense<0.000000e+00> : vector<16x128xf32>
    %2 = tpu.matmul %0, %1, %cst {dimension_numbers = #tpu.dot_dimension_numbers<[1], [0], [0], [1], [0, 0, 1, 1], [], []>} : vector<16x144xbf16>, vector<144x128xbf16>, vector<16x128xf32> -> vector<16x128xf32>
    %c0_3 = arith.constant 0 : index
    %c0_4 = arith.constant 0 : index
    %3 = vector.load %arg3[%c0_3, %c0_4] : memref<16x1xf32, #tpu.memory_space<vmem>>, vector<16x1xf32>
    %4 = vector.broadcast %3 : vector<16x1xf32> to vector<16x128xf32>
    %5 = arith.addf %2, %4 : vector<16x128xf32>
    %cst_5 = arith.constant 0.000000e+00 : f32
    %6 = vector.broadcast %cst_5 : f32 to vector<16x128xf32>
    %7 = arith.maximumf %5, %6 : vector<16x128xf32>
    %c0_6 = arith.constant 0 : index
    %c0_7 = arith.constant 0 : index
    %8 = vector.load %arg4[%c0_6, %c0_7] : memref<16x128xf32, #tpu.memory_space<vmem>>, vector<16x128xf32>
    tpu.vector_store %arg4[%c0_6, %c0_7], %7 {strides = array<i32>} : memref<16x128xf32, #tpu.memory_space<vmem>>, vector<16x128xf32>,
    return
  }
  func.func @transform_0(%arg0: i32) -> (i32, i32) {
    %c0_i32 = arith.constant 0 : i32
    %c0_i32_0 = arith.constant 0 : i32
    return %c0_i32, %arg0 : i32, i32
  }
  func.func @transform_1(%arg0: i32) -> (i32, i32) {
    %c0_i32 = arith.constant 0 : i32
    %c0_i32_0 = arith.constant 0 : i32
    %c0_i32_1 = arith.constant 0 : i32
    return %c0_i32, %c0_i32_0 : i32, i32
  }
  func.func @transform_2(%arg0: i32) -> (i32, i32) {
    %c0_i32 = arith.constant 0 : i32
    %c0_i32_0 = arith.constant 0 : i32
    %c0_i32_1 = arith.constant 0 : i32
    return %c0_i32, %c0_i32_0 : i32, i32
  }
  func.func @transform_3(%arg0: i32) -> (i32, i32) {
    %c0_i32 = arith.constant 0 : i32
    %c0_i32_0 = arith.constant 0 : i32
    return %c0_i32, %arg0 : i32, i32
  }
}

module attributes {stable_mosaic.version = 11 : i64} {
  func.func @_conv_res_kernel(%arg0: i32, %arg1: memref<144x128xbf16, #tpu.memory_space<vmem>>, %arg2: memref<16x144xbf16, #tpu.memory_space<vmem>>, %arg3: memref<16x1xf32, #tpu.memory_space<vmem>>, %arg4: memref<16x128xf32, #tpu.memory_space<vmem>>, %arg5: memref<16x128xf32, #tpu.memory_space<vmem>>) attributes {dimension_semantics = [#tpu.dimension_semantics<parallel>], iteration_bounds = array<i64: 1>, scalar_prefetch = 0 : i64, scratch_operands = 0 : i64, tpu.core_type = #tpu.core_type<tc>, window_params = [{transform_indices = @transform_0, window_bounds = array<i64: 144, 128>}, {pipeline_mode = #tpu.pipeline_mode<synchronous>, transform_indices = @transform_1, window_bounds = array<i64: 16, 144>}, {pipeline_mode = #tpu.pipeline_mode<synchronous>, transform_indices = @transform_2, window_bounds = array<i64: 16, 1>}, {transform_indices = @transform_3, window_bounds = array<i64: 16, 128>}, {transform_indices = @transform_4, window_bounds = array<i64: 16, 128>}]} {
    %c0 = arith.constant 0 : index
    %c0_0 = arith.constant 0 : index
    %0 = vector.load %arg2[%c0, %c0_0] : memref<16x144xbf16, #tpu.memory_space<vmem>>, vector<16x144xbf16>
    %c0_1 = arith.constant 0 : index
    %c0_2 = arith.constant 0 : index
    %1 = vector.load %arg1[%c0_1, %c0_2] : memref<144x128xbf16, #tpu.memory_space<vmem>>, vector<144x128xbf16>
    %cst = arith.constant dense<0.000000e+00> : vector<16x128xf32>
    %2 = tpu.matmul %0, %1, %cst {dimension_numbers = #tpu.dot_dimension_numbers<[1], [0], [0], [1], [0, 0, 1, 1], [], []>} : vector<16x144xbf16>, vector<144x128xbf16>, vector<16x128xf32> -> vector<16x128xf32>
    %c0_3 = arith.constant 0 : index
    %c0_4 = arith.constant 0 : index
    %3 = vector.load %arg3[%c0_3, %c0_4] : memref<16x1xf32, #tpu.memory_space<vmem>>, vector<16x1xf32>
    %4 = vector.broadcast %3 : vector<16x1xf32> to vector<16x128xf32>
    %5 = arith.addf %2, %4 : vector<16x128xf32>
    %c0_5 = arith.constant 0 : index
    %c0_6 = arith.constant 0 : index
    %6 = vector.load %arg4[%c0_5, %c0_6] : memref<16x128xf32, #tpu.memory_space<vmem>>, vector<16x128xf32>
    %7 = arith.addf %5, %6 : vector<16x128xf32>
    %cst_7 = arith.constant 0.000000e+00 : f32
    %8 = vector.broadcast %cst_7 : f32 to vector<16x128xf32>
    %9 = arith.maximumf %7, %8 : vector<16x128xf32>
    %c0_8 = arith.constant 0 : index
    %c0_9 = arith.constant 0 : index
    %10 = vector.load %arg5[%c0_8, %c0_9] : memref<16x128xf32, #tpu.memory_space<vmem>>, vector<16x128xf32>
    tpu.vector_store %arg5[%c0_8, %c0_9], %9 {strides = array<i32>} : memref<16x128xf32, #tpu.memory_space<vmem>>, vector<16x128xf32>,
    return
  }
  func.func @transform_0(%arg0: i32) -> (i32, i32) {
    %c0_i32 = arith.constant 0 : i32
    %c0_i32_0 = arith.constant 0 : i32
    return %c0_i32, %arg0 : i32, i32
  }
  func.func @transform_1(%arg0: i32) -> (i32, i32) {
    %c0_i32 = arith.constant 0 : i32
    %c0_i32_0 = arith.constant 0 : i32
    %c0_i32_1 = arith.constant 0 : i32
    return %c0_i32, %c0_i32_0 : i32, i32
  }
  func.func @transform_2(%arg0: i32) -> (i32, i32) {
    %c0_i32 = arith.constant 0 : i32
    %c0_i32_0 = arith.constant 0 : i32
    %c0_i32_1 = arith.constant 0 : i32
    return %c0_i32, %c0_i32_0 : i32, i32
  }
  func.func @transform_3(%arg0: i32) -> (i32, i32) {
    %c0_i32 = arith.constant 0 : i32
    %c0_i32_0 = arith.constant 0 : i32
    return %c0_i32, %arg0 : i32, i32
  }
  func.func @transform_4(%arg0: i32) -> (i32, i32) {
    %c0_i32 = arith.constant 0 : i32
    %c0_i32_0 = arith.constant 0 : i32
    return %c0_i32, %arg0 : i32, i32
  }
}

module attributes {stable_mosaic.version = 11 : i64} {
  func.func @_conv_kernel(%arg0: i32, %arg1: memref<144x32xbf16, #tpu.memory_space<vmem>>, %arg2: memref<32x144xbf16, #tpu.memory_space<vmem>>, %arg3: memref<32x1xf32, #tpu.memory_space<vmem>>, %arg4: memref<32x32xf32, #tpu.memory_space<vmem>>) attributes {dimension_semantics = [#tpu.dimension_semantics<parallel>], iteration_bounds = array<i64: 1>, scalar_prefetch = 0 : i64, scratch_operands = 0 : i64, tpu.core_type = #tpu.core_type<tc>, window_params = [{transform_indices = @transform_0, window_bounds = array<i64: 144, 32>}, {pipeline_mode = #tpu.pipeline_mode<synchronous>, transform_indices = @transform_1, window_bounds = array<i64: 32, 144>}, {pipeline_mode = #tpu.pipeline_mode<synchronous>, transform_indices = @transform_2, window_bounds = array<i64: 32, 1>}, {transform_indices = @transform_3, window_bounds = array<i64: 32, 32>}]} {
    %c0 = arith.constant 0 : index
    %c0_0 = arith.constant 0 : index
    %0 = vector.load %arg2[%c0, %c0_0] : memref<32x144xbf16, #tpu.memory_space<vmem>>, vector<32x144xbf16>
    %c0_1 = arith.constant 0 : index
    %c0_2 = arith.constant 0 : index
    %1 = vector.load %arg1[%c0_1, %c0_2] : memref<144x32xbf16, #tpu.memory_space<vmem>>, vector<144x32xbf16>
    %cst = arith.constant dense<0.000000e+00> : vector<32x32xf32>
    %2 = tpu.matmul %0, %1, %cst {dimension_numbers = #tpu.dot_dimension_numbers<[1], [0], [0], [1], [0, 0, 1, 1], [], []>} : vector<32x144xbf16>, vector<144x32xbf16>, vector<32x32xf32> -> vector<32x32xf32>
    %c0_3 = arith.constant 0 : index
    %c0_4 = arith.constant 0 : index
    %3 = vector.load %arg3[%c0_3, %c0_4] : memref<32x1xf32, #tpu.memory_space<vmem>>, vector<32x1xf32>
    %4 = vector.broadcast %3 : vector<32x1xf32> to vector<32x32xf32>
    %5 = arith.addf %2, %4 : vector<32x32xf32>
    %cst_5 = arith.constant 0.000000e+00 : f32
    %6 = vector.broadcast %cst_5 : f32 to vector<32x32xf32>
    %7 = arith.maximumf %5, %6 : vector<32x32xf32>
    %c0_6 = arith.constant 0 : index
    %c0_7 = arith.constant 0 : index
    %8 = vector.load %arg4[%c0_6, %c0_7] : memref<32x32xf32, #tpu.memory_space<vmem>>, vector<32x32xf32>
    tpu.vector_store %arg4[%c0_6, %c0_7], %7 {strides = array<i32>} : memref<32x32xf32, #tpu.memory_space<vmem>>, vector<32x32xf32>,
    return
  }
  func.func @transform_0(%arg0: i32) -> (i32, i32) {
    %c0_i32 = arith.constant 0 : i32
    %c0_i32_0 = arith.constant 0 : i32
    return %c0_i32, %arg0 : i32, i32
  }
  func.func @transform_1(%arg0: i32) -> (i32, i32) {
    %c0_i32 = arith.constant 0 : i32
    %c0_i32_0 = arith.constant 0 : i32
    %c0_i32_1 = arith.constant 0 : i32
    return %c0_i32, %c0_i32_0 : i32, i32
  }
  func.func @transform_2(%arg0: i32) -> (i32, i32) {
    %c0_i32 = arith.constant 0 : i32
    %c0_i32_0 = arith.constant 0 : i32
    %c0_i32_1 = arith.constant 0 : i32
    return %c0_i32, %c0_i32_0 : i32, i32
  }
  func.func @transform_3(%arg0: i32) -> (i32, i32) {
    %c0_i32 = arith.constant 0 : i32
    %c0_i32_0 = arith.constant 0 : i32
    return %c0_i32, %arg0 : i32, i32
  }
}

module attributes {stable_mosaic.version = 11 : i64} {
  func.func @_conv_kernel(%arg0: i32, %arg1: memref<288x32xbf16, #tpu.memory_space<vmem>>, %arg2: memref<32x288xbf16, #tpu.memory_space<vmem>>, %arg3: memref<32x1xf32, #tpu.memory_space<vmem>>, %arg4: memref<32x32xf32, #tpu.memory_space<vmem>>) attributes {dimension_semantics = [#tpu.dimension_semantics<parallel>], iteration_bounds = array<i64: 1>, scalar_prefetch = 0 : i64, scratch_operands = 0 : i64, tpu.core_type = #tpu.core_type<tc>, window_params = [{transform_indices = @transform_0, window_bounds = array<i64: 288, 32>}, {pipeline_mode = #tpu.pipeline_mode<synchronous>, transform_indices = @transform_1, window_bounds = array<i64: 32, 288>}, {pipeline_mode = #tpu.pipeline_mode<synchronous>, transform_indices = @transform_2, window_bounds = array<i64: 32, 1>}, {transform_indices = @transform_3, window_bounds = array<i64: 32, 32>}]} {
    %c0 = arith.constant 0 : index
    %c0_0 = arith.constant 0 : index
    %0 = vector.load %arg2[%c0, %c0_0] : memref<32x288xbf16, #tpu.memory_space<vmem>>, vector<32x288xbf16>
    %c0_1 = arith.constant 0 : index
    %c0_2 = arith.constant 0 : index
    %1 = vector.load %arg1[%c0_1, %c0_2] : memref<288x32xbf16, #tpu.memory_space<vmem>>, vector<288x32xbf16>
    %cst = arith.constant dense<0.000000e+00> : vector<32x32xf32>
    %2 = tpu.matmul %0, %1, %cst {dimension_numbers = #tpu.dot_dimension_numbers<[1], [0], [0], [1], [0, 0, 1, 1], [], []>} : vector<32x288xbf16>, vector<288x32xbf16>, vector<32x32xf32> -> vector<32x32xf32>
    %c0_3 = arith.constant 0 : index
    %c0_4 = arith.constant 0 : index
    %3 = vector.load %arg3[%c0_3, %c0_4] : memref<32x1xf32, #tpu.memory_space<vmem>>, vector<32x1xf32>
    %4 = vector.broadcast %3 : vector<32x1xf32> to vector<32x32xf32>
    %5 = arith.addf %2, %4 : vector<32x32xf32>
    %cst_5 = arith.constant 0.000000e+00 : f32
    %6 = vector.broadcast %cst_5 : f32 to vector<32x32xf32>
    %7 = arith.maximumf %5, %6 : vector<32x32xf32>
    %c0_6 = arith.constant 0 : index
    %c0_7 = arith.constant 0 : index
    %8 = vector.load %arg4[%c0_6, %c0_7] : memref<32x32xf32, #tpu.memory_space<vmem>>, vector<32x32xf32>
    tpu.vector_store %arg4[%c0_6, %c0_7], %7 {strides = array<i32>} : memref<32x32xf32, #tpu.memory_space<vmem>>, vector<32x32xf32>,
    return
  }
  func.func @transform_0(%arg0: i32) -> (i32, i32) {
    %c0_i32 = arith.constant 0 : i32
    %c0_i32_0 = arith.constant 0 : i32
    return %c0_i32, %arg0 : i32, i32
  }
  func.func @transform_1(%arg0: i32) -> (i32, i32) {
    %c0_i32 = arith.constant 0 : i32
    %c0_i32_0 = arith.constant 0 : i32
    %c0_i32_1 = arith.constant 0 : i32
    return %c0_i32, %c0_i32_0 : i32, i32
  }
  func.func @transform_2(%arg0: i32) -> (i32, i32) {
    %c0_i32 = arith.constant 0 : i32
    %c0_i32_0 = arith.constant 0 : i32
    %c0_i32_1 = arith.constant 0 : i32
    return %c0_i32, %c0_i32_0 : i32, i32
  }
  func.func @transform_3(%arg0: i32) -> (i32, i32) {
    %c0_i32 = arith.constant 0 : i32
    %c0_i32_0 = arith.constant 0 : i32
    return %c0_i32, %arg0 : i32, i32
  }
}

module attributes {stable_mosaic.version = 11 : i64} {
  func.func @_conv_res_kernel(%arg0: i32, %arg1: memref<288x32xbf16, #tpu.memory_space<vmem>>, %arg2: memref<32x288xbf16, #tpu.memory_space<vmem>>, %arg3: memref<32x1xf32, #tpu.memory_space<vmem>>, %arg4: memref<32x32xf32, #tpu.memory_space<vmem>>, %arg5: memref<32x32xf32, #tpu.memory_space<vmem>>) attributes {dimension_semantics = [#tpu.dimension_semantics<parallel>], iteration_bounds = array<i64: 1>, scalar_prefetch = 0 : i64, scratch_operands = 0 : i64, tpu.core_type = #tpu.core_type<tc>, window_params = [{transform_indices = @transform_0, window_bounds = array<i64: 288, 32>}, {pipeline_mode = #tpu.pipeline_mode<synchronous>, transform_indices = @transform_1, window_bounds = array<i64: 32, 288>}, {pipeline_mode = #tpu.pipeline_mode<synchronous>, transform_indices = @transform_2, window_bounds = array<i64: 32, 1>}, {transform_indices = @transform_3, window_bounds = array<i64: 32, 32>}, {transform_indices = @transform_4, window_bounds = array<i64: 32, 32>}]} {
    %c0 = arith.constant 0 : index
    %c0_0 = arith.constant 0 : index
    %0 = vector.load %arg2[%c0, %c0_0] : memref<32x288xbf16, #tpu.memory_space<vmem>>, vector<32x288xbf16>
    %c0_1 = arith.constant 0 : index
    %c0_2 = arith.constant 0 : index
    %1 = vector.load %arg1[%c0_1, %c0_2] : memref<288x32xbf16, #tpu.memory_space<vmem>>, vector<288x32xbf16>
    %cst = arith.constant dense<0.000000e+00> : vector<32x32xf32>
    %2 = tpu.matmul %0, %1, %cst {dimension_numbers = #tpu.dot_dimension_numbers<[1], [0], [0], [1], [0, 0, 1, 1], [], []>} : vector<32x288xbf16>, vector<288x32xbf16>, vector<32x32xf32> -> vector<32x32xf32>
    %c0_3 = arith.constant 0 : index
    %c0_4 = arith.constant 0 : index
    %3 = vector.load %arg3[%c0_3, %c0_4] : memref<32x1xf32, #tpu.memory_space<vmem>>, vector<32x1xf32>
    %4 = vector.broadcast %3 : vector<32x1xf32> to vector<32x32xf32>
    %5 = arith.addf %2, %4 : vector<32x32xf32>
    %c0_5 = arith.constant 0 : index
    %c0_6 = arith.constant 0 : index
    %6 = vector.load %arg4[%c0_5, %c0_6] : memref<32x32xf32, #tpu.memory_space<vmem>>, vector<32x32xf32>
    %7 = arith.addf %5, %6 : vector<32x32xf32>
    %cst_7 = arith.constant 0.000000e+00 : f32
    %8 = vector.broadcast %cst_7 : f32 to vector<32x32xf32>
    %9 = arith.maximumf %7, %8 : vector<32x32xf32>
    %c0_8 = arith.constant 0 : index
    %c0_9 = arith.constant 0 : index
    %10 = vector.load %arg5[%c0_8, %c0_9] : memref<32x32xf32, #tpu.memory_space<vmem>>, vector<32x32xf32>
    tpu.vector_store %arg5[%c0_8, %c0_9], %9 {strides = array<i32>} : memref<32x32xf32, #tpu.memory_space<vmem>>, vector<32x32xf32>,
    return
  }
  func.func @transform_0(%arg0: i32) -> (i32, i32) {
    %c0_i32 = arith.constant 0 : i32
    %c0_i32_0 = arith.constant 0 : i32
    return %c0_i32, %arg0 : i32, i32
  }
  func.func @transform_1(%arg0: i32) -> (i32, i32) {
    %c0_i32 = arith.constant 0 : i32
    %c0_i32_0 = arith.constant 0 : i32
    %c0_i32_1 = arith.constant 0 : i32
    return %c0_i32, %c0_i32_0 : i32, i32
  }
  func.func @transform_2(%arg0: i32) -> (i32, i32) {
    %c0_i32 = arith.constant 0 : i32
    %c0_i32_0 = arith.constant 0 : i32
    %c0_i32_1 = arith.constant 0 : i32
    return %c0_i32, %c0_i32_0 : i32, i32
  }
  func.func @transform_3(%arg0: i32) -> (i32, i32) {
    %c0_i32 = arith.constant 0 : i32
    %c0_i32_0 = arith.constant 0 : i32
    return %c0_i32, %arg0 : i32, i32
  }
  func.func @transform_4(%arg0: i32) -> (i32, i32) {
    %c0_i32 = arith.constant 0 : i32
    %c0_i32_0 = arith.constant 0 : i32
    return %c0_i32, %arg0 : i32, i32
  }
}

module attributes {stable_mosaic.version = 11 : i64} {
  func.func @_conv_down_res_kernel(%arg0: i32, %arg1: memref<288x32xbf16, #tpu.memory_space<vmem>>, %arg2: memref<32x288xbf16, #tpu.memory_space<vmem>>, %arg3: memref<32x1xf32, #tpu.memory_space<vmem>>, %arg4: memref<16x32xbf16, #tpu.memory_space<vmem>>, %arg5: memref<32x16xbf16, #tpu.memory_space<vmem>>, %arg6: memref<32x1xf32, #tpu.memory_space<vmem>>, %arg7: memref<32x32xf32, #tpu.memory_space<vmem>>) attributes {dimension_semantics = [#tpu.dimension_semantics<parallel>], iteration_bounds = array<i64: 1>, scalar_prefetch = 0 : i64, scratch_operands = 0 : i64, tpu.core_type = #tpu.core_type<tc>, window_params = [{transform_indices = @transform_0, window_bounds = array<i64: 288, 32>}, {pipeline_mode = #tpu.pipeline_mode<synchronous>, transform_indices = @transform_1, window_bounds = array<i64: 32, 288>}, {pipeline_mode = #tpu.pipeline_mode<synchronous>, transform_indices = @transform_2, window_bounds = array<i64: 32, 1>}, {transform_indices = @transform_3, window_bounds = array<i64: 16, 32>}, {pipeline_mode = #tpu.pipeline_mode<synchronous>, transform_indices = @transform_4, window_bounds = array<i64: 32, 16>}, {pipeline_mode = #tpu.pipeline_mode<synchronous>, transform_indices = @transform_5, window_bounds = array<i64: 32, 1>}, {transform_indices = @transform_6, window_bounds = array<i64: 32, 32>}]} {
    %c0 = arith.constant 0 : index
    %c0_0 = arith.constant 0 : index
    %0 = vector.load %arg5[%c0, %c0_0] : memref<32x16xbf16, #tpu.memory_space<vmem>>, vector<32x16xbf16>
    %c0_1 = arith.constant 0 : index
    %c0_2 = arith.constant 0 : index
    %1 = vector.load %arg4[%c0_1, %c0_2] : memref<16x32xbf16, #tpu.memory_space<vmem>>, vector<16x32xbf16>
    %cst = arith.constant dense<0.000000e+00> : vector<32x32xf32>
    %2 = tpu.matmul %0, %1, %cst {dimension_numbers = #tpu.dot_dimension_numbers<[1], [0], [0], [1], [0, 0, 1, 1], [], []>} : vector<32x16xbf16>, vector<16x32xbf16>, vector<32x32xf32> -> vector<32x32xf32>
    %c0_3 = arith.constant 0 : index
    %c0_4 = arith.constant 0 : index
    %3 = vector.load %arg6[%c0_3, %c0_4] : memref<32x1xf32, #tpu.memory_space<vmem>>, vector<32x1xf32>
    %4 = vector.broadcast %3 : vector<32x1xf32> to vector<32x32xf32>
    %5 = arith.addf %2, %4 : vector<32x32xf32>
    %c0_5 = arith.constant 0 : index
    %c0_6 = arith.constant 0 : index
    %6 = vector.load %arg2[%c0_5, %c0_6] : memref<32x288xbf16, #tpu.memory_space<vmem>>, vector<32x288xbf16>
    %c0_7 = arith.constant 0 : index
    %c0_8 = arith.constant 0 : index
    %7 = vector.load %arg1[%c0_7, %c0_8] : memref<288x32xbf16, #tpu.memory_space<vmem>>, vector<288x32xbf16>
    %cst_9 = arith.constant dense<0.000000e+00> : vector<32x32xf32>
    %8 = tpu.matmul %6, %7, %cst_9 {dimension_numbers = #tpu.dot_dimension_numbers<[1], [0], [0], [1], [0, 0, 1, 1], [], []>} : vector<32x288xbf16>, vector<288x32xbf16>, vector<32x32xf32> -> vector<32x32xf32>
    %c0_10 = arith.constant 0 : index
    %c0_11 = arith.constant 0 : index
    %9 = vector.load %arg3[%c0_10, %c0_11] : memref<32x1xf32, #tpu.memory_space<vmem>>, vector<32x1xf32>
    %10 = vector.broadcast %9 : vector<32x1xf32> to vector<32x32xf32>
    %11 = arith.addf %8, %10 : vector<32x32xf32>
    %12 = arith.addf %11, %5 : vector<32x32xf32>
    %cst_12 = arith.constant 0.000000e+00 : f32
    %13 = vector.broadcast %cst_12 : f32 to vector<32x32xf32>
    %14 = arith.maximumf %12, %13 : vector<32x32xf32>
    %c0_13 = arith.constant 0 : index
    %c0_14 = arith.constant 0 : index
    %15 = vector.load %arg7[%c0_13, %c0_14] : memref<32x32xf32, #tpu.memory_space<vmem>>, vector<32x32xf32>
    tpu.vector_store %arg7[%c0_13, %c0_14], %14 {strides = array<i32>} : memref<32x32xf32, #tpu.memory_space<vmem>>, vector<32x32xf32>,
    return
  }
  func.func @transform_0(%arg0: i32) -> (i32, i32) {
    %c0_i32 = arith.constant 0 : i32
    %c0_i32_0 = arith.constant 0 : i32
    return %c0_i32, %arg0 : i32, i32
  }
  func.func @transform_1(%arg0: i32) -> (i32, i32) {
    %c0_i32 = arith.constant 0 : i32
    %c0_i32_0 = arith.constant 0 : i32
    %c0_i32_1 = arith.constant 0 : i32
    return %c0_i32, %c0_i32_0 : i32, i32
  }
  func.func @transform_2(%arg0: i32) -> (i32, i32) {
    %c0_i32 = arith.constant 0 : i32
    %c0_i32_0 = arith.constant 0 : i32
    %c0_i32_1 = arith.constant 0 : i32
    return %c0_i32, %c0_i32_0 : i32, i32
  }
  func.func @transform_3(%arg0: i32) -> (i32, i32) {
    %c0_i32 = arith.constant 0 : i32
    %c0_i32_0 = arith.constant 0 : i32
    return %c0_i32, %arg0 : i32, i32
  }
  func.func @transform_4(%arg0: i32) -> (i32, i32) {
    %c0_i32 = arith.constant 0 : i32
    %c0_i32_0 = arith.constant 0 : i32
    %c0_i32_1 = arith.constant 0 : i32
    return %c0_i32, %c0_i32_0 : i32, i32
  }
  func.func @transform_5(%arg0: i32) -> (i32, i32) {
    %c0_i32 = arith.constant 0 : i32
    %c0_i32_0 = arith.constant 0 : i32
    %c0_i32_1 = arith.constant 0 : i32
    return %c0_i32, %c0_i32_0 : i32, i32
  }
  func.func @transform_6(%arg0: i32) -> (i32, i32) {
    %c0_i32 = arith.constant 0 : i32
    %c0_i32_0 = arith.constant 0 : i32
    return %c0_i32, %arg0 : i32, i32
  }
}

module attributes {stable_mosaic.version = 11 : i64} {
  func.func @_conv_kernel(%arg0: i32, %arg1: memref<288x8xbf16, #tpu.memory_space<vmem>>, %arg2: memref<64x288xbf16, #tpu.memory_space<vmem>>, %arg3: memref<64x1xf32, #tpu.memory_space<vmem>>, %arg4: memref<64x8xf32, #tpu.memory_space<vmem>>) attributes {dimension_semantics = [#tpu.dimension_semantics<parallel>], iteration_bounds = array<i64: 1>, scalar_prefetch = 0 : i64, scratch_operands = 0 : i64, tpu.core_type = #tpu.core_type<tc>, window_params = [{transform_indices = @transform_0, window_bounds = array<i64: 288, 8>}, {pipeline_mode = #tpu.pipeline_mode<synchronous>, transform_indices = @transform_1, window_bounds = array<i64: 64, 288>}, {pipeline_mode = #tpu.pipeline_mode<synchronous>, transform_indices = @transform_2, window_bounds = array<i64: 64, 1>}, {transform_indices = @transform_3, window_bounds = array<i64: 64, 8>}]} {
    %c0 = arith.constant 0 : index
    %c0_0 = arith.constant 0 : index
    %0 = vector.load %arg2[%c0, %c0_0] : memref<64x288xbf16, #tpu.memory_space<vmem>>, vector<64x288xbf16>
    %c0_1 = arith.constant 0 : index
    %c0_2 = arith.constant 0 : index
    %1 = vector.load %arg1[%c0_1, %c0_2] : memref<288x8xbf16, #tpu.memory_space<vmem>>, vector<288x8xbf16>
    %cst = arith.constant dense<0.000000e+00> : vector<64x8xf32>
    %2 = tpu.matmul %0, %1, %cst {dimension_numbers = #tpu.dot_dimension_numbers<[1], [0], [0], [1], [0, 0, 1, 1], [], []>} : vector<64x288xbf16>, vector<288x8xbf16>, vector<64x8xf32> -> vector<64x8xf32>
    %c0_3 = arith.constant 0 : index
    %c0_4 = arith.constant 0 : index
    %3 = vector.load %arg3[%c0_3, %c0_4] : memref<64x1xf32, #tpu.memory_space<vmem>>, vector<64x1xf32>
    %4 = vector.broadcast %3 : vector<64x1xf32> to vector<64x8xf32>
    %5 = arith.addf %2, %4 : vector<64x8xf32>
    %cst_5 = arith.constant 0.000000e+00 : f32
    %6 = vector.broadcast %cst_5 : f32 to vector<64x8xf32>
    %7 = arith.maximumf %5, %6 : vector<64x8xf32>
    %c0_6 = arith.constant 0 : index
    %c0_7 = arith.constant 0 : index
    %8 = vector.load %arg4[%c0_6, %c0_7] : memref<64x8xf32, #tpu.memory_space<vmem>>, vector<64x8xf32>
    tpu.vector_store %arg4[%c0_6, %c0_7], %7 {strides = array<i32>} : memref<64x8xf32, #tpu.memory_space<vmem>>, vector<64x8xf32>,
    return
  }
  func.func @transform_0(%arg0: i32) -> (i32, i32) {
    %c0_i32 = arith.constant 0 : i32
    %c0_i32_0 = arith.constant 0 : i32
    return %c0_i32, %arg0 : i32, i32
  }
  func.func @transform_1(%arg0: i32) -> (i32, i32) {
    %c0_i32 = arith.constant 0 : i32
    %c0_i32_0 = arith.constant 0 : i32
    %c0_i32_1 = arith.constant 0 : i32
    return %c0_i32, %c0_i32_0 : i32, i32
  }
  func.func @transform_2(%arg0: i32) -> (i32, i32) {
    %c0_i32 = arith.constant 0 : i32
    %c0_i32_0 = arith.constant 0 : i32
    %c0_i32_1 = arith.constant 0 : i32
    return %c0_i32, %c0_i32_0 : i32, i32
  }
  func.func @transform_3(%arg0: i32) -> (i32, i32) {
    %c0_i32 = arith.constant 0 : i32
    %c0_i32_0 = arith.constant 0 : i32
    return %c0_i32, %arg0 : i32, i32
  }
}

module attributes {stable_mosaic.version = 11 : i64} {
  func.func @_conv_down_res_kernel(%arg0: i32, %arg1: memref<576x8xbf16, #tpu.memory_space<vmem>>, %arg2: memref<64x576xbf16, #tpu.memory_space<vmem>>, %arg3: memref<64x1xf32, #tpu.memory_space<vmem>>, %arg4: memref<32x8xbf16, #tpu.memory_space<vmem>>, %arg5: memref<64x32xbf16, #tpu.memory_space<vmem>>, %arg6: memref<64x1xf32, #tpu.memory_space<vmem>>, %arg7: memref<64x8xf32, #tpu.memory_space<vmem>>) attributes {dimension_semantics = [#tpu.dimension_semantics<parallel>], iteration_bounds = array<i64: 1>, scalar_prefetch = 0 : i64, scratch_operands = 0 : i64, tpu.core_type = #tpu.core_type<tc>, window_params = [{transform_indices = @transform_0, window_bounds = array<i64: 576, 8>}, {pipeline_mode = #tpu.pipeline_mode<synchronous>, transform_indices = @transform_1, window_bounds = array<i64: 64, 576>}, {pipeline_mode = #tpu.pipeline_mode<synchronous>, transform_indices = @transform_2, window_bounds = array<i64: 64, 1>}, {transform_indices = @transform_3, window_bounds = array<i64: 32, 8>}, {pipeline_mode = #tpu.pipeline_mode<synchronous>, transform_indices = @transform_4, window_bounds = array<i64: 64, 32>}, {pipeline_mode = #tpu.pipeline_mode<synchronous>, transform_indices = @transform_5, window_bounds = array<i64: 64, 1>}, {transform_indices = @transform_6, window_bounds = array<i64: 64, 8>}]} {
    %c0 = arith.constant 0 : index
    %c0_0 = arith.constant 0 : index
    %0 = vector.load %arg5[%c0, %c0_0] : memref<64x32xbf16, #tpu.memory_space<vmem>>, vector<64x32xbf16>
    %c0_1 = arith.constant 0 : index
    %c0_2 = arith.constant 0 : index
    %1 = vector.load %arg4[%c0_1, %c0_2] : memref<32x8xbf16, #tpu.memory_space<vmem>>, vector<32x8xbf16>
    %cst = arith.constant dense<0.000000e+00> : vector<64x8xf32>
    %2 = tpu.matmul %0, %1, %cst {dimension_numbers = #tpu.dot_dimension_numbers<[1], [0], [0], [1], [0, 0, 1, 1], [], []>} : vector<64x32xbf16>, vector<32x8xbf16>, vector<64x8xf32> -> vector<64x8xf32>
    %c0_3 = arith.constant 0 : index
    %c0_4 = arith.constant 0 : index
    %3 = vector.load %arg6[%c0_3, %c0_4] : memref<64x1xf32, #tpu.memory_space<vmem>>, vector<64x1xf32>
    %4 = vector.broadcast %3 : vector<64x1xf32> to vector<64x8xf32>
    %5 = arith.addf %2, %4 : vector<64x8xf32>
    %c0_5 = arith.constant 0 : index
    %c0_6 = arith.constant 0 : index
    %6 = vector.load %arg2[%c0_5, %c0_6] : memref<64x576xbf16, #tpu.memory_space<vmem>>, vector<64x576xbf16>
    %c0_7 = arith.constant 0 : index
    %c0_8 = arith.constant 0 : index
    %7 = vector.load %arg1[%c0_7, %c0_8] : memref<576x8xbf16, #tpu.memory_space<vmem>>, vector<576x8xbf16>
    %cst_9 = arith.constant dense<0.000000e+00> : vector<64x8xf32>
    %8 = tpu.matmul %6, %7, %cst_9 {dimension_numbers = #tpu.dot_dimension_numbers<[1], [0], [0], [1], [0, 0, 1, 1], [], []>} : vector<64x576xbf16>, vector<576x8xbf16>, vector<64x8xf32> -> vector<64x8xf32>
    %c0_10 = arith.constant 0 : index
    %c0_11 = arith.constant 0 : index
    %9 = vector.load %arg3[%c0_10, %c0_11] : memref<64x1xf32, #tpu.memory_space<vmem>>, vector<64x1xf32>
    %10 = vector.broadcast %9 : vector<64x1xf32> to vector<64x8xf32>
    %11 = arith.addf %8, %10 : vector<64x8xf32>
    %12 = arith.addf %11, %5 : vector<64x8xf32>
    %cst_12 = arith.constant 0.000000e+00 : f32
    %13 = vector.broadcast %cst_12 : f32 to vector<64x8xf32>
    %14 = arith.maximumf %12, %13 : vector<64x8xf32>
    %c0_13 = arith.constant 0 : index
    %c0_14 = arith.constant 0 : index
    %15 = vector.load %arg7[%c0_13, %c0_14] : memref<64x8xf32, #tpu.memory_space<vmem>>, vector<64x8xf32>
    tpu.vector_store %arg7[%c0_13, %c0_14], %14 {strides = array<i32>} : memref<64x8xf32, #tpu.memory_space<vmem>>, vector<64x8xf32>,
    return
  }
  func.func @transform_0(%arg0: i32) -> (i32, i32) {
    %c0_i32 = arith.constant 0 : i32
    %c0_i32_0 = arith.constant 0 : i32
    return %c0_i32, %arg0 : i32, i32
  }
  func.func @transform_1(%arg0: i32) -> (i32, i32) {
    %c0_i32 = arith.constant 0 : i32
    %c0_i32_0 = arith.constant 0 : i32
    %c0_i32_1 = arith.constant 0 : i32
    return %c0_i32, %c0_i32_0 : i32, i32
  }
  func.func @transform_2(%arg0: i32) -> (i32, i32) {
    %c0_i32 = arith.constant 0 : i32
    %c0_i32_0 = arith.constant 0 : i32
    %c0_i32_1 = arith.constant 0 : i32
    return %c0_i32, %c0_i32_0 : i32, i32
  }
  func.func @transform_3(%arg0: i32) -> (i32, i32) {
    %c0_i32 = arith.constant 0 : i32
    %c0_i32_0 = arith.constant 0 : i32
    return %c0_i32, %arg0 : i32, i32
  }
  func.func @transform_4(%arg0: i32) -> (i32, i32) {
    %c0_i32 = arith.constant 0 : i32
    %c0_i32_0 = arith.constant 0 : i32
    %c0_i32_1 = arith.constant 0 : i32
    return %c0_i32, %c0_i32_0 : i32, i32
  }
  func.func @transform_5(%arg0: i32) -> (i32, i32) {
    %c0_i32 = arith.constant 0 : i32
    %c0_i32_0 = arith.constant 0 : i32
    %c0_i32_1 = arith.constant 0 : i32
    return %c0_i32, %c0_i32_0 : i32, i32
  }
  func.func @transform_6(%arg0: i32) -> (i32, i32) {
    %c0_i32 = arith.constant 0 : i32
    %c0_i32_0 = arith.constant 0 : i32
    return %c0_i32, %arg0 : i32, i32
  }
}

module attributes {stable_mosaic.version = 11 : i64} {
  func.func @_conv_kernel(%arg0: i32, %arg1: memref<576x8xbf16, #tpu.memory_space<vmem>>, %arg2: memref<64x576xbf16, #tpu.memory_space<vmem>>, %arg3: memref<64x1xf32, #tpu.memory_space<vmem>>, %arg4: memref<64x8xf32, #tpu.memory_space<vmem>>) attributes {dimension_semantics = [#tpu.dimension_semantics<parallel>], iteration_bounds = array<i64: 1>, scalar_prefetch = 0 : i64, scratch_operands = 0 : i64, tpu.core_type = #tpu.core_type<tc>, window_params = [{transform_indices = @transform_0, window_bounds = array<i64: 576, 8>}, {pipeline_mode = #tpu.pipeline_mode<synchronous>, transform_indices = @transform_1, window_bounds = array<i64: 64, 576>}, {pipeline_mode = #tpu.pipeline_mode<synchronous>, transform_indices = @transform_2, window_bounds = array<i64: 64, 1>}, {transform_indices = @transform_3, window_bounds = array<i64: 64, 8>}]} {
    %c0 = arith.constant 0 : index
    %c0_0 = arith.constant 0 : index
    %0 = vector.load %arg2[%c0, %c0_0] : memref<64x576xbf16, #tpu.memory_space<vmem>>, vector<64x576xbf16>
    %c0_1 = arith.constant 0 : index
    %c0_2 = arith.constant 0 : index
    %1 = vector.load %arg1[%c0_1, %c0_2] : memref<576x8xbf16, #tpu.memory_space<vmem>>, vector<576x8xbf16>
    %cst = arith.constant dense<0.000000e+00> : vector<64x8xf32>
    %2 = tpu.matmul %0, %1, %cst {dimension_numbers = #tpu.dot_dimension_numbers<[1], [0], [0], [1], [0, 0, 1, 1], [], []>} : vector<64x576xbf16>, vector<576x8xbf16>, vector<64x8xf32> -> vector<64x8xf32>
    %c0_3 = arith.constant 0 : index
    %c0_4 = arith.constant 0 : index
    %3 = vector.load %arg3[%c0_3, %c0_4] : memref<64x1xf32, #tpu.memory_space<vmem>>, vector<64x1xf32>
    %4 = vector.broadcast %3 : vector<64x1xf32> to vector<64x8xf32>
    %5 = arith.addf %2, %4 : vector<64x8xf32>
    %cst_5 = arith.constant 0.000000e+00 : f32
    %6 = vector.broadcast %cst_5 : f32 to vector<64x8xf32>
    %7 = arith.maximumf %5, %6 : vector<64x8xf32>
    %c0_6 = arith.constant 0 : index
    %c0_7 = arith.constant 0 : index
    %8 = vector.load %arg4[%c0_6, %c0_7] : memref<64x8xf32, #tpu.memory_space<vmem>>, vector<64x8xf32>
    tpu.vector_store %arg4[%c0_6, %c0_7], %7 {strides = array<i32>} : memref<64x8xf32, #tpu.memory_space<vmem>>, vector<64x8xf32>,
    return
  }
  func.func @transform_0(%arg0: i32) -> (i32, i32) {
    %c0_i32 = arith.constant 0 : i32
    %c0_i32_0 = arith.constant 0 : i32
    return %c0_i32, %arg0 : i32, i32
  }
  func.func @transform_1(%arg0: i32) -> (i32, i32) {
    %c0_i32 = arith.constant 0 : i32
    %c0_i32_0 = arith.constant 0 : i32
    %c0_i32_1 = arith.constant 0 : i32
    return %c0_i32, %c0_i32_0 : i32, i32
  }
  func.func @transform_2(%arg0: i32) -> (i32, i32) {
    %c0_i32 = arith.constant 0 : i32
    %c0_i32_0 = arith.constant 0 : i32
    %c0_i32_1 = arith.constant 0 : i32
    return %c0_i32, %c0_i32_0 : i32, i32
  }
  func.func @transform_3(%arg0: i32) -> (i32, i32) {
    %c0_i32 = arith.constant 0 : i32
    %c0_i32_0 = arith.constant 0 : i32
    return %c0_i32, %arg0 : i32, i32
  }
}

module attributes {stable_mosaic.version = 11 : i64} {
  func.func @_conv_res_gap_kernel(%arg0: i32, %arg1: memref<576x8xbf16, #tpu.memory_space<vmem>>, %arg2: memref<64x576xbf16, #tpu.memory_space<vmem>>, %arg3: memref<64x1xf32, #tpu.memory_space<vmem>>, %arg4: memref<64x8xf32, #tpu.memory_space<vmem>>, %arg5: memref<8x2xf32, #tpu.memory_space<vmem>>, %arg6: memref<64x2xf32, #tpu.memory_space<vmem>>) attributes {dimension_semantics = [#tpu.dimension_semantics<parallel>], iteration_bounds = array<i64: 1>, scalar_prefetch = 0 : i64, scratch_operands = 0 : i64, tpu.core_type = #tpu.core_type<tc>, window_params = [{transform_indices = @transform_0, window_bounds = array<i64: 576, 8>}, {pipeline_mode = #tpu.pipeline_mode<synchronous>, transform_indices = @transform_1, window_bounds = array<i64: 64, 576>}, {pipeline_mode = #tpu.pipeline_mode<synchronous>, transform_indices = @transform_2, window_bounds = array<i64: 64, 1>}, {transform_indices = @transform_3, window_bounds = array<i64: 64, 8>}, {pipeline_mode = #tpu.pipeline_mode<synchronous>, transform_indices = @transform_4, window_bounds = array<i64: 8, 2>}, {pipeline_mode = #tpu.pipeline_mode<synchronous>, transform_indices = @transform_5, window_bounds = array<i64: 64, 2>}]} {
    %c0 = arith.constant 0 : index
    %c0_0 = arith.constant 0 : index
    %0 = vector.load %arg2[%c0, %c0_0] : memref<64x576xbf16, #tpu.memory_space<vmem>>, vector<64x576xbf16>
    %c0_1 = arith.constant 0 : index
    %c0_2 = arith.constant 0 : index
    %1 = vector.load %arg1[%c0_1, %c0_2] : memref<576x8xbf16, #tpu.memory_space<vmem>>, vector<576x8xbf16>
    %cst = arith.constant dense<0.000000e+00> : vector<64x8xf32>
    %2 = tpu.matmul %0, %1, %cst {dimension_numbers = #tpu.dot_dimension_numbers<[1], [0], [0], [1], [0, 0, 1, 1], [], []>} : vector<64x576xbf16>, vector<576x8xbf16>, vector<64x8xf32> -> vector<64x8xf32>
    %c0_3 = arith.constant 0 : index
    %c0_4 = arith.constant 0 : index
    %3 = vector.load %arg3[%c0_3, %c0_4] : memref<64x1xf32, #tpu.memory_space<vmem>>, vector<64x1xf32>
    %4 = vector.broadcast %3 : vector<64x1xf32> to vector<64x8xf32>
    %5 = arith.addf %2, %4 : vector<64x8xf32>
    %c0_5 = arith.constant 0 : index
    %c0_6 = arith.constant 0 : index
    %6 = vector.load %arg4[%c0_5, %c0_6] : memref<64x8xf32, #tpu.memory_space<vmem>>, vector<64x8xf32>
    %7 = arith.addf %5, %6 : vector<64x8xf32>
    %cst_7 = arith.constant 0.000000e+00 : f32
    %8 = vector.broadcast %cst_7 : f32 to vector<64x8xf32>
    %9 = arith.maximumf %7, %8 : vector<64x8xf32>
    %c0_8 = arith.constant 0 : index
    %c0_9 = arith.constant 0 : index
    %10 = vector.load %arg5[%c0_8, %c0_9] : memref<8x2xf32, #tpu.memory_space<vmem>>, vector<8x2xf32>
    %cst_10 = arith.constant dense<0.000000e+00> : vector<64x2xf32>
    %11 = tpu.matmul %9, %10, %cst_10 {dimension_numbers = #tpu.dot_dimension_numbers<[1], [0], [0], [1], [0, 0, 1, 1], [], []>} : vector<64x8xf32>, vector<8x2xf32>, vector<64x2xf32> -> vector<64x2xf32>
    %c0_11 = arith.constant 0 : index
    %c0_12 = arith.constant 0 : index
    %12 = vector.load %arg6[%c0_11, %c0_12] : memref<64x2xf32, #tpu.memory_space<vmem>>, vector<64x2xf32>
    tpu.vector_store %arg6[%c0_11, %c0_12], %11 {strides = array<i32>} : memref<64x2xf32, #tpu.memory_space<vmem>>, vector<64x2xf32>,
    return
  }
  func.func @transform_0(%arg0: i32) -> (i32, i32) {
    %c0_i32 = arith.constant 0 : i32
    %c0_i32_0 = arith.constant 0 : i32
    return %c0_i32, %arg0 : i32, i32
  }
  func.func @transform_1(%arg0: i32) -> (i32, i32) {
    %c0_i32 = arith.constant 0 : i32
    %c0_i32_0 = arith.constant 0 : i32
    %c0_i32_1 = arith.constant 0 : i32
    return %c0_i32, %c0_i32_0 : i32, i32
  }
  func.func @transform_2(%arg0: i32) -> (i32, i32) {
    %c0_i32 = arith.constant 0 : i32
    %c0_i32_0 = arith.constant 0 : i32
    %c0_i32_1 = arith.constant 0 : i32
    return %c0_i32, %c0_i32_0 : i32, i32
  }
  func.func @transform_3(%arg0: i32) -> (i32, i32) {
    %c0_i32 = arith.constant 0 : i32
    %c0_i32_0 = arith.constant 0 : i32
    return %c0_i32, %arg0 : i32, i32
  }
  func.func @transform_4(%arg0: i32) -> (i32, i32) {
    %c0_i32 = arith.constant 0 : i32
    %c0_i32_0 = arith.constant 0 : i32
    %c0_i32_1 = arith.constant 0 : i32
    return %c0_i32, %c0_i32_0 : i32, i32
  }
  func.func @transform_5(%arg0: i32) -> (i32, i32) {
    %c0_i32 = arith.constant 0 : i32
    %c0_i32_0 = arith.constant 0 : i32
    %c0_i32_1 = arith.constant 0 : i32
    return %c0_i32, %c0_i32_0 : i32, i32
  }
}

</mosaic_0001>

<bundles_post_ra>
// kernel: backbone_forward.18
= control target key start
LH: loop header
LB: loop body
LE: loop exit
PB: predicated region body
PF: predicated region fallthrough
CT: control target
= control target key end

     0   :  { %s1270_s12 = smov 0   ;;  %s1272_s13 = smov 0   ;;  %s1604_s0 = inlined_call_operand.vmem [shape: bf16[147,2048], index: 0, kind: input, shape index: {}]   ;;  %s1605_s1 = inlined_call_operand.vmem [shape: bf16[8,147], index: 1, kind: input, shape index: {}]   ;;  %s1606_s2 = inlined_call_operand.vmem [shape: f32[8,1], index: 2, kind: input, shape index: {}]   ;;  %s1607_s3 = inlined_call_operand.vmem [shape: f32[8,2048], index: 3, kind: output, shape index: {}]  }
   0x1   :  { %s1274_s14 = smov 0  }
   0x2 LB: > { %s1087_s15 = sadd.s32 4294967295, %s1246_s14   ;;  %s1287_s16 = sadd.s32 1, %s1246_s14   ;;  %s1246_s14 = sphi %s1274_s14, %s1610_s14   ;;  %s1242_s13 = sphi %s1272_s13, %s1609_s13   ;;  %s1238_s12 = sphi %s1270_s12, %s1608_s12  }
   0x3   : > { %s17_s17 = ssub.s32 %s1246_s14, %s1287_s16  ;;  %s20_s18 = sadd.s32 1, %s1242_s13 }
   0x4   : > { %p18_p0 = scmp.eq.s32.totalorder %s17_s17, 0  ;;  %p27_p1 = scmp.ne.s32.totalorder %s1242_s13, %s1238_s12 }
   0x5   : > { %p28_p2 = scmp.eq.s32.totalorder %s1246_s14, 0  ;;  %p1090_p4 = scmp.ge.s32.totalorder %s1246_s14, 2 }
   0x6   : > { %s1296_s19 = scalar_select %p18_p0, %s1242_s13, %s20_s18  }
   0x7   : > { %p29_p3 = por %p28_p2, %p27_p1  ;;  %127 = sbr.rel (%p1090_p4) target bundleno = 57 (0x39), region = 24 }
   0xe   : > { %130 = sbr.rel (!%p29_p3) target bundleno = 57 (0x39), region = 28  ;;  %s132_s20 = sand.u32 (%p29_p3), 1, %s1242_s13  }
   0xf   : > { %s1184_s21 = sshll.u32 (%p29_p3), %s1246_s14, 5  ;;  %s1185_s22 = smul.u32 (%p29_p3), 608, %s132_s20 }
  0x10   : > { %s1304_s25 = scalar_lea.vmem (%p29_p3), %s1604_s0, %s1184_s21 }
  0x11   : > { %v150_v0 = vld [vmem:[%s1304_s25] sm:$0xff] (%p29_p3)  ;;  %v152_v1 = vld [vmem:[%s1304_s25 + $0x8] sm:$0xff] (%p29_p3)  ;;  %v154_v2 = vld [vmem:[%s1304_s25 + $0x10] sm:$0xff] (%p29_p3)  ;;  %s1312_s26 = scalar_lea.vmem (%p29_p3), [#allocation2], %s1185_s22 }
  0x12   : > { %v156_v3 = vld [vmem:[%s1304_s25 + $0x18] sm:$0xff] (%p29_p3)  ;;  %v158_v4 = vld [vmem:[%s1304_s25 + $0x40] sm:$0xff] (%p29_p3)  ;;  %v160_v5 = vld [vmem:[%s1304_s25 + $0x48] sm:$0xff] (%p29_p3)  ;;  %151 = vst [vmem:[%s1312_s26] sm:$0xff] (%p29_p3), %v150_v0 }
  0x13   : > { %153 = vst [vmem:[%s1312_s26 + $0x8] sm:$0xff] (%p29_p3), %v152_v1  ;;  %155 = vst [vmem:[%s1312_s26 + $0x10] sm:$0xff] (%p29_p3), %v154_v2  ;;  %v162_v6 = vld [vmem:[%s1304_s25 + $0x50] sm:$0xff] (%p29_p3)  ;;  %v164_v7 = vld [vmem:[%s1304_s25 + $0x58] sm:$0xff] (%p29_p3) }
  0x14   : > { %157 = vst [vmem:[%s1312_s26 + $0x18] sm:$0xff] (%p29_p3), %v156_v3  ;;  %159 = vst [vmem:[%s1312_s26 + $0x20] sm:$0xff] (%p29_p3), %v158_v4  ;;  %v166_v8 = vld [vmem:[%s1304_s25 + $0x80] sm:$0xff] (%p29_p3)  ;;  %v168_v9 = vld [vmem:[%s1304_s25 + $0x88] sm:$0xff] (%p29_p3) }
  0x15   : > { %161 = vst [vmem:[%s1312_s26 + $0x28] sm:$0xff] %v160_v5  ;;  %163 = vst [vmem:[%s1312_s26 + $0x30] sm:$0xff] %v162_v6  ;;  %v170_v10 = vld [vmem:[%s1304_s25 + $0x90] sm:$0xff]  ;;  %v172_v11 = vld [vmem:[%s1304_s25 + $0x98] sm:$0xff] }
  0x16   : > { %165 = vst [vmem:[%s1312_s26 + $0x38] sm:$0xff] %v164_v7  ;;  %167 = vst [vmem:[%s1312_s26 + $0x40] sm:$0xff] %v166_v8  ;;  %v174_v12 = vld [vmem:[%s1304_s25 + $0xc0] sm:$0xff]  ;;  %v176_v13 = vld [vmem:[%s1304_s25 + $0xc8] sm:$0xff] }
  0x17   : > { %169 = vst [vmem:[%s1312_s26 + $0x48] sm:$0xff] %v168_v9  ;;  %171 = vst [vmem:[%s1312_s26 + $0x50] sm:$0xff] %v170_v10  ;;  %v178_v14 = vld [vmem:[%s1304_s25 + $0xd0] sm:$0xff]  ;;  %v180_v15 = vld [vmem:[%s1304_s25 + $0xd8] sm:$0xff] }
  0x18   : > { %173 = vst [vmem:[%s1312_s26 + $0x58] sm:$0xff] %v172_v11  ;;  %175 = vst [vmem:[%s1312_s26 + $0x60] sm:$0xff] %v174_v12  ;;  %v182_v16 = vld [vmem:[%s1304_s25 + $0x100] sm:$0xff]  ;;  %v184_v17 = vld [vmem:[%s1304_s25 + $0x108] sm:$0xff] }
  0x19   : > { %177 = vst [vmem:[%s1312_s26 + $0x68] sm:$0xff] %v176_v13  ;;  %179 = vst [vmem:[%s1312_s26 + $0x70] sm:$0xff] %v178_v14  ;;  %v186_v18 = vld [vmem:[%s1304_s25 + $0x110] sm:$0xff]  ;;  %v188_v19 = vld [vmem:[%s1304_s25 + $0x118] sm:$0xff] }
  0x1a   : > { %181 = vst [vmem:[%s1312_s26 + $0x78] sm:$0xff] %v180_v15  ;;  %183 = vst [vmem:[%s1312_s26 + $0x80] sm:$0xff] %v182_v16  ;;  %v190_v20 = vld [vmem:[%s1304_s25 + $0x140] sm:$0xff]  ;;  %v192_v21 = vld [vmem:[%s1304_s25 + $0x148] sm:$0xff] }
  0x1b   : > { %185 = vst [vmem:[%s1312_s26 + $0x88] sm:$0xff] %v184_v17  ;;  %187 = vst [vmem:[%s1312_s26 + $0x90] sm:$0xff] %v186_v18  ;;  %v194_v22 = vld [vmem:[%s1304_s25 + $0x150] sm:$0xff]  ;;  %v196_v23 = vld [vmem:[%s1304_s25 + $0x158] sm:$0xff] }
  0x1c   : > { %189 = vst [vmem:[%s1312_s26 + $0x98] sm:$0xff] %v188_v19  ;;  %191 = vst [vmem:[%s1312_s26 + $0xa0] sm:$0xff] %v190_v20  ;;  %v198_v24 = vld [vmem:[%s1304_s25 + $0x180] sm:$0xff]  ;;  %v200_v25 = vld [vmem:[%s1304_s25 + $0x188] sm:$0xff] }
  0x1d   : > { %193 = vst [vmem:[%s1312_s26 + $0xa8] sm:$0xff] %v192_v21  ;;  %195 = vst [vmem:[%s1312_s26 + $0xb0] sm:$0xff] %v194_v22  ;;  %v202_v26 = vld [vmem:[%s1304_s25 + $0x190] sm:$0xff]  ;;  %v204_v27 = vld [vmem:[%s1304_s25 + $0x198] sm:$0xff] }
  0x1e   : > { %197 = vst [vmem:[%s1312_s26 + $0xb8] sm:$0xff] %v196_v23  ;;  %199 = vst [vmem:[%s1312_s26 + $0xc0] sm:$0xff] %v198_v24  ;;  %v206_v28 = vld [vmem:[%s1304_s25 + $0x1c0] sm:$0xff]  ;;  %v208_v29 = vld [vmem:[%s1304_s25 + $0x1c8] sm:$0xff] }
  0x1f   : > { %201 = vst [vmem:[%s1312_s26 + $0xc8] sm:$0xff] %v200_v25  ;;  %203 = vst [vmem:[%s1312_s26 + $0xd0] sm:$0xff] %v202_v26  ;;  %v210_v30 = vld [vmem:[%s1304_s25 + $0x1d0] sm:$0xff]  ;;  %v212_v31 = vld [vmem:[%s1304_s25 + $0x1d8] sm:$0xff] }
  0x20   : > { %205 = vst [vmem:[%s1312_s26 + $0xd8] sm:$0xff] %v204_v27  ;;  %207 = vst [vmem:[%s1312_s26 + $0xe0] sm:$0xff] %v206_v28  ;;  %v214_v32 = vld [vmem:[%s1304_s25 + $0x200] sm:$0xff]  ;;  %v216_v33 = vld [vmem:[%s1304_s25 + $0x208] sm:$0xff] }
  0x21   : > { %209 = vst [vmem:[%s1312_s26 + $0xe8] sm:$0xff] %v208_v29  ;;  %211 = vst [vmem:[%s1312_s26 + $0xf0] sm:$0xff] %v210_v30  ;;  %v218_v34 = vld [vmem:[%s1304_s25 + $0x210] sm:$0xff]  ;;  %v220_v35 = vld [vmem:[%s1304_s25 + $0x218] sm:$0xff] }
  0x22   : > { %213 = vst [vmem:[%s1312_s26 + $0xf8] sm:$0xff] %v212_v31  ;;  %215 = vst [vmem:[%s1312_s26 + $0x100] sm:$0xff] %v214_v32  ;;  %v222_v36 = vld [vmem:[%s1304_s25 + $0x240] sm:$0xff]  ;;  %v224_v37 = vld [vmem:[%s1304_s25 + $0x248] sm:$0xff] }
  0x23   : > { %217 = vst [vmem:[%s1312_s26 + $0x108] sm:$0xff] %v216_v33  ;;  %219 = vst [vmem:[%s1312_s26 + $0x110] sm:$0xff] %v218_v34  ;;  %v226_v38 = vld [vmem:[%s1304_s25 + $0x250] sm:$0xff]  ;;  %v228_v39 = vld [vmem:[%s1304_s25 + $0x258] sm:$0xff] }
  0x24   : > { %221 = vst [vmem:[%s1312_s26 + $0x118] sm:$0xff] %v220_v35  ;;  %223 = vst [vmem:[%s1312_s26 + $0x120] sm:$0xff] %v222_v36  ;;  %v230_v40 = vld [vmem:[%s1304_s25 + $0x280] sm:$0xff]  ;;  %v232_v41 = vld [vmem:[%s1304_s25 + $0x288] sm:$0xff] }
  0x25   : > { %225 = vst [vmem:[%s1312_s26 + $0x128] sm:$0xff] %v224_v37  ;;  %227 = vst [vmem:[%s1312_s26 + $0x130] sm:$0xff] %v226_v38  ;;  %v234_v42 = vld [vmem:[%s1304_s25 + $0x290] sm:$0xff]  ;;  %v236_v43 = vld [vmem:[%s1304_s25 + $0x298] sm:$0xff] }
  0x26   : > { %229 = vst [vmem:[%s1312_s26 + $0x138] sm:$0xff] %v228_v39  ;;  %231 = vst [vmem:[%s1312_s26 + $0x140] sm:$0xff] %v230_v40  ;;  %v238_v44 = vld [vmem:[%s1304_s25 + $0x2c0] sm:$0xff]  ;;  %v240_v45 = vld [vmem:[%s1304_s25 + $0x2c8] sm:$0xff] }
  0x27   : > { %233 = vst [vmem:[%s1312_s26 + $0x148] sm:$0xff] %v232_v41  ;;  %235 = vst [vmem:[%s1312_s26 + $0x150] sm:$0xff] %v234_v42  ;;  %v242_v46 = vld [vmem:[%s1304_s25 + $0x2d0] sm:$0xff]  ;;  %v244_v47 = vld [vmem:[%s1304_s25 + $0x2d8] sm:$0xff] }
  0x28   : > { %237 = vst [vmem:[%s1312_s26 + $0x158] sm:$0xff] %v236_v43  ;;  %239 = vst [vmem:[%s1312_s26 + $0x160] sm:$0xff] %v238_v44  ;;  %v246_v48 = vld [vmem:[%s1304_s25 + $0x300] sm:$0xff]  ;;  %v248_v49 = vld [vmem:[%s1304_s25 + $0x308] sm:$0xff] }
  0x29   : > { %241 = vst [vmem:[%s1312_s26 + $0x168] sm:$0xff] %v240_v45  ;;  %243 = vst [vmem:[%s1312_s26 + $0x170] sm:$0xff] %v242_v46  ;;  %v250_v50 = vld [vmem:[%s1304_s25 + $0x310] sm:$0xff]  ;;  %v252_v51 = vld [vmem:[%s1304_s25 + $0x318] sm:$0xff] }
  0x2a   : > { %245 = vst [vmem:[%s1312_s26 + $0x178] sm:$0xff] %v244_v47  ;;  %247 = vst [vmem:[%s1312_s26 + $0x180] sm:$0xff] %v246_v48  ;;  %v254_v52 = vld [vmem:[%s1304_s25 + $0x340] sm:$0xff]  ;;  %v256_v53 = vld [vmem:[%s1304_s25 + $0x348] sm:$0xff] }
  0x2b   : > { %249 = vst [vmem:[%s1312_s26 + $0x188] sm:$0xff] %v248_v49  ;;  %251 = vst [vmem:[%s1312_s26 + $0x190] sm:$0xff] %v250_v50  ;;  %v258_v54 = vld [vmem:[%s1304_s25 + $0x350] sm:$0xff]  ;;  %v260_v55 = vld [vmem:[%s1304_s25 + $0x358] sm:$0xff] }
  0x2c   : > { %253 = vst [vmem:[%s1312_s26 + $0x198] sm:$0xff] %v252_v51  ;;  %255 = vst [vmem:[%s1312_s26 + $0x1a0] sm:$0xff] %v254_v52  ;;  %v262_v56 = vld [vmem:[%s1304_s25 + $0x380] sm:$0xff]  ;;  %v264_v57 = vld [vmem:[%s1304_s25 + $0x388] sm:$0xff] }
  0x2d   : > { %257 = vst [vmem:[%s1312_s26 + $0x1a8] sm:$0xff] %v256_v53  ;;  %259 = vst [vmem:[%s1312_s26 + $0x1b0] sm:$0xff] %v258_v54  ;;  %v266_v58 = vld [vmem:[%s1304_s25 + $0x390] sm:$0xff]  ;;  %v268_v59 = vld [vmem:[%s1304_s25 + $0x398] sm:$0xff] }
  0x2e   : > { %261 = vst [vmem:[%s1312_s26 + $0x1b8] sm:$0xff] %v260_v55  ;;  %263 = vst [vmem:[%s1312_s26 + $0x1c0] sm:$0xff] %v262_v56  ;;  %v270_v60 = vld [vmem:[%s1304_s25 + $0x3c0] sm:$0xff]  ;;  %v272_v61 = vld [vmem:[%s1304_s25 + $0x3c8] sm:$0xff] }
  0x2f   : > { %265 = vst [vmem:[%s1312_s26 + $0x1c8] sm:$0xff] %v264_v57  ;;  %267 = vst [vmem:[%s1312_s26 + $0x1d0] sm:$0xff] %v266_v58  ;;  %v274_v62 = vld [vmem:[%s1304_s25 + $0x3d0] sm:$0xff]  ;;  %v276_v63 = vld [vmem:[%s1304_s25 + $0x3d8] sm:$0xff] }
  0x30   : > { %269 = vst [vmem:[%s1312_s26 + $0x1d8] sm:$0xff] %v268_v59  ;;  %271 = vst [vmem:[%s1312_s26 + $0x1e0] sm:$0xff] %v270_v60  ;;  %v278_v0 = vld [vmem:[%s1304_s25 + $0x400] sm:$0xff]  ;;  %v280_v1 = vld [vmem:[%s1304_s25 + $0x408] sm:$0xff] }
  0x31   : > { %273 = vst [vmem:[%s1312_s26 + $0x1e8] sm:$0xff] %v272_v61  ;;  %275 = vst [vmem:[%s1312_s26 + $0x1f0] sm:$0xff] %v274_v62  ;;  %v282_v2 = vld [vmem:[%s1304_s25 + $0x410] sm:$0xff]  ;;  %v284_v3 = vld [vmem:[%s1304_s25 + $0x418] sm:$0xff] }
  0x32   : > { %277 = vst [vmem:[%s1312_s26 + $0x1f8] sm:$0xff] %v276_v63  ;;  %279 = vst [vmem:[%s1312_s26 + $0x200] sm:$0xff] %v278_v0  ;;  %v286_v4 = vld [vmem:[%s1304_s25 + $0x440] sm:$0xff]  ;;  %v288_v5 = vld [vmem:[%s1304_s25 + $0x448] sm:$0xff] }
  0x33   : > { %281 = vst [vmem:[%s1312_s26 + $0x208] sm:$0xff] %v280_v1  ;;  %283 = vst [vmem:[%s1312_s26 + $0x210] sm:$0xff] %v282_v2  ;;  %v290_v6 = vld [vmem:[%s1304_s25 + $0x450] sm:$0xff]  ;;  %v292_v7 = vld [vmem:[%s1304_s25 + $0x458] sm:$0xff] }
  0x34   : > { %285 = vst [vmem:[%s1312_s26 + $0x218] sm:$0xff] %v284_v3  ;;  %287 = vst [vmem:[%s1312_s26 + $0x220] sm:$0xff] %v286_v4  ;;  %v294_v8 = vld [vmem:[%s1304_s25 + $0x480] sm:$0xff]  ;;  %v296_v9 = vld [vmem:[%s1304_s25 + $0x488] sm:$0xff] }
  0x35   : > { %289 = vst [vmem:[%s1312_s26 + $0x228] sm:$0xff] %v288_v5  ;;  %291 = vst [vmem:[%s1312_s26 + $0x230] sm:$0xff] %v290_v6  ;;  %v298_v10 = vld [vmem:[%s1304_s25 + $0x490] sm:$0xff]  ;;  %v300_v11 = vld [vmem:[%s1304_s25 + $0x498] sm:$0xff] }
  0x36   : > { %293 = vst [vmem:[%s1312_s26 + $0x238] sm:$0xff] %v292_v7  ;;  %295 = vst [vmem:[%s1312_s26 + $0x240] sm:$0xff] %v294_v8 }
  0x37   : > { %297 = vst [vmem:[%s1312_s26 + $0x248] sm:$0xff] %v296_v9  ;;  %299 = vst [vmem:[%s1312_s26 + $0x250] sm:$0xff] %v298_v10 }
  0x38   : > { %301 = vst [vmem:[%s1312_s26 + $0x258] sm:$0xff] %v300_v11 }
  0x39 PF: > { %p1093_p5 = scmp.ge.s32.totalorder %s1246_s14, 1  ;;  %p306_p6 = scmp.lt.s32.totalorder %s1246_s14, 3 }
  0x3b   : > { %p307_p7 = pnand %p1093_p5, %p306_p6 }
  0x3c   : > { %s313_s27 = sand.u32 (!%p307_p7), 1, %s1238_s12   ;;  %v1466_v12 = vld [vmem:[%s1605_s1] sm:$0xff] (!%p307_p7)  ;;  %vm813_vm0 = vcmask (!%p307_p7), 154624   ;;  %v1248_v15 = vmov (!%p307_p7), 0   ;;  %vm817_vm1 = vcmask (!%p307_p7), 1040384   ;;  %vm818_vm2 = vcmask (!%p307_p7), 1041408  }
  0x3d   : > { %310 = sbr.rel (%p307_p7) target bundleno = 367 (0x16f), region = 51  ;;  %v1470_v13 = vcombine.high (!%p307_p7), %v1466_v12, %v1466_v12  ;;  %v421_v14 = vld [vmem:[%s1606_s2] sm:$0xff] (!%p307_p7)  ;;  %1213 = vset.pattern.permute.xlu0 (!%p307_p7), %v1248_v15  ;;  %s1094_s7 = sshll.u32 (!%p307_p7), %s1087_s15, 3 }
  0x3e   : > { %s1186_s30 = smul.u32 (!%p307_p7), 608, %s313_s27  ;;  %424 = vperm.xlu0 (!%p307_p7), %1213, %v421_v14   ;;  %p338_p8 = scmp.lt.s32.totalorder (!%p307_p7), %s1094_s7, 15 }
  0x3f   : > { %1178 = vmatprep.mubr.msk.bf16.mxu0 (!%p307_p7), %vm813_vm0, %v1470_v13  ;;  %1179 = vmatprep.mubr.msk.bf16.mxu1 (!%p307_p7), %vm813_vm0, %v1470_v13 }
  0x40   : > { %s1479_s6 = scalar_lea.vmem (!%p307_p7), [#allocation2], %s1186_s30 }
  0x41   : > { %v345_v16 = vld [vmem:[%s1479_s6] sm:$0xff] (!%p307_p7)  ;;  %v346_v18 = vld [vmem:[%s1479_s6 + $0x8] sm:$0xff] (!%p307_p7) }
  0x42   : > { %v349_v17 = vld [vmem:[%s1479_s6 + $0x20] sm:$0xff] (!%p307_p7)  ;;  %v350_v20 = vld [vmem:[%s1479_s6 + $0x28] sm:$0xff] (!%p307_p7) }
  0x43   : > { %v1099_v19 = vcombine.high (!%p307_p7), %v345_v16, %v349_v17  ;;  %v1098_v21 = vcombine.low (!%p307_p7), %v345_v16, %v349_v17  ;;  %v353_v22 = vld [vmem:[%s1479_s6 + $0x40] sm:$0xff] (!%p307_p7)  ;;  %v1101_v24 = vcombine.high (!%p307_p7), %v346_v18, %v350_v20  ;;  %v1100_v25 = vcombine.low (!%p307_p7), %v346_v18, %v350_v20  ;;  %v354_v27 = vld [vmem:[%s1479_s6 + $0x48] sm:$0xff] (!%p307_p7) }
  0x44   : > { %v357_v23 = vld [vmem:[%s1479_s6 + $0x60] sm:$0xff]  ;;  %v358_v28 = vld [vmem:[%s1479_s6 + $0x68] sm:$0xff]  ;;  %s1612_s7 = smov (!%p338_p8, %s1094_s7), 15 }
  0x45   : > { %v1107_v26 = vcombine.high %v353_v22, %v357_v23  ;;  %v361_v29 = vld [vmem:[%s1479_s6 + $0x80] sm:$0xff]  ;;  %845 = vmatprep.subr.bf16.mxu0 %v1099_v19  ;;  %v1109_v30 = vcombine.high %v354_v27, %v358_v28  ;;  %v362_v32 = vld [vmem:[%s1479_s6 + $0x88] sm:$0xff]  ;;  %886 = vmatprep.subr.bf16.mxu1 %v1101_v24  ;;  %v1106_v34 = vcombine.low %v353_v22, %v357_v23  ;;  %s1095_s8 = sshll.u32 %s1612_s7, 3 }
  0x46   : > { %v365_v31 = vld [vmem:[%s1479_s6 + $0xa0] sm:$0xff]  ;;  %v366_v33 = vld [vmem:[%s1479_s6 + $0xa8] sm:$0xff]  ;;  %846 = vmatpush1.bf16.msra.mxu0 %v1098_v21  ;;  %887 = vmatpush1.bf16.msra.mxu1 %v1100_v25  ;;  %v1108_v35 = vcombine.low %v354_v27, %v358_v28  ;;  %v1249_v21 = vmov 65535   ;;  %s1584_s11 = scalar_lea.vmem %s1607_s3, %s1095_s8 }
  0x47   : > { %847 = vmatprep.subr.bf16.mxu0 %v1107_v26  ;;  %v1115_v36 = vcombine.high %v361_v29, %v365_v31  ;;  %888 = vmatprep.subr.bf16.mxu1 %v1109_v30  ;;  %v1117_v37 = vcombine.high %v362_v32, %v366_v33  ;;  %v369_v38 = vld [vmem:[%s1479_s6 + $0xc0] sm:$0xff]  ;;  %v370_v40 = vld [vmem:[%s1479_s6 + $0xc8] sm:$0xff]  ;;  %v1114_v42 = vcombine.low %v361_v29, %v365_v31  ;;  %v819_v22 = vsel %vm817_vm1, 4294967295, %v1249_v21 }
  0x48   : > { %v373_v39 = vld [vmem:[%s1479_s6 + $0xe0] sm:$0xff]  ;;  %v374_v41 = vld [vmem:[%s1479_s6 + $0xe8] sm:$0xff]  ;;  %v1116_v43 = vcombine.low %v362_v32, %v366_v33  ;;  %v1519_v29 = vsel %vm818_vm2, %v819_v22, 0  ;;  %v395_v22 = vld [vmem:[%s1479_s6 + $0x190] sm:$0xff] }
  0x49   : > { %v1123_v44 = vcombine.high %v369_v38, %v373_v39  ;;  %v1125_v45 = vcombine.high %v370_v40, %v374_v41  ;;  %v377_v46 = vld [vmem:[%s1479_s6 + $0x100] sm:$0xff]  ;;  %v378_v48 = vld [vmem:[%s1479_s6 + $0x108] sm:$0xff]  ;;  %v1122_v50 = vcombine.low %v369_v38, %v373_v39  ;;  %v1124_v51 = vcombine.low %v370_v40, %v374_v41  ;;  %v351_v38 = vld [vmem:[%s1479_s6 + $0x30] sm:$0xff] }
  0x4a   : > { %848 = vmatpush1.bf16.msra.mxu0 %v1106_v34  ;;  %889 = vmatpush1.bf16.msra.mxu1 %v1108_v35  ;;  %v381_v47 = vld [vmem:[%s1479_s6 + $0x120] sm:$0xff]  ;;  %v382_v49 = vld [vmem:[%s1479_s6 + $0x128] sm:$0xff]  ;;  %v348_v39 = vld [vmem:[%s1479_s6 + $0x18] sm:$0xff] }
  0x4b   : > { %849 = vmatprep.subr.bf16.mxu0 %v1115_v36  ;;  %890 = vmatprep.subr.bf16.mxu1 %v1117_v37  ;;  %v1131_v52 = vcombine.high %v377_v46, %v381_v47  ;;  %v1133_v53 = vcombine.high %v378_v48, %v382_v49  ;;  %v385_v54 = vld [vmem:[%s1479_s6 + $0x140] sm:$0xff]  ;;  %v386_v56 = vld [vmem:[%s1479_s6 + $0x148] sm:$0xff]  ;;  %v1130_v58 = vcombine.low %v377_v46, %v381_v47  ;;  %v347_v37 = vld [vmem:[%s1479_s6 + $0x10] sm:$0xff] }
  0x4c   : > { %v389_v55 = vld [vmem:[%s1479_s6 + $0x160] sm:$0xff]  ;;  %v390_v57 = vld [vmem:[%s1479_s6 + $0x168] sm:$0xff]  ;;  %v1132_v59 = vcombine.low %v378_v48, %v382_v49  ;;  %v352_v40 = vld [vmem:[%s1479_s6 + $0x38] sm:$0xff]  ;;  %v1533_v47 = vcombine.low %v1466_v12, %v1466_v12 }
  0x4d   : > { %v1139_v60 = vcombine.high %v385_v54, %v389_v55  ;;  %v1141_v61 = vcombine.high %v386_v56, %v390_v57  ;;  %v393_v62 = vld [vmem:[%s1479_s6 + $0x180] sm:$0xff]  ;;  %v394_v0 = vld [vmem:[%s1479_s6 + $0x188] sm:$0xff]  ;;  %v1138_v2 = vcombine.low %v385_v54, %v389_v55  ;;  %v1140_v3 = vcombine.low %v386_v56, %v390_v57  ;;  %v359_v46 = vld [vmem:[%s1479_s6 + $0x70] sm:$0xff] }
  0x4e   : > { %850 = vmatpush1.bf16.msra.mxu0 %v1114_v42  ;;  %891 = vmatpush1.bf16.msra.mxu1 %v1116_v43  ;;  %v397_v63 = vld [vmem:[%s1479_s6 + $0x1a0] sm:$0xff]  ;;  %v398_v1 = vld [vmem:[%s1479_s6 + $0x1a8] sm:$0xff]  ;;  %v1103_v43 = vcombine.high %v347_v37, %v351_v38  ;;  %v356_v48 = vld [vmem:[%s1479_s6 + $0x58] sm:$0xff] }
  0x4f   : > { %851 = vmatprep.subr.bf16.mxu0 %v1123_v44  ;;  %892 = vmatprep.subr.bf16.mxu1 %v1125_v45  ;;  %v1147_v4 = vcombine.high %v393_v62, %v397_v63  ;;  %v1149_v5 = vcombine.high %v394_v0, %v398_v1  ;;  %v401_v6 = vld [vmem:[%s1479_s6 + $0x1c0] sm:$0xff]  ;;  %v402_v8 = vld [vmem:[%s1479_s6 + $0x1c8] sm:$0xff]  ;;  %v1146_v10 = vcombine.low %v393_v62, %v397_v63  ;;  %v355_v45 = vld [vmem:[%s1479_s6 + $0x50] sm:$0xff] }
  0x50   : > { %v405_v7 = vld [vmem:[%s1479_s6 + $0x1e0] sm:$0xff]  ;;  %v406_v9 = vld [vmem:[%s1479_s6 + $0x1e8] sm:$0xff]  ;;  %v1148_v11 = vcombine.low %v394_v0, %v398_v1  ;;  %v1105_v44 = vcombine.high %v348_v39, %v352_v40  ;;  %v360_v49 = vld [vmem:[%s1479_s6 + $0x78] sm:$0xff]  ;;  %v1110_v57 = vcombine.low %v355_v45, %v359_v46 }
  0x51   : > { %v1155_v14 = vcombine.high %v401_v6, %v405_v7  ;;  %v1157_v15 = vcombine.high %v402_v8, %v406_v9  ;;  %v409_v16 = vld [vmem:[%s1479_s6 + $0x200] sm:$0xff]  ;;  %v410_v19 = vld [vmem:[%s1479_s6 + $0x208] sm:$0xff]  ;;  %v1154_v24 = vcombine.low %v401_v6, %v405_v7  ;;  %v1156_v25 = vcombine.low %v402_v8, %v406_v9  ;;  %v363_v54 = vld [vmem:[%s1479_s6 + $0x90] sm:$0xff] }
  0x52   : > { %852 = vmatpush1.bf16.msra.mxu0 %v1122_v50  ;;  %893 = vmatpush1.bf16.msra.mxu1 %v1124_v51  ;;  %v413_v17 = vld [vmem:[%s1479_s6 + $0x220] sm:$0xff]  ;;  %v414_v20 = vld [vmem:[%s1479_s6 + $0x228] sm:$0xff]  ;;  %v1102_v50 = vcombine.low %v347_v37, %v351_v38  ;;  %v1104_v51 = vcombine.low %v348_v39, %v352_v40  ;;  %v367_v55 = vld [vmem:[%s1479_s6 + $0xb0] sm:$0xff] }
  0x53   : > { %853 = vmatprep.subr.bf16.mxu0 %v1131_v52  ;;  %894 = vmatprep.subr.bf16.mxu1 %v1133_v53  ;;  %v417_v18 = vld [vmem:[%s1479_s6 + $0x240] sm:$0x33]  ;;  %v418_v23 = vld [vmem:[%s1479_s6 + $0x248] sm:$0x33]  ;;  %v1163_v26 = vcombine.high %v409_v16, %v413_v17  ;;  %v1165_v28 = vcombine.high %v410_v19, %v414_v20  ;;  %v1162_v31 = vcombine.low %v409_v16, %v413_v17  ;;  %v364_v12 = vld [vmem:[%s1479_s6 + $0x98] sm:$0xff] }
  0x54   : > { %v1171_v27 = vcombine.high %v417_v18, %v417_v18  ;;  %v1173_v30 = vcombine.high %v418_v23, %v418_v23  ;;  %v1170_v32 = vcombine.low %v417_v18, %v417_v18  ;;  %v1164_v33 = vcombine.low %v410_v19, %v414_v20  ;;  %v368_v56 = vld [vmem:[%s1479_s6 + $0xb8] sm:$0xff]  ;;  %v375_v62 = vld [vmem:[%s1479_s6 + $0xf0] sm:$0xff] }
  0x55   : > { %v1172_v35 = vcombine.low %v418_v23, %v418_v23  ;;  %v1111_v52 = vcombine.high %v355_v45, %v359_v46  ;;  %v1113_v53 = vcombine.high %v356_v48, %v360_v49  ;;  %v372_v63 = vld [vmem:[%s1479_s6 + $0xd8] sm:$0xff]  ;;  %v1118_v1 = vcombine.low %v363_v54, %v367_v55  ;;  %v383_v6 = vld [vmem:[%s1479_s6 + $0x130] sm:$0xff] }
  0x56   : > { %854 = vmatpush1.bf16.msra.mxu0 %v1130_v58  ;;  %895 = vmatpush1.bf16.msra.mxu1 %v1132_v59  ;;  %v825_v34 = vand.u32 %v1171_v27, %v1519_v29  ;;  %v831_v36 = vand.u32 %v1173_v30, %v1519_v29  ;;  %v822_v41 = vand.u32 %v1170_v32, %v1519_v29  ;;  %v376_v0 = vld [vmem:[%s1479_s6 + $0xf8] sm:$0xff]  ;;  %v399_v23 = vld [vmem:[%s1479_s6 + $0x1b0] sm:$0xff] }
  0x57   : > { %855 = vmatprep.subr.bf16.mxu0 %v1139_v60  ;;  %896 = vmatprep.subr.bf16.mxu1 %v1141_v61  ;;  %v828_v42 = vand.u32 %v1172_v35, %v1519_v29  ;;  %v1112_v58 = vcombine.low %v356_v48, %v360_v49  ;;  %v1119_v59 = vcombine.high %v363_v54, %v367_v55  ;;  %v371_v61 = vld [vmem:[%s1479_s6 + $0xd0] sm:$0xff]  ;;  %v380_v7 = vld [vmem:[%s1479_s6 + $0x118] sm:$0xff] }
  0x58   : > { %v1121_v60 = vcombine.high %v364_v12, %v368_v56  ;;  %v384_v8 = vld [vmem:[%s1479_s6 + $0x138] sm:$0xff]  ;;  %v1126_v9 = vcombine.low %v371_v61, %v375_v62  ;;  %v407_v32 = vld [vmem:[%s1479_s6 + $0x1f0] sm:$0xff]  ;;  %v1150_v35 = vcombine.low %v395_v22, %v399_v23 }
  0x59   : > { %v388_v16 = vld [vmem:[%s1479_s6 + $0x158] sm:$0xff]  ;;  %v1136_v19 = vcombine.low %v380_v7, %v384_v8  ;;  %v411_v39 = vld [vmem:[%s1479_s6 + $0x210] sm:$0xff] }
  0x5a   : > { %856 = vmatpush1.bf16.msra.mxu0 %v1138_v2  ;;  %897 = vmatpush1.bf16.msra.mxu1 %v1140_v3  ;;  %v1120_v2 = vcombine.low %v364_v12, %v368_v56  ;;  %v1127_v3 = vcombine.high %v371_v61, %v375_v62  ;;  %v392_v17 = vld [vmem:[%s1479_s6 + $0x178] sm:$0xff]  ;;  %v415_v40 = vld [vmem:[%s1479_s6 + $0x230] sm:$0xff] }
  0x5b   : > { %857 = vmatprep.subr.bf16.mxu0 %v1147_v4  ;;  %898 = vmatprep.subr.bf16.mxu1 %v1149_v5  ;;  %v1129_v4 = vcombine.high %v372_v63, %v376_v0  ;;  %v379_v5 = vld [vmem:[%s1479_s6 + $0x110] sm:$0xff]  ;;  %v1145_v21 = vcombine.high %v388_v16, %v392_v17  ;;  %v1144_v27 = vcombine.low %v388_v16, %v392_v17 }
  0x5c   : > { %v1134_v18 = vcombine.low %v379_v5, %v383_v6  ;;  %v1167_v48 = vcombine.high %v411_v39, %v415_v40 }
  0x5e   : > { %858 = vmatpush1.bf16.msra.mxu0 %v1146_v10  ;;  %899 = vmatpush1.bf16.msra.mxu1 %v1148_v11  ;;  %v1135_v10 = vcombine.high %v379_v5, %v383_v6  ;;  %v1137_v11 = vcombine.high %v380_v7, %v384_v8 }
  0x5f   : > { %859 = vmatprep.subr.bf16.mxu0 %v1155_v14  ;;  %900 = vmatprep.subr.bf16.mxu1 %v1157_v15  ;;  %v387_v14 = vld [vmem:[%s1479_s6 + $0x150] sm:$0xff] }
  0x60   : > { %v391_v15 = vld [vmem:[%s1479_s6 + $0x170] sm:$0xff] }
  0x61   : > { %v1143_v20 = vcombine.high %v387_v14, %v391_v15 }
  0x62   : > { %860 = vmatpush1.bf16.msra.mxu0 %v1154_v24  ;;  %901 = vmatpush1.bf16.msra.mxu1 %v1156_v25  ;;  %v396_v24 = vld [vmem:[%s1479_s6 + $0x198] sm:$0xff] }
  0x63   : > { %861 = vmatprep.subr.bf16.mxu0 %v1163_v26  ;;  %902 = vmatprep.subr.bf16.mxu1 %v1165_v28  ;;  %v400_v25 = vld [vmem:[%s1479_s6 + $0x1b8] sm:$0xff]  ;;  %v1142_v26 = vcombine.low %v387_v14, %v391_v15  ;;  %v1151_v28 = vcombine.high %v395_v22, %v399_v23 }
  0x64   : > { %v1153_v30 = vcombine.high %v396_v24, %v400_v25 }
  0x66   : > { %862 = vmatpush1.bf16.msra.mxu0 %v1162_v31  ;;  %903 = vmatpush1.bf16.msra.mxu1 %v1164_v33  ;;  %v403_v31 = vld [vmem:[%s1479_s6 + $0x1d0] sm:$0xff]  ;;  %v404_v33 = vld [vmem:[%s1479_s6 + $0x1d8] sm:$0xff] }
  0x67   : > { %863 = vmatprep.subr.bf16.mxu0 %v825_v34  ;;  %904 = vmatprep.subr.bf16.mxu1 %v831_v36  ;;  %v408_v34 = vld [vmem:[%s1479_s6 + $0x1f8] sm:$0xff]  ;;  %v1152_v36 = vcombine.low %v396_v24, %v400_v25  ;;  %v1159_v37 = vcombine.high %v403_v31, %v407_v32  ;;  %v1158_v45 = vcombine.low %v403_v31, %v407_v32 }
  0x68   : > { %v1161_v38 = vcombine.high %v404_v33, %v408_v34  ;;  %v1160_v46 = vcombine.low %v404_v33, %v408_v34 }
  0x6a   : > { %864 = vmatpush1.bf16.msra.mxu0 %v822_v41  ;;  %905 = vmatpush1.bf16.msra.mxu1 %v828_v42  ;;  %v419_v41 = vld [vmem:[%s1479_s6 + $0x250] sm:$0x33]  ;;  %v412_v42 = vld [vmem:[%s1479_s6 + $0x218] sm:$0xff] }
  0x6b   : > { %927 = vmatprep.subr.bf16.mxu0 %v1103_v43  ;;  %968 = vmatprep.subr.bf16.mxu1 %v1105_v44  ;;  %v416_v43 = vld [vmem:[%s1479_s6 + $0x238] sm:$0xff]  ;;  %v1175_v49 = vcombine.high %v419_v41, %v419_v41 }
  0x6c   : > { %v420_v44 = vld [vmem:[%s1479_s6 + $0x258] sm:$0x33]  ;;  %v1168_v54 = vcombine.low %v412_v42, %v416_v43 }
  0x6d   : > { %878 = vmatmul.mubr.bf16.vlgmr.msra.gmra.mrb[0].mxu0 %v1533_v47  ;;  %919 = vmatmul.mubr.bf16.vlgmr.msra.gmra.mrb[0].mxu1 %v1533_v47  ;;  %v837_v55 = vand.u32 %v1175_v49, %v1519_v29  ;;  %v1176_v12 = vcombine.low %v420_v44, %v420_v44 }
  0x6e   : > { %928 = vmatpush1.bf16.msra.mxu0 %v1102_v50  ;;  %969 = vmatpush1.bf16.msra.mxu1 %v1104_v51  ;;  %v1169_v50 = vcombine.high %v412_v42, %v416_v43  ;;  %v1177_v51 = vcombine.high %v420_v44, %v420_v44 }
  0x6f   : > { %929 = vmatprep.subr.bf16.mxu0 %v1111_v52  ;;  %970 = vmatprep.subr.bf16.mxu1 %v1113_v53  ;;  %v1166_v52 = vcombine.low %v411_v39, %v415_v40  ;;  %v1174_v53 = vcombine.low %v419_v41, %v419_v41 }
  0x70   : > { %1180 = vmatprep.mubr.msk.bf16.mxu0 %vm813_vm0, %v1470_v13  ;;  %1181 = vmatprep.mubr.msk.bf16.mxu1 %vm813_vm0, %v1470_v13  ;;  %v1128_v13 = vcombine.low %v372_v63, %v376_v0  ;;  %v843_v56 = vand.u32 %v1177_v51, %v1519_v29 }
  0x72   : > { %930 = vmatpush1.bf16.msra.mxu0 %v1110_v57  ;;  %971 = vmatpush1.bf16.msra.mxu1 %v1112_v58  ;;  %v834_v57 = vand.u32 %v1174_v53, %v1519_v29  ;;  %v840_v58 = vand.u32 %v1176_v12, %v1519_v29 }
  0x73   : > { %931 = vmatprep.subr.bf16.mxu0 %v1119_v59  ;;  %972 = vmatprep.subr.bf16.mxu1 %v1121_v60 }
  0x76   : > { %932 = vmatpush1.bf16.msra.mxu0 %v1118_v1  ;;  %973 = vmatpush1.bf16.msra.mxu1 %v1120_v2 }
  0x77   : > { %933 = vmatprep.subr.bf16.mxu0 %v1127_v3  ;;  %974 = vmatprep.subr.bf16.mxu1 %v1129_v4 }
  0x7a   : > { %934 = vmatpush1.bf16.msra.mxu0 %v1126_v9  ;;  %975 = vmatpush1.bf16.msra.mxu1 %v1128_v13 }
  0x7b   : > { %935 = vmatprep.subr.bf16.mxu0 %v1135_v10  ;;  %976 = vmatprep.subr.bf16.mxu1 %v1137_v11 }
  0x7e   : > { %936 = vmatpush1.bf16.msra.mxu0 %v1134_v18  ;;  %977 = vmatpush1.bf16.msra.mxu1 %v1136_v19 }
  0x7f   : > { %937 = vmatprep.subr.bf16.mxu0 %v1143_v20  ;;  %978 = vmatprep.subr.bf16.mxu1 %v1145_v21 }
  0x82   : > { %938 = vmatpush1.bf16.msra.mxu0 %v1142_v26  ;;  %979 = vmatpush1.bf16.msra.mxu1 %v1144_v27 }
  0x83   : > { %939 = vmatprep.subr.bf16.mxu0 %v1151_v28  ;;  %980 = vmatprep.subr.bf16.mxu1 %v1153_v30 }
  0x86   : > { %940 = vmatpush1.bf16.msra.mxu0 %v1150_v35  ;;  %981 = vmatpush1.bf16.msra.mxu1 %v1152_v36 }
  0x87   : > { %941 = vmatprep.subr.bf16.mxu0 %v1159_v37  ;;  %982 = vmatprep.subr.bf16.mxu1 %v1161_v38 }
  0x8a   : > { %942 = vmatpush1.bf16.msra.mxu0 %v1158_v45  ;;  %983 = vmatpush1.bf16.msra.mxu1 %v1160_v46 }
  0x8b   : > { %943 = vmatprep.subr.bf16.mxu0 %v1167_v48  ;;  %984 = vmatprep.subr.bf16.mxu1 %v1169_v50 }
  0x8e   : > { %944 = vmatpush1.bf16.msra.mxu0 %v1166_v52  ;;  %985 = vmatpush1.bf16.msra.mxu1 %v1168_v54 }
  0x8f   : > { %945 = vmatprep.subr.bf16.mxu0 %v837_v55  ;;  %986 = vmatprep.subr.bf16.mxu1 %v843_v56 }
  0x92   : > { %946 = vmatpush1.bf16.msra.mxu0 %v834_v57  ;;  %987 = vmatpush1.bf16.msra.mxu1 %v840_v58 }
  0x95   : > { %960 = vmatmul.mubr.bf16.vlgmr.msra.gmra.mrb[4].mxu0 %v1533_v47  ;;  %1001 = vmatmul.mubr.bf16.vlgmr.msra.gmra.mrb[4].mxu1 %v1533_v47 }
  0xbd   : > { %v425_v59 = vpop.permute.xlu0 %424 }
 0x140   : > { %v879_v60 = vpop.f32.mrb[0].mxu0  ;;  %v920_v61 = vpop.f32.mrb[0].mxu1 }
 0x141   : > { %v880_v62 = vadd.f32 %v879_v60, %v425_v59  ;;  %v881_v63 = vpop.f32.mrb[1].mxu0  ;;  %v921_v29 = vadd.f32 %v920_v61, %v425_v59  ;;  %v922_v0 = vpop.f32.mrb[1].mxu1 }
 0x142   : > { %v882_v47 = vadd.f32 %v881_v63, %v425_v59  ;;  %v883_v1 = vpop.f32.mrb[2].mxu0  ;;  %v923_v3 = vadd.f32 %v922_v0, %v425_v59  ;;  %v924_v4 = vpop.f32.mrb[2].mxu1 }
 0x143   : > { %v1009_v2 = vmax.f32 %v880_v62, 0.0  ;;  %v884_v5 = vpop.f32.mrb[3].mxu0  ;;  %v1011_v6 = vmax.f32 %v921_v29, 0.0  ;;  %v925_v8 = vpop.f32.mrb[3].mxu1 }
 0x144   : > { %v1010_v7 = vmax.f32 %v882_v47, 0.0  ;;  %v1012_v9 = vmax.f32 %v923_v3, 0.0 }
 0x145   : > { %1017 = vst [vmem:[%s1584_s11] sm:$0xff] %v1009_v2  ;;  %1019 = vst [vmem:[%s1584_s11 + $0x10] sm:$0xff] %v1011_v6 }
 0x146   : > { %1018 = vst [vmem:[%s1584_s11 + $0x8] sm:$0xff] %v1010_v7  ;;  %1020 = vst [vmem:[%s1584_s11 + $0x18] sm:$0xff] %v1012_v9 }
 0x168   : > { %v961_v13 = vpop.f32.mrb[4].mxu0  ;;  %v1002_v11 = vpop.f32.mrb[4].mxu1 }
 0x169   : > { %v962_v10 = vadd.f32 %v961_v13, %v425_v59  ;;  %v963_v14 = vpop.f32.mrb[5].mxu0  ;;  %v1003_v15 = vadd.f32 %v1002_v11, %v425_v59  ;;  %v1004_v17 = vpop.f32.mrb[5].mxu1 }
 0x16a   : > { %v964_v16 = vadd.f32 %v963_v14, %v425_v59  ;;  %v965_v18 = vpop.f32.mrb[6].mxu0  ;;  %v1005_v20 = vadd.f32 %v1004_v17, %v425_v59  ;;  %v1006_v21 = vpop.f32.mrb[6].mxu1 }
 0x16b   : > { %v1013_v19 = vmax.f32 %v962_v10, 0.0  ;;  %v966_v22 = vpop.f32.mrb[7].mxu0  ;;  %v1015_v23 = vmax.f32 %v1003_v15, 0.0  ;;  %v1007_v25 = vpop.f32.mrb[7].mxu1 }
 0x16c   : > { %v1014_v24 = vmax.f32 %v964_v16, 0.0  ;;  %v1016_v26 = vmax.f32 %v1005_v20, 0.0 }
 0x16d   : > { %1021 = vst [vmem:[%s1584_s11 + $0x20] sm:$0xff] %v1013_v19  ;;  %1023 = vst [vmem:[%s1584_s11 + $0x30] sm:$0xff] %v1015_v23 }
 0x16e   : > { %1022 = vst [vmem:[%s1584_s11 + $0x28] sm:$0xff] %v1014_v24  ;;  %1024 = vst [vmem:[%s1584_s11 + $0x38] sm:$0xff] %v1016_v26 }
 0x16f PF: > { %p10_p9 = scmp.ge.s32.totalorder %s1287_s16, 4   ;;  %s1608_s12 = smov %s1242_s13 }
 0x170   : > { %s1609_s13 = smov %s1296_s19  ;;  %s1610_s14 = smov %s1287_s16 }
 0x171   :  { %12 = sbr.rel (!%p10_p9) target bundleno = 2 (0x2), region = 90 }

// kernel: backbone_forward.19
= control target key start
LH: loop header
LB: loop body
LE: loop exit
PB: predicated region body
PF: predicated region fallthrough
CT: control target
= control target key end

     0   :  { %s214_s0 = inlined_call_operand.vmem [shape: f32[9,8,512], index: 0, kind: input, shape index: {}]   ;;  %s215_s1 = inlined_call_operand.vmem [shape: f32[8,512], index: 1, kind: output, shape index: {}]  }
   0x1   :  { %v8_v0 = vld [vmem:[%s214_s0] sm:$0xff]  ;;  %v9_v6 = vld [vmem:[%s214_s0 + $0x8] sm:$0xff]  ;;  %v10_v15 = vld [vmem:[%s214_s0 + $0x10] sm:$0xff] }
   0x2   :  { %v12_v1 = vld [vmem:[%s214_s0 + $0x20] sm:$0xff]  ;;  %v13_v7 = vld [vmem:[%s214_s0 + $0x28] sm:$0xff]  ;;  %v14_v16 = vld [vmem:[%s214_s0 + $0x30] sm:$0xff] }
   0x3   :  { %v16_v2 = vld [vmem:[%s214_s0 + $0x40] sm:$0xff]  ;;  %v44_v3 = vmax.f32 %v8_v0, %v12_v1  ;;  %v17_v8 = vld [vmem:[%s214_s0 + $0x48] sm:$0xff]  ;;  %v52_v10 = vmax.f32 %v9_v6, %v13_v7  ;;  %v18_v17 = vld [vmem:[%s214_s0 + $0x50] sm:$0xff]  ;;  %v60_v20 = vmax.f32 %v10_v15, %v14_v16 }
   0x4   :  { %v20_v4 = vld [vmem:[%s214_s0 + $0x60] sm:$0xff]  ;;  %v21_v13 = vld [vmem:[%s214_s0 + $0x68] sm:$0xff]  ;;  %v22_v24 = vld [vmem:[%s214_s0 + $0x70] sm:$0xff] }
   0x5   :  { %v45_v5 = vmax.f32 %v44_v3, %v16_v2  ;;  %v24_v9 = vld [vmem:[%s214_s0 + $0x80] sm:$0xff]  ;;  %v53_v14 = vmax.f32 %v52_v10, %v17_v8  ;;  %v25_v19 = vld [vmem:[%s214_s0 + $0x88] sm:$0xff]  ;;  %v61_v26 = vmax.f32 %v60_v20, %v18_v17  ;;  %v11_v27 = vld [vmem:[%s214_s0 + $0x18] sm:$0xff] }
   0x6   :  { %v28_v11 = vld [vmem:[%s214_s0 + $0xa0] sm:$0xff]  ;;  %v29_v22 = vld [vmem:[%s214_s0 + $0xa8] sm:$0xff]  ;;  %v15_v28 = vld [vmem:[%s214_s0 + $0x38] sm:$0xff] }
   0x7   :  { %v46_v12 = vmax.f32 %v45_v5, %v20_v4  ;;  %v32_v21 = vld [vmem:[%s214_s0 + $0xc0] sm:$0xff]  ;;  %v54_v23 = vmax.f32 %v53_v14, %v21_v13  ;;  %v19_v29 = vld [vmem:[%s214_s0 + $0x58] sm:$0xff]  ;;  %v26_v32 = vld [vmem:[%s214_s0 + $0x90] sm:$0xff]  ;;  %v68_v33 = vmax.f32 %v11_v27, %v15_v28  ;;  %v62_v36 = vmax.f32 %v61_v26, %v22_v24 }
   0x8   :  { %v36_v30 = vld [vmem:[%s214_s0 + $0xe0] sm:$0xff]  ;;  %v33_v35 = vld [vmem:[%s214_s0 + $0xc8] sm:$0xff]  ;;  %v23_v37 = vld [vmem:[%s214_s0 + $0x78] sm:$0xff] }
   0x9   :  { %v47_v18 = vmax.f32 %v46_v12, %v24_v9  ;;  %v55_v31 = vmax.f32 %v54_v23, %v25_v19  ;;  %v40_v38 = vld [vmem:[%s214_s0 + $0x100] sm:$0xff]  ;;  %v30_v40 = vld [vmem:[%s214_s0 + $0xb0] sm:$0xff]  ;;  %v69_v41 = vmax.f32 %v68_v33, %v19_v29  ;;  %v37_v43 = vld [vmem:[%s214_s0 + $0xe8] sm:$0xff]  ;;  %v63_v44 = vmax.f32 %v62_v36, %v26_v32 }
   0xa   :  { %v27_v45 = vld [vmem:[%s214_s0 + $0x98] sm:$0xff]  ;;  %v34_v47 = vld [vmem:[%s214_s0 + $0xd0] sm:$0xff]  ;;  %v41_v50 = vld [vmem:[%s214_s0 + $0x108] sm:$0xff] }
   0xb   :  { %v48_v25 = vmax.f32 %v47_v18, %v28_v11  ;;  %v56_v39 = vmax.f32 %v55_v31, %v29_v22  ;;  %v70_v48 = vmax.f32 %v69_v41, %v23_v37  ;;  %v64_v51 = vmax.f32 %v63_v44, %v30_v40  ;;  %v31_v52 = vld [vmem:[%s214_s0 + $0xb8] sm:$0xff]  ;;  %v38_v54 = vld [vmem:[%s214_s0 + $0xf0] sm:$0xff] }
   0xc   :  { %v35_v57 = vld [vmem:[%s214_s0 + $0xd8] sm:$0xff]  ;;  %v42_v59 = vld [vmem:[%s214_s0 + $0x110] sm:$0xff] }
   0xd   :  { %v49_v34 = vmax.f32 %v48_v25, %v32_v21  ;;  %v57_v46 = vmax.f32 %v56_v39, %v33_v35  ;;  %v71_v55 = vmax.f32 %v70_v48, %v27_v45  ;;  %v65_v56 = vmax.f32 %v64_v51, %v34_v47  ;;  %v39_v62 = vld [vmem:[%s214_s0 + $0xf8] sm:$0xff] }
   0xe   :  { %v43_v1 = vld [vmem:[%s214_s0 + $0x118] sm:$0xff] }
   0xf   :  { %v50_v42 = vmax.f32 %v49_v34, %v36_v30  ;;  %v58_v53 = vmax.f32 %v57_v46, %v37_v43  ;;  %v72_v60 = vmax.f32 %v71_v55, %v31_v52  ;;  %v66_v61 = vmax.f32 %v65_v56, %v38_v54 }
  0x11   :  { %v51_v49 = vmax.f32 %v50_v42, %v40_v38  ;;  %v59_v58 = vmax.f32 %v58_v53, %v41_v50  ;;  %v73_v63 = vmax.f32 %v72_v60, %v35_v57  ;;  %v67_v0 = vmax.f32 %v66_v61, %v42_v59 }
  0x13   :  { %76 = vst [vmem:[%s215_s1] sm:$0xff] %v51_v49  ;;  %77 = vst [vmem:[%s215_s1 + $0x8] sm:$0xff] %v59_v58  ;;  %v74_v2 = vmax.f32 %v73_v63, %v39_v62 }
  0x14   :  { %78 = vst [vmem:[%s215_s1 + $0x10] sm:$0xff] %v67_v0 }
  0x15   :  { %v75_v3 = vmax.f32 %v74_v2, %v43_v1 }
  0x17   :  { %79 = vst [vmem:[%s215_s1 + $0x18] sm:$0xff] %v75_v3 }

// kernel: backbone_forward.20
= control target key start
LH: loop header
LB: loop body
LE: loop exit
PB: predicated region body
PF: predicated region fallthrough
CT: control target
= control target key end

     0   :  { %s531_s12 = smov 0   ;;  %s533_s13 = smov 0   ;;  %s589_s0 = inlined_call_operand.vmem [shape: bf16[72,512], index: 0, kind: input, shape index: {}]   ;;  %s590_s1 = inlined_call_operand.vmem [shape: bf16[8,72], index: 1, kind: input, shape index: {}]   ;;  %s591_s2 = inlined_call_operand.vmem [shape: f32[8,1], index: 2, kind: input, shape index: {}]   ;;  %s592_s3 = inlined_call_operand.vmem [shape: f32[8,512], index: 3, kind: output, shape index: {}]  }
   0x1   :  { %s535_s14 = smov 0  }
   0x2 LB: > { %s420_s15 = sadd.s32 4294967295, %s508_s14   ;;  %s548_s16 = sadd.s32 1, %s508_s14   ;;  %s508_s14 = sphi %s535_s14, %s595_s14   ;;  %s504_s13 = sphi %s533_s13, %s594_s13   ;;  %s500_s12 = sphi %s531_s12, %s593_s12  }
   0x3   : > { %s17_s17 = ssub.s32 %s508_s14, %s548_s16  ;;  %s20_s18 = sadd.s32 1, %s504_s13 }
   0x4   : > { %p18_p0 = scmp.eq.s32.totalorder %s17_s17, 0  ;;  %p27_p1 = scmp.ne.s32.totalorder %s504_s13, %s500_s12 }
   0x5   : > { %p28_p2 = scmp.eq.s32.totalorder %s508_s14, 0  ;;  %p423_p4 = scmp.ge.s32.totalorder %s508_s14, 2 }
   0x6   : > { %s557_s19 = scalar_select %p18_p0, %s504_s13, %s20_s18  }
   0x7   : > { %p29_p3 = por %p28_p2, %p27_p1  ;;  %127 = sbr.rel (%p423_p4) target bundleno = 23 (0x17), region = 24 }
   0xe   : > { %130 = sbr.rel (!%p29_p3) target bundleno = 23 (0x17), region = 28  ;;  %s132_s20 = sand.u32 (%p29_p3), 1, %s504_s13  }
   0xf   : > { %s443_s21 = sshll.u32 (%p29_p3), %s508_s14, 3  ;;  %s444_s22 = smul.u32 (%p29_p3), 72, %s132_s20 }
  0x10   : > { %s137_s25 = scalar_lea.vmem (%p29_p3), %s589_s0, %s443_s21 }
  0x11   : > { %v181_v0 = vld [vmem:[%s137_s25] sm:$0xff] (%p29_p3)  ;;  %v183_v1 = vld [vmem:[%s137_s25 + $0x10] sm:$0xff] (%p29_p3)  ;;  %s134_s26 = scalar_lea.vmem (%p29_p3), [#allocation2], %s444_s22 }
  0x12   : > { %v185_v2 = vld [vmem:[%s137_s25 + $0x20] sm:$0xff] (%p29_p3)  ;;  %v187_v3 = vld [vmem:[%s137_s25 + $0x30] sm:$0xff] (%p29_p3)  ;;  %182 = vst [vmem:[%s134_s26] sm:$0xff] (%p29_p3), %v181_v0  ;;  %184 = vst [vmem:[%s134_s26 + $0x8] sm:$0xff] (%p29_p3), %v183_v1 }
  0x13   : > { %v189_v4 = vld [vmem:[%s137_s25 + $0x40] sm:$0xff] (%p29_p3)  ;;  %v191_v5 = vld [vmem:[%s137_s25 + $0x50] sm:$0xff] (%p29_p3)  ;;  %186 = vst [vmem:[%s134_s26 + $0x10] sm:$0xff] (%p29_p3), %v185_v2  ;;  %188 = vst [vmem:[%s134_s26 + $0x18] sm:$0xff] (%p29_p3), %v187_v3 }
  0x14   : > { %190 = vst [vmem:[%s134_s26 + $0x20] sm:$0xff] (%p29_p3), %v189_v4  ;;  %192 = vst [vmem:[%s134_s26 + $0x28] sm:$0xff] (%p29_p3), %v191_v5  ;;  %v193_v6 = vld [vmem:[%s137_s25 + $0x60] sm:$0xff] (%p29_p3)  ;;  %v195_v7 = vld [vmem:[%s137_s25 + $0x70] sm:$0xff] (%p29_p3) }
  0x15   : > { %v197_v8 = vld [vmem:[%s137_s25 + $0x80] sm:$0xff]  ;;  %194 = vst [vmem:[%s134_s26 + $0x30] sm:$0xff] %v193_v6  ;;  %196 = vst [vmem:[%s134_s26 + $0x38] sm:$0xff] %v195_v7 }
  0x16   : > { %198 = vst [vmem:[%s134_s26 + $0x40] sm:$0xff] %v197_v8 }
  0x17 PF: > { %p426_p5 = scmp.ge.s32.totalorder %s508_s14, 1  ;;  %p203_p6 = scmp.lt.s32.totalorder %s508_s14, 3 }
  0x19   : > { %p204_p7 = pnand %p426_p5, %p203_p6 }
  0x1a   : > { %s210_s27 = sand.u32 (!%p204_p7), 1, %s500_s12   ;;  %v510_v9 = vmov (!%p204_p7), 0   ;;  %v251_v10 = vld [vmem:[%s591_s2] sm:$0xff] (!%p204_p7)  ;;  %vm306_vm0 = vcmask (!%p204_p7), 1043456   ;;  %vm302_vm1 = vcmask (!%p204_p7), 588800   ;;  %s427_s7 = sshll.u32 (!%p204_p7), %s420_s15, 1 }
  0x1b   : > { %207 = sbr.rel (%p204_p7) target bundleno = 270 (0x10e), region = 66  ;;  %345 = vmatprep.mubr.bf16.mxu0 (!%p204_p7), %v510_v9  ;;  %471 = vset.pattern.permute.xlu0 (!%p204_p7), %v510_v9  ;;  %v241_v23 = vld [vmem:[%s590_s1] sm:$0xf] (!%p204_p7)  ;;  %p235_p8 = scmp.lt.s32.totalorder (!%p204_p7), %s427_s7, 3 }
  0x1c   : > { %s445_s28 = smul.u32 (!%p204_p7), 72, %s210_s27  ;;  %254 = vperm.xlu0 (!%p204_p7), %471, %v251_v10  }
  0x1e   : > { %s212_s4 = scalar_lea.vmem (!%p204_p7), [#allocation2], %s445_s28 }
  0x1f   : > { %v472_v11 = vld [vmem:[%s212_s4 + $0x4] ss:$8 sps:$4 sm:$0xff] (!%p204_p7)   ;;  %v474_v12 = vld [vmem:[%s212_s4] ss:$8 sps:$4 sm:$0xff] (!%p204_p7)   ;;  %v475_v13 = vld [vmem:[%s212_s4 + $0x14] ss:$8 sps:$4 sm:$0xff] (!%p204_p7)  }
  0x20   : > { %313 = vmatprep.subr.bf16.mxu0 (!%p204_p7), %v472_v11  ;;  %v477_v14 = vld [vmem:[%s212_s4 + $0x10] ss:$8 sps:$4 sm:$0xff] (!%p204_p7)   ;;  %v478_v15 = vld [vmem:[%s212_s4 + $0x24] ss:$8 sps:$4 sm:$0xff] (!%p204_p7)   ;;  %v480_v16 = vld [vmem:[%s212_s4 + $0x20] ss:$8 sps:$4 sm:$0xff] (!%p204_p7)  }
  0x21   : > { %314 = vmatpush1.bf16.msra.mxu0 (!%p204_p7), %v474_v12  ;;  %v481_v17 = vld [vmem:[%s212_s4 + $0x34] ss:$8 sps:$4 sm:$0xff] (!%p204_p7)   ;;  %v250_v18 = vld [vmem:[%s212_s4 + $0x40] sm:$0xff] (!%p204_p7)  ;;  %v483_v19 = vld [vmem:[%s212_s4 + $0x30] ss:$8 sps:$4 sm:$0xff] (!%p204_p7)  }
  0x22   : > { %315 = vmatprep.subr.bf16.mxu0 %v475_v13  ;;  %v438_v20 = vcombine.high %v250_v18, %v250_v18  ;;  %v437_v21 = vcombine.low %v250_v18, %v250_v18  ;;  %s597_s7 = smov (!%p235_p8, %s427_s7), 3 }
  0x23   : > { %s428_s8 = sshll.u32 %s597_s7, 3 }
  0x24   : > { %v308_v22 = vsel %vm306_vm0, %v437_v21, 0  ;;  %s238_s11 = scalar_lea.vmem %s592_s3, %s428_s8 }
  0x25   : > { %316 = vmatpush1.bf16.msra.mxu0 %v477_v14 }
  0x26   : > { %317 = vmatprep.subr.bf16.mxu0 %v478_v15 }
  0x29   : > { %318 = vmatpush1.bf16.msra.mxu0 %v480_v16 }
  0x2a   : > { %319 = vmatprep.subr.bf16.mxu0 %v481_v17 }
  0x2d   : > { %320 = vmatpush1.bf16.msra.mxu0 %v483_v19 }
  0x2e   : > { %439 = vmatprep.subr.msk.bf16.mxu0 %vm306_vm0, %v438_v20 }
  0x31   : > { %322 = vmatpush1.bf16.msra.mxu0 %v308_v22 }
  0x34   : > { %440 = vmatmul.mubr.msk.bf16.vlgmr.msra.gmra.mrb[0].mxu0 %vm302_vm1, %v241_v23 }
  0x9b   : > { %v255_v24 = vpop.permute.xlu0 %254 }
 0x107   : > { %v347_v25 = vpop.f32.mrb[0].mxu0 }
 0x108   : > { %v348_v26 = vadd.f32 %v347_v25, %v255_v24  ;;  %v349_v27 = vpop.f32.mrb[1].mxu0 }
 0x109   : > { %v350_v28 = vadd.f32 %v349_v27, %v255_v24  ;;  %v351_v29 = vpop.f32.mrb[2].mxu0 }
 0x10a   : > { %v354_v30 = vmax.f32 %v348_v26, 0.0  ;;  %v352_v31 = vpop.f32.mrb[3].mxu0 }
 0x10b   : > { %v355_v32 = vmax.f32 %v350_v28, 0.0 }
 0x10c   : > { %356 = vst [vmem:[%s238_s11] sm:$0xff] %v354_v30 }
 0x10d   : > { %357 = vst [vmem:[%s238_s11 + $0x8] sm:$0xff] %v355_v32 }
 0x10e PF: > { %p10_p9 = scmp.ge.s32.totalorder %s548_s16, 4   ;;  %s593_s12 = smov %s504_s13 }
 0x10f   : > { %s594_s13 = smov %s557_s19  ;;  %s595_s14 = smov %s548_s16 }
 0x110   :  { %12 = sbr.rel (!%p10_p9) target bundleno = 2 (0x2), region = 105 }

// kernel: backbone_forward.21
= control target key start
LH: loop header
LB: loop body
LE: loop exit
PB: predicated region body
PF: predicated region fallthrough
CT: control target
= control target key end

     0   :  { %s603_s15 = smov 0   ;;  %s605_s16 = smov 0   ;;  %s664_s0 = inlined_call_operand.vmem [shape: bf16[72,512], index: 0, kind: input, shape index: {}]   ;;  %s665_s1 = inlined_call_operand.vmem [shape: bf16[8,72], index: 1, kind: input, shape index: {}]   ;;  %s666_s2 = inlined_call_operand.vmem [shape: f32[8,1], index: 2, kind: input, shape index: {}]   ;;  %s667_s3 = inlined_call_operand.vmem [shape: f32[8,512], index: 3, kind: input, shape index: {}]   ;;  %s668_s4 = inlined_call_operand.vmem [shape: f32[8,512], index: 4, kind: output, shape index: {}]  }
   0x1   :  { %s607_s17 = smov 0  }
   0x2 LB: > { %s485_s18 = sadd.s32 4294967295, %s575_s17   ;;  %s620_s19 = sadd.s32 1, %s575_s17   ;;  %s575_s17 = sphi %s607_s17, %s671_s17   ;;  %s571_s16 = sphi %s605_s16, %s670_s16   ;;  %s567_s15 = sphi %s603_s15, %s669_s15  }
   0x3   : > { %s18_s20 = ssub.s32 %s575_s17, %s620_s19  ;;  %s21_s21 = sadd.s32 1, %s571_s16 }
   0x4   : > { %p19_p0 = scmp.eq.s32.totalorder %s18_s20, 0  ;;  %p28_p1 = scmp.ne.s32.totalorder %s571_s16, %s567_s15 }
   0x5   : > { %p29_p2 = scmp.eq.s32.totalorder %s575_s17, 0  ;;  %p488_p4 = scmp.ge.s32.totalorder %s575_s17, 2 }
   0x6   : > { %s629_s22 = scalar_select %p19_p0, %s571_s16, %s21_s21  }
   0x7   : > { %p30_p3 = por %p29_p2, %p28_p1  ;;  %154 = sbr.rel (%p488_p4) target bundleno = 23 (0x17), region = 24 }
   0xe   : > { %157 = sbr.rel (!%p30_p3) target bundleno = 23 (0x17), region = 28  ;;  %s159_s23 = sand.u32 (%p30_p3), 1, %s571_s16  }
   0xf   : > { %s510_s24 = sshll.u32 (%p30_p3), %s575_s17, 3  ;;  %s511_s25 = smul.u32 (%p30_p3), 72, %s159_s23 }
  0x10   : > { %s164_s28 = scalar_lea.vmem (%p30_p3), %s664_s0, %s510_s24 }
  0x11   : > { %v208_v0 = vld [vmem:[%s164_s28] sm:$0xff] (%p30_p3)  ;;  %v210_v1 = vld [vmem:[%s164_s28 + $0x10] sm:$0xff] (%p30_p3)  ;;  %s161_s29 = scalar_lea.vmem (%p30_p3), [#allocation2], %s511_s25 }
  0x12   : > { %v212_v2 = vld [vmem:[%s164_s28 + $0x20] sm:$0xff] (%p30_p3)  ;;  %v214_v3 = vld [vmem:[%s164_s28 + $0x30] sm:$0xff] (%p30_p3)  ;;  %209 = vst [vmem:[%s161_s29] sm:$0xff] (%p30_p3), %v208_v0  ;;  %211 = vst [vmem:[%s161_s29 + $0x8] sm:$0xff] (%p30_p3), %v210_v1 }
  0x13   : > { %v216_v4 = vld [vmem:[%s164_s28 + $0x40] sm:$0xff] (%p30_p3)  ;;  %v218_v5 = vld [vmem:[%s164_s28 + $0x50] sm:$0xff] (%p30_p3)  ;;  %213 = vst [vmem:[%s161_s29 + $0x10] sm:$0xff] (%p30_p3), %v212_v2  ;;  %215 = vst [vmem:[%s161_s29 + $0x18] sm:$0xff] (%p30_p3), %v214_v3 }
  0x14   : > { %217 = vst [vmem:[%s161_s29 + $0x20] sm:$0xff] (%p30_p3), %v216_v4  ;;  %219 = vst [vmem:[%s161_s29 + $0x28] sm:$0xff] (%p30_p3), %v218_v5  ;;  %v220_v6 = vld [vmem:[%s164_s28 + $0x60] sm:$0xff] (%p30_p3)  ;;  %v222_v7 = vld [vmem:[%s164_s28 + $0x70] sm:$0xff] (%p30_p3) }
  0x15   : > { %v224_v8 = vld [vmem:[%s164_s28 + $0x80] sm:$0xff]  ;;  %221 = vst [vmem:[%s161_s29 + $0x30] sm:$0xff] %v220_v6  ;;  %223 = vst [vmem:[%s161_s29 + $0x38] sm:$0xff] %v222_v7 }
  0x16   : > { %225 = vst [vmem:[%s161_s29 + $0x40] sm:$0xff] %v224_v8 }
  0x17 PF: > { %p491_p5 = scmp.ge.s32.totalorder %s575_s17, 1  ;;  %p239_p6 = scmp.lt.s32.totalorder %s575_s17, 3 }
  0x19   : > { %p240_p7 = pnand %p491_p5, %p239_p6 }
  0x1a   : > { %s246_s30 = sand.u32 (!%p240_p7), 1, %s567_s15   ;;  %v577_v9 = vmov (!%p240_p7), 0   ;;  %v300_v10 = vld [vmem:[%s666_s2] sm:$0xff] (!%p240_p7)  ;;  %vm355_vm0 = vcmask (!%p240_p7), 1043456   ;;  %vm351_vm1 = vcmask (!%p240_p7), 588800   ;;  %s492_s11 = sshll.u32 (!%p240_p7), %s485_s18, 1 }
  0x1b   : > { %243 = sbr.rel (%p240_p7) target bundleno = 272 (0x110), region = 70  ;;  %394 = vmatprep.mubr.bf16.mxu0 (!%p240_p7), %v577_v9  ;;  %538 = vset.pattern.permute.xlu0 (!%p240_p7), %v577_v9  ;;  %v290_v23 = vld [vmem:[%s665_s1] sm:$0xf] (!%p240_p7)  ;;  %p278_p8 = scmp.lt.s32.totalorder (!%p240_p7), %s492_s11, 3 }
  0x1c   : > { %s512_s5 = smul.u32 (!%p240_p7), 72, %s246_s30  ;;  %303 = vperm.xlu0 (!%p240_p7), %538, %v300_v10  }
  0x1e   : > { %s248_s8 = scalar_lea.vmem (!%p240_p7), [#allocation2], %s512_s5 }
  0x1f   : > { %v539_v11 = vld [vmem:[%s248_s8 + $0x4] ss:$8 sps:$4 sm:$0xff] (!%p240_p7)   ;;  %v541_v12 = vld [vmem:[%s248_s8] ss:$8 sps:$4 sm:$0xff] (!%p240_p7)   ;;  %v542_v13 = vld [vmem:[%s248_s8 + $0x14] ss:$8 sps:$4 sm:$0xff] (!%p240_p7)  }
  0x20   : > { %362 = vmatprep.subr.bf16.mxu0 (!%p240_p7), %v539_v11  ;;  %v544_v14 = vld [vmem:[%s248_s8 + $0x10] ss:$8 sps:$4 sm:$0xff] (!%p240_p7)   ;;  %v545_v15 = vld [vmem:[%s248_s8 + $0x24] ss:$8 sps:$4 sm:$0xff] (!%p240_p7)   ;;  %v547_v16 = vld [vmem:[%s248_s8 + $0x20] ss:$8 sps:$4 sm:$0xff] (!%p240_p7)  }
  0x21   : > { %363 = vmatpush1.bf16.msra.mxu0 (!%p240_p7), %v541_v12  ;;  %v548_v17 = vld [vmem:[%s248_s8 + $0x34] ss:$8 sps:$4 sm:$0xff] (!%p240_p7)   ;;  %v299_v18 = vld [vmem:[%s248_s8 + $0x40] sm:$0xff] (!%p240_p7)  ;;  %v550_v19 = vld [vmem:[%s248_s8 + $0x30] ss:$8 sps:$4 sm:$0xff] (!%p240_p7)  }
  0x22   : > { %364 = vmatprep.subr.bf16.mxu0 %v542_v13  ;;  %v505_v20 = vcombine.high %v299_v18, %v299_v18  ;;  %v504_v21 = vcombine.low %v299_v18, %v299_v18  ;;  %s673_s11 = smov (!%p278_p8, %s492_s11), 3 }
  0x23   : > { %s493_s12 = sshll.u32 %s673_s11, 3 }
  0x24   : > { %v357_v22 = vsel %vm355_vm0, %v504_v21, 0  ;;  %s281_s15 = scalar_lea.vmem %s667_s3, %s493_s12  ;;  %s287_s18 = scalar_lea.vmem %s668_s4, %s493_s12 }
  0x25   : > { %365 = vmatpush1.bf16.msra.mxu0 %v544_v14  ;;  %v403_v26 = vld [vmem:[%s281_s15] sm:$0xff]  ;;  %v404_v29 = vld [vmem:[%s281_s15 + $0x8] sm:$0xff] }
  0x26   : > { %366 = vmatprep.subr.bf16.mxu0 %v545_v15 }
  0x29   : > { %367 = vmatpush1.bf16.msra.mxu0 %v547_v16 }
  0x2a   : > { %368 = vmatprep.subr.bf16.mxu0 %v548_v17 }
  0x2d   : > { %369 = vmatpush1.bf16.msra.mxu0 %v550_v19 }
  0x2e   : > { %506 = vmatprep.subr.msk.bf16.mxu0 %vm355_vm0, %v505_v20 }
  0x31   : > { %371 = vmatpush1.bf16.msra.mxu0 %v357_v22 }
  0x34   : > { %507 = vmatmul.mubr.msk.bf16.vlgmr.msra.gmra.mrb[0].mxu0 %vm351_vm1, %v290_v23 }
  0x9b   : > { %v304_v24 = vpop.permute.xlu0 %303 }
 0x107   : > { %v396_v25 = vpop.f32.mrb[0].mxu0 }
 0x108   : > { %v397_v27 = vadd.f32 %v396_v25, %v304_v24  ;;  %v398_v28 = vpop.f32.mrb[1].mxu0 }
 0x109   : > { %v399_v30 = vadd.f32 %v398_v28, %v304_v24  ;;  %v400_v31 = vpop.f32.mrb[2].mxu0 }
 0x10a   : > { %v405_v32 = vadd.f32 %v403_v26, %v397_v27  ;;  %v401_v33 = vpop.f32.mrb[3].mxu0 }
 0x10b   : > { %v406_v34 = vadd.f32 %v404_v29, %v399_v30 }
 0x10c   : > { %v407_v35 = vmax.f32 %v405_v32, 0.0 }
 0x10d   : > { %v408_v36 = vmax.f32 %v406_v34, 0.0 }
 0x10e   : > { %409 = vst [vmem:[%s287_s18] sm:$0xff] %v407_v35 }
 0x10f   : > { %410 = vst [vmem:[%s287_s18 + $0x8] sm:$0xff] %v408_v36 }
 0x110 PF: > { %p11_p9 = scmp.ge.s32.totalorder %s620_s19, 4   ;;  %s669_s15 = smov %s571_s16 }
 0x111   : > { %s670_s16 = smov %s629_s22  ;;  %s671_s17 = smov %s620_s19 }
 0x112   :  { %13 = sbr.rel (!%p11_p9) target bundleno = 2 (0x2), region = 112 }

// kernel: backbone_forward.24
= control target key start
LH: loop header
LB: loop body
LE: loop exit
PB: predicated region body
PF: predicated region fallthrough
CT: control target
= control target key end

     0   :  { %v164_v0 = vmov 0.0   ;;  %vm165_vm0 = vmmov 0   ;;  %v166_v2 = vmov 0   ;;  %vm74_vm1 = vcmask 1043456   ;;  %s217_s0 = inlined_call_operand.vmem [shape: bf16[72,128], index: 0, kind: input, shape index: {}]   ;;  %s218_s2 = inlined_call_operand.vmem [shape: f32[16,1], index: 2, kind: input, shape index: {}]   ;;  %s219_s1 = inlined_call_operand.vmem [shape: bf16[16,72], index: 1, kind: input, shape index: {}]   ;;  %s220_s3 = inlined_call_operand.vmem [shape: f32[16,128], index: 3, kind: output, shape index: {}]  }
   0x1   :  { %140 = vmatprep.subr.bf16.mxu0 %v164_v0  ;;  %v158_v1 = vld [vmem:[%s217_s0] sm:$0xff]   ;;  %150 = vmatprep.mubr.msk.bf16.mxu0 %vm165_vm0, %v164_v0  ;;  %v159_v3 = vld [vmem:[%s217_s0 + $0x8] sm:$0xff]   ;;  %v160_v5 = vld [vmem:[%s217_s0 + $0x10] sm:$0xff]   ;;  %vm70_vm2 = vcmask 588800  }
   0x2   :  { %157 = vset.pattern.permute.xlu0 %v166_v2  ;;  %141 = vmatpush3.bf16.msra.mxu0 %v158_v1  ;;  %v26_v4 = vld [vmem:[%s218_s2] sm:$0xff]  ;;  %v27_v6 = vld [vmem:[%s218_s2 + $0x8] sm:$0xff]  ;;  %v161_v7 = vld [vmem:[%s217_s0 + $0x18] sm:$0xff]  }
   0x3   :  { %142 = vmatprep.subr.bf16.mxu0 %v164_v0  ;;  %30 = vperm.xlu0 %157, %v26_v4   ;;  %v162_v8 = vld [vmem:[%s217_s0 + $0x20] ss:$0 sps:$4 sm:$0xff]  }
   0x4   :  { %v76_v9 = vsel %vm74_vm1, %v162_v8, 0  ;;  %v163_v10 = vld [vmem:[%s219_s1] sm:$0xff]  }
   0x6   :  { %143 = vmatpush3.bf16.msra.mxu0 %v159_v3 }
   0x7   :  { %144 = vmatprep.subr.bf16.mxu0 %v164_v0  ;;  %35 = vperm.xlu0 %157, %v27_v6  }
   0xa   :  { %145 = vmatpush3.bf16.msra.mxu0 %v160_v5 }
   0xb   :  { %146 = vmatprep.subr.bf16.mxu0 %v164_v0 }
   0xe   :  { %147 = vmatpush3.bf16.msra.mxu0 %v161_v7 }
   0xf   :  { %148 = vmatprep.subr.bf16.mxu0 %v164_v0 }
  0x12   :  { %149 = vmatpush3.bf16.msra.mxu0 %v76_v9 }
  0x15   :  { %151 = vmatmul.mubr.msk.bf16.vlgmr.msra.gmra.mrb[0].mxu0 %vm70_vm2, %v163_v10 }
  0x82   :  { %v31_v11 = vpop.permute.xlu0 %30 }
  0x86   :  { %v36_v15 = vpop.permute.xlu0 %35 }
  0xe8   :  { %v112_v12 = vpop.f32.mrb[0].mxu0 }
  0xe9   :  { %v113_v13 = vadd.f32 %v112_v12, %v31_v11  ;;  %v152_v14 = vpop.f32.mrb[1].mxu0 }
  0xea   :  { %v115_v16 = vpop.f32.mrb[2].mxu0 }
  0xeb   :  { %v119_v17 = vmax.f32 %v113_v13, 0.0  ;;  %v116_v18 = vadd.f32 %v115_v16, %v36_v15  ;;  %v153_v19 = vpop.f32.mrb[3].mxu0 }
  0xed   :  { %121 = vst [vmem:[%s220_s3] sm:$0xff] %v119_v17  ;;  %v120_v20 = vmax.f32 %v116_v18, 0.0 }
  0xef   :  { %122 = vst [vmem:[%s220_s3 + $0x8] sm:$0xff] %v120_v20 }

// kernel: backbone_forward.25
= control target key start
LH: loop header
LB: loop body
LE: loop exit
PB: predicated region body
PF: predicated region fallthrough
CT: control target
= control target key end

     0   :  { %v289_v0 = vmov 0   ;;  %v290_v2 = vmov 0.0   ;;  %vm291_vm0 = vmmov 0   ;;  %vm48_vm1 = vcmask 1043456   ;;  %s384_s0 = inlined_call_operand.vmem [shape: bf16[144,128], index: 0, kind: input, shape index: {}]   ;;  %s385_s3 = inlined_call_operand.vmem [shape: bf16[8,128], index: 3, kind: input, shape index: {}]   ;;  %s386_s4 = inlined_call_operand.vmem [shape: bf16[16,8], index: 4, kind: input, shape index: {}]   ;;  %s387_s1 = inlined_call_operand.vmem [shape: bf16[16,144], index: 1, kind: input, shape index: {}]   ;;  %s388_s5 = inlined_call_operand.vmem [shape: f32[16,1], index: 5, kind: input, shape index: {}]   ;;  %s389_s2 = inlined_call_operand.vmem [shape: f32[16,1], index: 2, kind: input, shape index: {}]   ;;  %s390_s6 = inlined_call_operand.vmem [shape: f32[16,128], index: 6, kind: output, shape index: {}]  }
   0x1   :  { %192 = vmatprep.subr.bf16.mxu0 %v289_v0  ;;  %v276_v1 = vld [vmem:[%s384_s0] sm:$0xff]   ;;  %259 = vmatprep.subr.bf16.mxu1 %v290_v2  ;;  %v277_v3 = vld [vmem:[%s384_s0 + $0x8] sm:$0xff]   ;;  %v278_v4 = vld [vmem:[%s384_s0 + $0x10] sm:$0xff]   ;;  %vm44_vm2 = vcmask 64512   ;;  %vm188_vm3 = vcmask 130048  }
   0x2   :  { %261 = vmatprep.mubr.msk.bf16.mxu1 %vm291_vm0, %v290_v2  ;;  %274 = vset.pattern.permute.xlu0 %v289_v0  ;;  %v26_v5 = vld [vmem:[%s385_s3] sm:$0xf]  ;;  %v279_v8 = vld [vmem:[%s384_s0 + $0x18] sm:$0xff]   ;;  %v288_v9 = vld [vmem:[%s387_s1 + $0x4] ss:$8 sps:$4 sm:$0xff]  }
   0x3   :  { %193 = vmatpush1.bf16.msra.mxu0 %v276_v1  ;;  %275 = vset.pattern.permute.xlu1 %v289_v0  ;;  %v50_v6 = vsel %vm48_vm1, %v26_v5, 0  ;;  %v283_v7 = vld [vmem:[%s386_s4] sm:$0xff]   ;;  %v28_v12 = vld [vmem:[%s388_s5 + $0x8] sm:$0xff]  ;;  %v282_v16 = vld [vmem:[%s384_s0 + $0x30] sm:$0xff]  }
   0x4   :  { %194 = vmatprep.subr.bf16.mxu0 %v289_v0  ;;  %260 = vmatpush3.bf16.msra.mxu1 %v50_v6  ;;  %v27_v10 = vld [vmem:[%s388_s5] sm:$0xff]  ;;  %v114_v14 = vld [vmem:[%s389_s2 + $0x8] sm:$0xff]  ;;  %v284_v17 = vld [vmem:[%s384_s0 + $0x38] sm:$0xff]  }
   0x5   :  { %31 = vperm.xlu0 %274, %v27_v10   ;;  %v113_v11 = vld [vmem:[%s389_s2] sm:$0xff]  ;;  %256 = vmatprep.mubr.msk.bf16.mxu0 %vm188_vm3, %v288_v9  ;;  %v281_v15 = vld [vmem:[%s384_s0 + $0x28] sm:$0xff]  }
   0x6   :  { %117 = vperm.xlu1 %275, %v113_v11   ;;  %v280_v13 = vld [vmem:[%s384_s0 + $0x20] sm:$0xff]  }
   0x7   :  { %195 = vmatpush1.bf16.msra.mxu0 %v277_v3  ;;  %262 = vmatmul.mubr.msk.bf16.vlgmr.msra.gmra.mrb[0].mxu1 %vm44_vm2, %v283_v7  ;;  %v285_v18 = vld [vmem:[%s384_s0 + $0x40] sm:$0xff]  }
   0x8   :  { %196 = vmatprep.subr.bf16.mxu0 %v289_v0  ;;  %v286_v19 = vld [vmem:[%s387_s1] ss:$8 sps:$4 sm:$0xff]  }
   0x9   :  { %36 = vperm.xlu0 %274, %v28_v12  }
   0xa   :  { %122 = vperm.xlu1 %275, %v114_v14  }
   0xb   :  { %197 = vmatpush1.bf16.msra.mxu0 %v278_v4 }
   0xc   :  { %198 = vmatprep.subr.bf16.mxu0 %v289_v0 }
   0xf   :  { %199 = vmatpush1.bf16.msra.mxu0 %v279_v8 }
  0x10   :  { %200 = vmatprep.subr.bf16.mxu0 %v289_v0 }
  0x13   :  { %201 = vmatpush1.bf16.msra.mxu0 %v280_v13 }
  0x14   :  { %202 = vmatprep.subr.bf16.mxu0 %v289_v0 }
  0x17   :  { %203 = vmatpush1.bf16.msra.mxu0 %v281_v15 }
  0x18   :  { %204 = vmatprep.subr.bf16.mxu0 %v289_v0 }
  0x1b   :  { %205 = vmatpush1.bf16.msra.mxu0 %v282_v16 }
  0x1c   :  { %206 = vmatprep.subr.bf16.mxu0 %v289_v0 }
  0x1f   :  { %207 = vmatpush1.bf16.msra.mxu0 %v284_v17 }
  0x20   :  { %208 = vmatprep.subr.bf16.mxu0 %v289_v0 }
  0x23   :  { %209 = vmatpush1.bf16.msra.mxu0 %v285_v18 }
  0x26   :  { %225 = vmatmul.mubr.bf16.vlgmr.msra.gmra.mrb[0].mxu0 %v286_v19 }
  0x84   :  { %v32_v24 = vpop.permute.xlu0 %31 }
  0x85   :  { %v118_v25 = vpop.permute.xlu1 %117 }
  0x88   :  { %v37_v26 = vpop.permute.xlu0 %36 }
  0x89   :  { %v123_v29 = vpop.permute.xlu1 %122 }
  0xda   :  { %v86_v20 = vpop.f32.mrb[0].mxu1 }
  0xdb   :  { %v263_v21 = vpop.f32.mrb[1].mxu1  ;;  %v87_v27 = vadd.f32 %v86_v20, %v32_v24 }
  0xdc   :  { %v89_v22 = vpop.f32.mrb[2].mxu1 }
  0xdd   :  { %v264_v23 = vpop.f32.mrb[3].mxu1  ;;  %v90_v28 = vadd.f32 %v89_v22, %v37_v26  ;;  %v266_v30 = vadd.f32 %v118_v25, %v87_v27 }
  0xdf   :  { %v269_v32 = vadd.f32 %v123_v29, %v90_v28 }
  0xf9   :  { %v226_v31 = vpop.f32.mrb[0].mxu0 }
  0xfa   :  { %v267_v33 = vadd.f32 %v266_v30, %v226_v31  ;;  %v228_v34 = vpop.f32.mrb[1].mxu0 }
  0xfb   :  { %v229_v35 = vpop.f32.mrb[2].mxu0 }
  0xfc   :  { %v235_v36 = vmax.f32 %v267_v33, 0.0  ;;  %v270_v37 = vadd.f32 %v269_v32, %v229_v35  ;;  %v231_v38 = vpop.f32.mrb[3].mxu0 }
  0xfe   :  { %237 = vst [vmem:[%s390_s6] sm:$0xff] %v235_v36  ;;  %v236_v39 = vmax.f32 %v270_v37, 0.0 }
 0x100   :  { %238 = vst [vmem:[%s390_s6 + $0x8] sm:$0xff] %v236_v39 }

// kernel: backbone_forward.26
= control target key start
LH: loop header
LB: loop body
LE: loop exit
PB: predicated region body
PF: predicated region fallthrough
CT: control target
= control target key end

     0   :  { %v189_v0 = vmov 0   ;;  %vm110_vm0 = vcmask 130048   ;;  %s255_s0 = inlined_call_operand.vmem [shape: bf16[144,128], index: 0, kind: input, shape index: {}]   ;;  %s256_s1 = inlined_call_operand.vmem [shape: bf16[16,144], index: 1, kind: input, shape index: {}]   ;;  %s257_s2 = inlined_call_operand.vmem [shape: f32[16,1], index: 2, kind: input, shape index: {}]   ;;  %s258_s3 = inlined_call_operand.vmem [shape: f32[16,128], index: 3, kind: output, shape index: {}]  }
   0x1   :  { %114 = vmatprep.subr.bf16.mxu0 %v189_v0  ;;  %v177_v1 = vld [vmem:[%s255_s0] sm:$0xff]   ;;  %176 = vset.pattern.permute.xlu0 %v189_v0  ;;  %v178_v2 = vld [vmem:[%s255_s0 + $0x8] sm:$0xff]   ;;  %v179_v3 = vld [vmem:[%s255_s0 + $0x10] sm:$0xff]  }
   0x2   :  { %115 = vmatpush1.bf16.msra.mxu0 %v177_v1  ;;  %v180_v4 = vld [vmem:[%s255_s0 + $0x18] sm:$0xff]   ;;  %v188_v5 = vld [vmem:[%s256_s1 + $0x4] ss:$8 sps:$4 sm:$0xff]   ;;  %v183_v10 = vld [vmem:[%s255_s0 + $0x30] sm:$0xff]  }
   0x3   :  { %116 = vmatprep.subr.bf16.mxu0 %v189_v0  ;;  %v35_v6 = vld [vmem:[%s257_s2] sm:$0xff]  ;;  %174 = vmatprep.mubr.msk.bf16.mxu0 %vm110_vm0, %v188_v5  ;;  %v36_v7 = vld [vmem:[%s257_s2 + $0x8] sm:$0xff]  ;;  %v184_v11 = vld [vmem:[%s255_s0 + $0x38] sm:$0xff]  }
   0x4   :  { %39 = vperm.xlu0 %176, %v35_v6   ;;  %v181_v8 = vld [vmem:[%s255_s0 + $0x20] sm:$0xff]   ;;  %v182_v9 = vld [vmem:[%s255_s0 + $0x28] sm:$0xff]  }
   0x5   :  { %v185_v12 = vld [vmem:[%s255_s0 + $0x40] sm:$0xff]  }
   0x6   :  { %117 = vmatpush1.bf16.msra.mxu0 %v178_v2  ;;  %v186_v13 = vld [vmem:[%s256_s1] ss:$8 sps:$4 sm:$0xff]  }
   0x7   :  { %118 = vmatprep.subr.bf16.mxu0 %v189_v0 }
   0x8   :  { %44 = vperm.xlu0 %176, %v36_v7  }
   0xa   :  { %119 = vmatpush1.bf16.msra.mxu0 %v179_v3 }
   0xb   :  { %120 = vmatprep.subr.bf16.mxu0 %v189_v0 }
   0xe   :  { %121 = vmatpush1.bf16.msra.mxu0 %v180_v4 }
   0xf   :  { %122 = vmatprep.subr.bf16.mxu0 %v189_v0 }
  0x12   :  { %123 = vmatpush1.bf16.msra.mxu0 %v181_v8 }
  0x13   :  { %124 = vmatprep.subr.bf16.mxu0 %v189_v0 }
  0x16   :  { %125 = vmatpush1.bf16.msra.mxu0 %v182_v9 }
  0x17   :  { %126 = vmatprep.subr.bf16.mxu0 %v189_v0 }
  0x1a   :  { %127 = vmatpush1.bf16.msra.mxu0 %v183_v10 }
  0x1b   :  { %128 = vmatprep.subr.bf16.mxu0 %v189_v0 }
  0x1e   :  { %129 = vmatpush1.bf16.msra.mxu0 %v184_v11 }
  0x1f   :  { %130 = vmatprep.subr.bf16.mxu0 %v189_v0 }
  0x22   :  { %131 = vmatpush1.bf16.msra.mxu0 %v185_v12 }
  0x25   :  { %147 = vmatmul.mubr.bf16.vlgmr.msra.gmra.mrb[0].mxu0 %v186_v13 }
  0x83   :  { %v40_v14 = vpop.permute.xlu0 %39 }
  0x87   :  { %v45_v18 = vpop.permute.xlu0 %44 }
  0xf8   :  { %v148_v15 = vpop.f32.mrb[0].mxu0 }
  0xf9   :  { %v149_v16 = vadd.f32 %v148_v15, %v40_v14  ;;  %v150_v17 = vpop.f32.mrb[1].mxu0 }
  0xfa   :  { %v151_v19 = vpop.f32.mrb[2].mxu0 }
  0xfb   :  { %v155_v20 = vmax.f32 %v149_v16, 0.0  ;;  %v152_v21 = vadd.f32 %v151_v19, %v45_v18  ;;  %v153_v22 = vpop.f32.mrb[3].mxu0 }
  0xfd   :  { %157 = vst [vmem:[%s258_s3] sm:$0xff] %v155_v20  ;;  %v156_v23 = vmax.f32 %v152_v21, 0.0 }
  0xff   :  { %158 = vst [vmem:[%s258_s3 + $0x8] sm:$0xff] %v156_v23 }

// kernel: backbone_forward.27
= control target key start
LH: loop header
LB: loop body
LE: loop exit
PB: predicated region body
PF: predicated region fallthrough
CT: control target
= control target key end

     0   :  { %v196_v0 = vmov 0   ;;  %vm113_vm0 = vcmask 130048   ;;  %s273_s0 = inlined_call_operand.vmem [shape: bf16[144,128], index: 0, kind: input, shape index: {}]   ;;  %s274_s1 = inlined_call_operand.vmem [shape: bf16[16,144], index: 1, kind: input, shape index: {}]   ;;  %s275_s2 = inlined_call_operand.vmem [shape: f32[16,1], index: 2, kind: input, shape index: {}]   ;;  %s276_s3 = inlined_call_operand.vmem [shape: f32[16,128], index: 3, kind: input, shape index: {}]   ;;  %s277_s4 = inlined_call_operand.vmem [shape: f32[16,128], index: 4, kind: output, shape index: {}]  }
   0x1   :  { %117 = vmatprep.subr.bf16.mxu0 %v196_v0  ;;  %v184_v1 = vld [vmem:[%s273_s0] sm:$0xff]   ;;  %183 = vset.pattern.permute.xlu0 %v196_v0  ;;  %v185_v2 = vld [vmem:[%s273_s0 + $0x8] sm:$0xff]   ;;  %v186_v3 = vld [vmem:[%s273_s0 + $0x10] sm:$0xff]  }
   0x2   :  { %118 = vmatpush1.bf16.msra.mxu0 %v184_v1  ;;  %v187_v4 = vld [vmem:[%s273_s0 + $0x18] sm:$0xff]   ;;  %v195_v5 = vld [vmem:[%s274_s1 + $0x4] ss:$8 sps:$4 sm:$0xff]   ;;  %v190_v10 = vld [vmem:[%s273_s0 + $0x30] sm:$0xff]  }
   0x3   :  { %119 = vmatprep.subr.bf16.mxu0 %v196_v0  ;;  %v38_v6 = vld [vmem:[%s275_s2] sm:$0xff]  ;;  %181 = vmatprep.mubr.msk.bf16.mxu0 %vm113_vm0, %v195_v5  ;;  %v39_v7 = vld [vmem:[%s275_s2 + $0x8] sm:$0xff]  ;;  %v191_v11 = vld [vmem:[%s273_s0 + $0x38] sm:$0xff]  }
   0x4   :  { %42 = vperm.xlu0 %183, %v38_v6   ;;  %v188_v8 = vld [vmem:[%s273_s0 + $0x20] sm:$0xff]   ;;  %v189_v9 = vld [vmem:[%s273_s0 + $0x28] sm:$0xff]  }
   0x5   :  { %v192_v12 = vld [vmem:[%s273_s0 + $0x40] sm:$0xff]   ;;  %v159_v21 = vld [vmem:[%s276_s3 + $0x8] sm:$0xff] }
   0x6   :  { %120 = vmatpush1.bf16.msra.mxu0 %v185_v2  ;;  %v193_v13 = vld [vmem:[%s274_s1] ss:$8 sps:$4 sm:$0xff]  }
   0x7   :  { %121 = vmatprep.subr.bf16.mxu0 %v196_v0  ;;  %v158_v16 = vld [vmem:[%s276_s3] sm:$0xff] }
   0x8   :  { %47 = vperm.xlu0 %183, %v39_v7  }
   0xa   :  { %122 = vmatpush1.bf16.msra.mxu0 %v186_v3 }
   0xb   :  { %123 = vmatprep.subr.bf16.mxu0 %v196_v0 }
   0xe   :  { %124 = vmatpush1.bf16.msra.mxu0 %v187_v4 }
   0xf   :  { %125 = vmatprep.subr.bf16.mxu0 %v196_v0 }
  0x12   :  { %126 = vmatpush1.bf16.msra.mxu0 %v188_v8 }
  0x13   :  { %127 = vmatprep.subr.bf16.mxu0 %v196_v0 }
  0x16   :  { %128 = vmatpush1.bf16.msra.mxu0 %v189_v9 }
  0x17   :  { %129 = vmatprep.subr.bf16.mxu0 %v196_v0 }
  0x1a   :  { %130 = vmatpush1.bf16.msra.mxu0 %v190_v10 }
  0x1b   :  { %131 = vmatprep.subr.bf16.mxu0 %v196_v0 }
  0x1e   :  { %132 = vmatpush1.bf16.msra.mxu0 %v191_v11 }
  0x1f   :  { %133 = vmatprep.subr.bf16.mxu0 %v196_v0 }
  0x22   :  { %134 = vmatpush1.bf16.msra.mxu0 %v192_v12 }
  0x25   :  { %150 = vmatmul.mubr.bf16.vlgmr.msra.gmra.mrb[0].mxu0 %v193_v13 }
  0x83   :  { %v43_v14 = vpop.permute.xlu0 %42 }
  0x87   :  { %v48_v19 = vpop.permute.xlu0 %47 }
  0xf8   :  { %v151_v15 = vpop.f32.mrb[0].mxu0 }
  0xf9   :  { %v152_v17 = vadd.f32 %v151_v15, %v43_v14  ;;  %v153_v18 = vpop.f32.mrb[1].mxu0 }
  0xfa   :  { %v154_v20 = vpop.f32.mrb[2].mxu0 }
  0xfb   :  { %v160_v22 = vadd.f32 %v158_v16, %v152_v17  ;;  %v155_v23 = vadd.f32 %v154_v20, %v48_v19  ;;  %v156_v24 = vpop.f32.mrb[3].mxu0 }
  0xfd   :  { %v162_v25 = vmax.f32 %v160_v22, 0.0  ;;  %v161_v26 = vadd.f32 %v159_v21, %v155_v23 }
  0xff   :  { %164 = vst [vmem:[%s277_s4] sm:$0xff] %v162_v25  ;;  %v163_v27 = vmax.f32 %v161_v26, 0.0 }
 0x101   :  { %165 = vst [vmem:[%s277_s4 + $0x8] sm:$0xff] %v163_v27 }

// kernel: backbone_forward.28
= control target key start
LH: loop header
LB: loop body
LE: loop exit
PB: predicated region body
PF: predicated region fallthrough
CT: control target
= control target key end

     0   :  { %v253_v0 = vmov 0   ;;  %vm133_vm0 = vcmask 130048   ;;  %vm193_vm1 = vcmask 261120   ;;  %s337_s0 = inlined_call_operand.vmem [shape: bf16[144,32], index: 0, kind: input, shape index: {}]   ;;  %s338_s1 = inlined_call_operand.vmem [shape: bf16[32,144], index: 1, kind: input, shape index: {}]   ;;  %s339_s2 = inlined_call_operand.vmem [shape: f32[32,1], index: 2, kind: input, shape index: {}]   ;;  %s340_s3 = inlined_call_operand.vmem [shape: f32[32,32], index: 3, kind: output, shape index: {}]  }
   0x1   :  { %140 = vmatprep.subr.bf16.mxu0 %v253_v0  ;;  %217 = vmatprep.subr.bf16.mxu1 %v253_v0  ;;  %v238_v1 = vld [vmem:[%s337_s0] sm:$0xff]   ;;  %v239_v2 = vld [vmem:[%s337_s0 + $0x8] sm:$0xff]   ;;  %v240_v3 = vld [vmem:[%s337_s0 + $0x10] sm:$0xff]  }
   0x2   :  { %237 = vset.pattern.permute.xlu1 %v253_v0  ;;  %236 = vset.pattern.permute.xlu0 %v253_v0  ;;  %v241_v4 = vld [vmem:[%s337_s0 + $0x18] sm:$0xff]   ;;  %v249_v5 = vld [vmem:[%s338_s1 + $0x4] ss:$8 sps:$4 sm:$0xff]   ;;  %v39_v7 = vld [vmem:[%s339_s2 + $0x10] sm:$0xff] }
   0x3   :  { %141 = vmatpush1.bf16.msra.mxu0 %v238_v1  ;;  %226 = vmatpush1.bf16.msra.mxu1 %v238_v1  ;;  %v252_v6 = vld [vmem:[%s338_s1 + $0x14] ss:$8 sps:$4 sm:$0xff]   ;;  %v37_v8 = vld [vmem:[%s339_s2] sm:$0xff]  ;;  %v38_v11 = vld [vmem:[%s339_s2 + $0x8] sm:$0xff] }
   0x4   :  { %142 = vmatprep.subr.bf16.mxu0 %v253_v0  ;;  %218 = vmatprep.subr.bf16.mxu1 %v253_v0  ;;  %v40_v9 = vld [vmem:[%s339_s2 + $0x18] sm:$0xff]  ;;  %v242_v10 = vld [vmem:[%s337_s0 + $0x20] sm:$0xff]   ;;  %v243_v12 = vld [vmem:[%s337_s0 + $0x28] sm:$0xff]  }
   0x5   :  { %215 = vmatprep.mubr.msk.bf16.mxu0 %vm133_vm0, %v249_v5  ;;  %53 = vperm.xlu1 %237, %v39_v7   ;;  %v244_v13 = vld [vmem:[%s337_s0 + $0x30] sm:$0xff]   ;;  %v245_v14 = vld [vmem:[%s337_s0 + $0x38] sm:$0xff]   ;;  %v246_v15 = vld [vmem:[%s337_s0 + $0x40] sm:$0xff]  }
   0x6   :  { %216 = vmatprep.mubr.msk.bf16.mxu1 %vm133_vm0, %v252_v6  ;;  %43 = vperm.xlu0 %236, %v37_v8   ;;  %v247_v16 = vld [vmem:[%s338_s1] ss:$8 sps:$4 sm:$0xff]   ;;  %v250_v17 = vld [vmem:[%s338_s1 + $0x10] ss:$8 sps:$4 sm:$0xff]  }
   0x7   :  { %143 = vmatpush1.bf16.msra.mxu0 %v239_v2  ;;  %227 = vmatpush1.bf16.msra.mxu1 %v239_v2 }
   0x8   :  { %144 = vmatprep.subr.bf16.mxu0 %v253_v0  ;;  %219 = vmatprep.subr.bf16.mxu1 %v253_v0 }
   0x9   :  { %58 = vperm.xlu1 %237, %v40_v9  }
   0xa   :  { %48 = vperm.xlu0 %236, %v38_v11  }
   0xb   :  { %145 = vmatpush1.bf16.msra.mxu0 %v240_v3  ;;  %228 = vmatpush1.bf16.msra.mxu1 %v240_v3 }
   0xc   :  { %146 = vmatprep.subr.bf16.mxu0 %v253_v0  ;;  %220 = vmatprep.subr.bf16.mxu1 %v253_v0 }
   0xf   :  { %147 = vmatpush1.bf16.msra.mxu0 %v241_v4  ;;  %229 = vmatpush1.bf16.msra.mxu1 %v241_v4 }
  0x10   :  { %148 = vmatprep.subr.bf16.mxu0 %v253_v0  ;;  %221 = vmatprep.subr.bf16.mxu1 %v253_v0 }
  0x13   :  { %149 = vmatpush1.bf16.msra.mxu0 %v242_v10  ;;  %230 = vmatpush1.bf16.msra.mxu1 %v242_v10 }
  0x14   :  { %150 = vmatprep.subr.bf16.mxu0 %v253_v0  ;;  %222 = vmatprep.subr.bf16.mxu1 %v253_v0 }
  0x17   :  { %151 = vmatpush1.bf16.msra.mxu0 %v243_v12  ;;  %231 = vmatpush1.bf16.msra.mxu1 %v243_v12 }
  0x18   :  { %152 = vmatprep.subr.bf16.mxu0 %v253_v0  ;;  %223 = vmatprep.subr.bf16.mxu1 %v253_v0 }
  0x1b   :  { %153 = vmatpush1.bf16.msra.mxu0 %v244_v13  ;;  %232 = vmatpush1.bf16.msra.mxu1 %v244_v13 }
  0x1c   :  { %154 = vmatprep.subr.bf16.mxu0 %v253_v0  ;;  %224 = vmatprep.subr.bf16.mxu1 %v253_v0 }
  0x1f   :  { %155 = vmatpush1.bf16.msra.mxu0 %v245_v14  ;;  %233 = vmatpush1.bf16.msra.mxu1 %v245_v14 }
  0x20   :  { %156 = vmatprep.subr.bf16.mxu0 %v253_v0  ;;  %225 = vmatprep.subr.bf16.mxu1 %v253_v0 }
  0x23   :  { %157 = vmatpush1.bf16.msra.mxu0 %v246_v15  ;;  %234 = vmatpush1.bf16.msra.mxu1 %v246_v15 }
  0x26   :  { %173 = vmatmul.mubr.bf16.vlgmr.msra.gmra.mrb[0].mxu0 %v247_v16  ;;  %181 = vmatmul.mubr.bf16.vlgmr.msra.gmra.mrb[0].mxu1 %v250_v17 }
  0x84   :  { %v54_v18 = vpop.permute.xlu1 %53 }
  0x85   :  { %v44_v19 = vpop.permute.xlu0 %43 }
  0x88   :  { %v59_v20 = vpop.permute.xlu1 %58 }
  0x89   :  { %v49_v21 = vpop.permute.xlu0 %48 }
  0xf9   :  { %v174_v22 = vpop.f32.mrb[0].mxu0  ;;  %v182_v23 = vpop.f32.mrb[0].mxu1 }
  0xfa   :  { %v175_v24 = vadd.f32 %v174_v22, %v44_v19  ;;  %v183_v25 = vadd.f32 %v182_v23, %v54_v18  ;;  %v176_v26 = vpop.f32.mrb[1].mxu0  ;;  %v184_v27 = vpop.f32.mrb[1].mxu1 }
  0xfb   :  { %v177_v28 = vpop.f32.mrb[2].mxu0  ;;  %v185_v29 = vpop.f32.mrb[2].mxu1 }
  0xfc   :  { %v189_v30 = vmax.f32 %v175_v24, 0.0  ;;  %v191_v31 = vmax.f32 %v183_v25, 0.0  ;;  %v178_v32 = vadd.f32 %v177_v28, %v49_v21  ;;  %v186_v33 = vadd.f32 %v185_v29, %v59_v20  ;;  %v179_v34 = vpop.f32.mrb[3].mxu0  ;;  %v187_v35 = vpop.f32.mrb[3].mxu1 }
  0xfe   :  { %194 = vst.msk [vmem:[%s340_s3] sm:$0xff] %vm193_vm1, %v189_v30  ;;  %196 = vst.msk [vmem:[%s340_s3 + $0x10] sm:$0xff] %vm193_vm1, %v191_v31  ;;  %v190_v36 = vmax.f32 %v178_v32, 0.0  ;;  %v192_v37 = vmax.f32 %v186_v33, 0.0 }
 0x100   :  { %195 = vst.msk [vmem:[%s340_s3 + $0x8] sm:$0xff] %vm193_vm1, %v190_v36  ;;  %197 = vst.msk [vmem:[%s340_s3 + $0x18] sm:$0xff] %vm193_vm1, %v192_v37 }

// kernel: backbone_forward.30
= control target key start
LH: loop header
LB: loop body
LE: loop exit
PB: predicated region body
PF: predicated region fallthrough
CT: control target
= control target key end

     0   :  { %v433_v1 = vmov 0   ;;  %vm221_vm0 = vcmask 261120   ;;  %s556_s0 = inlined_call_operand.vmem [shape: bf16[288,32], index: 0, kind: input, shape index: {}]   ;;  %s557_s1 = inlined_call_operand.vmem [shape: bf16[32,288], index: 1, kind: input, shape index: {}]   ;;  %s558_s2 = inlined_call_operand.vmem [shape: f32[32,1], index: 2, kind: input, shape index: {}]   ;;  %s559_s3 = inlined_call_operand.vmem [shape: f32[32,32], index: 3, kind: output, shape index: {}]  }
   0x1   :  { %v407_v0 = vld [vmem:[%s556_s0 + $0x40] sm:$0xff]   ;;  %405 = vset.pattern.permute.xlu0 %v433_v1  ;;  %406 = vset.pattern.permute.xlu1 %v433_v1  ;;  %v409_v3 = vld [vmem:[%s556_s0 + $0x48] sm:$0xff]   ;;  %v411_v5 = vld [vmem:[%s556_s0 + $0x50] sm:$0xff]  }
   0x2   :  { %v408_v2 = vld [vmem:[%s556_s0] sm:$0xff]   ;;  %364 = vmatprep.subr.bf16.mxu0 %v407_v0  ;;  %v410_v4 = vld [vmem:[%s556_s0 + $0x8] sm:$0xff]   ;;  %v412_v6 = vld [vmem:[%s556_s0 + $0x10] sm:$0xff]  }
   0x3   :  { %365 = vmatpush3.bf16.msra.mxu0 %v408_v2  ;;  %v413_v7 = vld [vmem:[%s556_s0 + $0x58] sm:$0xff]   ;;  %v415_v9 = vld [vmem:[%s556_s0 + $0x60] sm:$0xff]   ;;  %v417_v12 = vld [vmem:[%s556_s0 + $0x68] sm:$0xff]  }
   0x4   :  { %366 = vmatprep.subr.bf16.mxu0 %v409_v3  ;;  %v414_v8 = vld [vmem:[%s556_s0 + $0x18] sm:$0xff]   ;;  %v416_v10 = vld [vmem:[%s556_s0 + $0x20] sm:$0xff]   ;;  %v418_v13 = vld [vmem:[%s556_s0 + $0x28] sm:$0xff]  }
   0x5   :  { %v422_v11 = vld [vmem:[%s556_s0 + $0x80] sm:$0xff]   ;;  %v419_v14 = vld [vmem:[%s556_s0 + $0x70] sm:$0xff]   ;;  %v427_v16 = vld [vmem:[%s556_s0 + $0x88] sm:$0xff]  }
   0x6   :  { %396 = vmatprep.subr.bf16.mxu1 %v422_v11  ;;  %v426_v15 = vld [vmem:[%s557_s1 + $0x4] ss:$12 sps:$4 sm:$0xff]   ;;  %v428_v17 = vld [vmem:[%s557_s1 + $0x8] ss:$12 sps:$4 sm:$0xff]   ;;  %v429_v18 = vld [vmem:[%s557_s1 + $0x20] ss:$12 sps:$4 sm:$0xff]  }
   0x7   :  { %367 = vmatpush3.bf16.msra.mxu0 %v410_v4  ;;  %397 = vmatpush3.bf16.msra.mxu1 %v422_v11  ;;  %v59_v19 = vld [vmem:[%s558_s2] sm:$0xff]  ;;  %v420_v20 = vld [vmem:[%s556_s0 + $0x30] sm:$0xff]   ;;  %v421_v22 = vld [vmem:[%s556_s0 + $0x78] sm:$0xff]  }
   0x8   :  { %368 = vmatprep.subr.bf16.mxu0 %v411_v5  ;;  %260 = vmatprep.mubr.bf16.mxu0 %v426_v15  ;;  %v61_v21 = vld [vmem:[%s558_s2 + $0x10] sm:$0xff]  ;;  %v60_v23 = vld [vmem:[%s558_s2 + $0x8] sm:$0xff]  ;;  %v62_v24 = vld [vmem:[%s558_s2 + $0x18] sm:$0xff] }
   0x9   :  { %398 = vmatprep.subr.bf16.mxu1 %v427_v16  ;;  %400 = vmatprep.mubr.msk.bf16.mxu1 %vm221_vm0, %v428_v17  ;;  %v423_v25 = vld [vmem:[%s556_s0 + $0x38] sm:$0xff]   ;;  %v424_v26 = vld [vmem:[%s557_s1] ss:$12 sps:$4 sm:$0xff]  }
   0xa   :  { %65 = vperm.xlu0 %405, %v59_v19   ;;  %75 = vperm.xlu1 %406, %v61_v21   ;;  %v430_v27 = vld [vmem:[%s557_s1 + $0x1c] ss:$12 sps:$4 sm:$0xff]   ;;  %v432_v28 = vld [vmem:[%s557_s1 + $0x18] ss:$12 sps:$4 sm:$0xff]  }
   0xb   :  { %369 = vmatpush3.bf16.msra.mxu0 %v412_v6  ;;  %399 = vmatpush3.bf16.msra.mxu1 %v427_v16 }
   0xc   :  { %370 = vmatprep.subr.bf16.mxu0 %v413_v7 }
   0xe   :  { %401 = vmatmul.mubr.msk.bf16.vlgmr.msra.gmra.mrb[0].mxu1 %vm221_vm0, %v429_v18  ;;  %70 = vperm.xlu0 %405, %v60_v23  }
   0xf   :  { %371 = vmatpush3.bf16.msra.mxu0 %v414_v8  ;;  %80 = vperm.xlu1 %406, %v62_v24  }
  0x10   :  { %372 = vmatprep.subr.bf16.mxu0 %v415_v9 }
  0x13   :  { %373 = vmatpush3.bf16.msra.mxu0 %v416_v10 }
  0x14   :  { %374 = vmatprep.subr.bf16.mxu0 %v417_v12 }
  0x17   :  { %375 = vmatpush3.bf16.msra.mxu0 %v418_v13 }
  0x18   :  { %376 = vmatprep.subr.bf16.mxu0 %v419_v14 }
  0x1b   :  { %377 = vmatpush3.bf16.msra.mxu0 %v420_v20 }
  0x1c   :  { %378 = vmatprep.subr.bf16.mxu0 %v421_v22 }
  0x1f   :  { %379 = vmatpush3.bf16.msra.mxu0 %v423_v25 }
  0x22   :  { %261 = vmatmul.mubr.bf16.vlgmr.msra.gmra.mrb[0].mxu0 %v424_v26 }
  0x23   :  { %268 = vmatprep.mubr.bf16.mxu0 %v430_v27 }
  0x2a   :  { %269 = vmatmul.mubr.bf16.gmra.mrb[4].mxu0 %v432_v28 }
  0x89   :  { %v66_v33 = vpop.permute.xlu0 %65  ;;  %v76_v44 = vpop.permute.xlu1 %75 }
  0x8d   :  { %v71_v39 = vpop.permute.xlu0 %70 }
  0x8e   :  { %v81_v55 = vpop.permute.xlu1 %80 }
  0xe1   :  { %v402_v29 = vpop.f32.mrb[0].mxu1 }
  0xe2   :  { %v311_v30 = vpop.f32.mrb[1].mxu1 }
  0xe3   :  { %v403_v31 = vpop.f32.mrb[2].mxu1 }
  0xe4   :  { %v314_v32 = vpop.f32.mrb[3].mxu1 }
  0xf5   :  { %v380_v34 = vpop.f32.mrb[0].mxu0 }
  0xf6   :  { %v381_v35 = vpop.f32.mrb[1].mxu0 }
  0xf7   :  { %v382_v36 = vadd.f32 %v381_v35, %v380_v34  ;;  %v383_v37 = vpop.f32.mrb[2].mxu0 }
  0xf8   :  { %v384_v38 = vpop.f32.mrb[3].mxu0 }
  0xf9   :  { %v385_v40 = vadd.f32 %v384_v38, %v383_v37  ;;  %v263_v41 = vadd.f32 %v382_v36, %v66_v33 }
  0xfb   :  { %v266_v42 = vadd.f32 %v385_v40, %v71_v39  ;;  %v312_v43 = vadd.f32 %v311_v30, %v263_v41 }
  0xfd   :  { %v326_v45 = vmax.f32 %v312_v43, 0.0  ;;  %v315_v46 = vadd.f32 %v314_v32, %v266_v42  ;;  %v386_v47 = vpop.f32.mrb[4].mxu0 }
  0xfe   :  { %v387_v48 = vpop.f32.mrb[5].mxu0 }
  0xff   :  { %330 = vst.msk [vmem:[%s559_s3] sm:$0xff] %vm221_vm0, %v326_v45  ;;  %v327_v49 = vmax.f32 %v315_v46, 0.0  ;;  %v388_v50 = vadd.f32 %v387_v48, %v386_v47  ;;  %v389_v51 = vpop.f32.mrb[6].mxu0 }
 0x100   :  { %v390_v52 = vpop.f32.mrb[7].mxu0 }
 0x101   :  { %331 = vst.msk [vmem:[%s559_s3 + $0x8] sm:$0xff] %vm221_vm0, %v327_v49  ;;  %v271_v53 = vadd.f32 %v388_v50, %v76_v44  ;;  %v391_v54 = vadd.f32 %v390_v52, %v389_v51 }
 0x103   :  { %v320_v56 = vadd.f32 %v402_v29, %v271_v53  ;;  %v274_v57 = vadd.f32 %v391_v54, %v81_v55 }
 0x105   :  { %v328_v58 = vmax.f32 %v320_v56, 0.0  ;;  %v323_v59 = vadd.f32 %v403_v31, %v274_v57 }
 0x107   :  { %332 = vst.msk [vmem:[%s559_s3 + $0x10] sm:$0xff] %vm221_vm0, %v328_v58  ;;  %v329_v60 = vmax.f32 %v323_v59, 0.0 }
 0x109   :  { %333 = vst.msk [vmem:[%s559_s3 + $0x18] sm:$0xff] %vm221_vm0, %v329_v60 }

// kernel: backbone_forward.31
= control target key start
LH: loop header
LB: loop body
LE: loop exit
PB: predicated region body
PF: predicated region fallthrough
CT: control target
= control target key end

     0   :  { %v444_v1 = vmov 0   ;;  %vm224_vm0 = vcmask 261120   ;;  %s584_s0 = inlined_call_operand.vmem [shape: bf16[288,32], index: 0, kind: input, shape index: {}]   ;;  %s585_s1 = inlined_call_operand.vmem [shape: bf16[32,288], index: 1, kind: input, shape index: {}]   ;;  %s586_s2 = inlined_call_operand.vmem [shape: f32[32,1], index: 2, kind: input, shape index: {}]   ;;  %s587_s3 = inlined_call_operand.vmem [shape: f32[32,32], index: 3, kind: input, shape index: {}]   ;;  %s588_s4 = inlined_call_operand.vmem [shape: f32[32,32], index: 4, kind: output, shape index: {}]  }
   0x1   :  { %v418_v0 = vld [vmem:[%s584_s0 + $0x40] sm:$0xff]   ;;  %416 = vset.pattern.permute.xlu0 %v444_v1  ;;  %417 = vset.pattern.permute.xlu1 %v444_v1  ;;  %v420_v3 = vld [vmem:[%s584_s0 + $0x48] sm:$0xff]   ;;  %v422_v5 = vld [vmem:[%s584_s0 + $0x50] sm:$0xff]  }
   0x2   :  { %v419_v2 = vld [vmem:[%s584_s0] sm:$0xff]   ;;  %375 = vmatprep.subr.bf16.mxu0 %v418_v0  ;;  %v421_v4 = vld [vmem:[%s584_s0 + $0x8] sm:$0xff]   ;;  %v423_v6 = vld [vmem:[%s584_s0 + $0x10] sm:$0xff]  }
   0x3   :  { %376 = vmatpush3.bf16.msra.mxu0 %v419_v2  ;;  %v424_v7 = vld [vmem:[%s584_s0 + $0x58] sm:$0xff]   ;;  %v426_v9 = vld [vmem:[%s584_s0 + $0x60] sm:$0xff]   ;;  %v428_v12 = vld [vmem:[%s584_s0 + $0x68] sm:$0xff]  }
   0x4   :  { %377 = vmatprep.subr.bf16.mxu0 %v420_v3  ;;  %v425_v8 = vld [vmem:[%s584_s0 + $0x18] sm:$0xff]   ;;  %v427_v10 = vld [vmem:[%s584_s0 + $0x20] sm:$0xff]   ;;  %v429_v13 = vld [vmem:[%s584_s0 + $0x28] sm:$0xff]  }
   0x5   :  { %v433_v11 = vld [vmem:[%s584_s0 + $0x80] sm:$0xff]   ;;  %v430_v14 = vld [vmem:[%s584_s0 + $0x70] sm:$0xff]   ;;  %v438_v16 = vld [vmem:[%s584_s0 + $0x88] sm:$0xff]  }
   0x6   :  { %407 = vmatprep.subr.bf16.mxu1 %v433_v11  ;;  %v437_v15 = vld [vmem:[%s585_s1 + $0x4] ss:$12 sps:$4 sm:$0xff]   ;;  %v439_v17 = vld [vmem:[%s585_s1 + $0x8] ss:$12 sps:$4 sm:$0xff]   ;;  %v440_v18 = vld [vmem:[%s585_s1 + $0x20] ss:$12 sps:$4 sm:$0xff]  }
   0x7   :  { %378 = vmatpush3.bf16.msra.mxu0 %v421_v4  ;;  %408 = vmatpush3.bf16.msra.mxu1 %v433_v11  ;;  %v62_v19 = vld [vmem:[%s586_s2] sm:$0xff]  ;;  %v431_v20 = vld [vmem:[%s584_s0 + $0x30] sm:$0xff]   ;;  %v432_v22 = vld [vmem:[%s584_s0 + $0x78] sm:$0xff]  }
   0x8   :  { %379 = vmatprep.subr.bf16.mxu0 %v422_v5  ;;  %263 = vmatprep.mubr.bf16.mxu0 %v437_v15  ;;  %v64_v21 = vld [vmem:[%s586_s2 + $0x10] sm:$0xff]  ;;  %v63_v23 = vld [vmem:[%s586_s2 + $0x8] sm:$0xff]  ;;  %v65_v24 = vld [vmem:[%s586_s2 + $0x18] sm:$0xff] }
   0x9   :  { %409 = vmatprep.subr.bf16.mxu1 %v438_v16  ;;  %411 = vmatprep.mubr.msk.bf16.mxu1 %vm224_vm0, %v439_v17  ;;  %v434_v25 = vld [vmem:[%s584_s0 + $0x38] sm:$0xff]   ;;  %v435_v26 = vld [vmem:[%s585_s1] ss:$12 sps:$4 sm:$0xff]   ;;  %v331_v60 = vld [vmem:[%s587_s3 + $0x10] sm:$0xff] }
   0xa   :  { %68 = vperm.xlu0 %416, %v62_v19   ;;  %78 = vperm.xlu1 %417, %v64_v21   ;;  %v441_v27 = vld [vmem:[%s585_s1 + $0x1c] ss:$12 sps:$4 sm:$0xff]   ;;  %v443_v28 = vld [vmem:[%s585_s1 + $0x18] ss:$12 sps:$4 sm:$0xff]  }
   0xb   :  { %380 = vmatpush3.bf16.msra.mxu0 %v423_v6  ;;  %410 = vmatpush3.bf16.msra.mxu1 %v438_v16  ;;  %v329_v42 = vld [vmem:[%s587_s3] sm:$0xff]  ;;  %v330_v46 = vld [vmem:[%s587_s3 + $0x8] sm:$0xff]  ;;  %v332_v63 = vld [vmem:[%s587_s3 + $0x18] sm:$0xff] }
   0xc   :  { %381 = vmatprep.subr.bf16.mxu0 %v424_v7 }
   0xe   :  { %412 = vmatmul.mubr.msk.bf16.vlgmr.msra.gmra.mrb[0].mxu1 %vm224_vm0, %v440_v18  ;;  %73 = vperm.xlu0 %416, %v63_v23  }
   0xf   :  { %382 = vmatpush3.bf16.msra.mxu0 %v425_v8  ;;  %83 = vperm.xlu1 %417, %v65_v24  }
  0x10   :  { %383 = vmatprep.subr.bf16.mxu0 %v426_v9 }
  0x13   :  { %384 = vmatpush3.bf16.msra.mxu0 %v427_v10 }
  0x14   :  { %385 = vmatprep.subr.bf16.mxu0 %v428_v12 }
  0x17   :  { %386 = vmatpush3.bf16.msra.mxu0 %v429_v13 }
  0x18   :  { %387 = vmatprep.subr.bf16.mxu0 %v430_v14 }
  0x1b   :  { %388 = vmatpush3.bf16.msra.mxu0 %v431_v20 }
  0x1c   :  { %389 = vmatprep.subr.bf16.mxu0 %v432_v22 }
  0x1f   :  { %390 = vmatpush3.bf16.msra.mxu0 %v434_v25 }
  0x22   :  { %264 = vmatmul.mubr.bf16.vlgmr.msra.gmra.mrb[0].mxu0 %v435_v26 }
  0x23   :  { %271 = vmatprep.mubr.bf16.mxu0 %v441_v27 }
  0x2a   :  { %272 = vmatmul.mubr.bf16.gmra.mrb[4].mxu0 %v443_v28 }
  0x89   :  { %v69_v33 = vpop.permute.xlu0 %68  ;;  %v79_v45 = vpop.permute.xlu1 %78 }
  0x8d   :  { %v74_v39 = vpop.permute.xlu0 %73 }
  0x8e   :  { %v84_v59 = vpop.permute.xlu1 %83 }
  0xe1   :  { %v413_v29 = vpop.f32.mrb[0].mxu1 }
  0xe2   :  { %v314_v30 = vpop.f32.mrb[1].mxu1 }
  0xe3   :  { %v414_v31 = vpop.f32.mrb[2].mxu1 }
  0xe4   :  { %v317_v32 = vpop.f32.mrb[3].mxu1 }
  0xf5   :  { %v391_v34 = vpop.f32.mrb[0].mxu0 }
  0xf6   :  { %v392_v35 = vpop.f32.mrb[1].mxu0 }
  0xf7   :  { %v393_v36 = vadd.f32 %v392_v35, %v391_v34  ;;  %v394_v37 = vpop.f32.mrb[2].mxu0 }
  0xf8   :  { %v395_v38 = vpop.f32.mrb[3].mxu0 }
  0xf9   :  { %v396_v40 = vadd.f32 %v395_v38, %v394_v37  ;;  %v266_v41 = vadd.f32 %v393_v36, %v69_v33 }
  0xfb   :  { %v269_v43 = vadd.f32 %v396_v40, %v74_v39  ;;  %v315_v44 = vadd.f32 %v314_v30, %v266_v41 }
  0xfd   :  { %v333_v47 = vadd.f32 %v329_v42, %v315_v44  ;;  %v318_v48 = vadd.f32 %v317_v32, %v269_v43  ;;  %v397_v49 = vpop.f32.mrb[4].mxu0 }
  0xfe   :  { %v398_v50 = vpop.f32.mrb[5].mxu0 }
  0xff   :  { %v337_v51 = vmax.f32 %v333_v47, 0.0  ;;  %v334_v52 = vadd.f32 %v330_v46, %v318_v48  ;;  %v399_v53 = vadd.f32 %v398_v50, %v397_v49  ;;  %v400_v54 = vpop.f32.mrb[6].mxu0 }
 0x100   :  { %v401_v55 = vpop.f32.mrb[7].mxu0 }
 0x101   :  { %341 = vst.msk [vmem:[%s588_s4] sm:$0xff] %vm224_vm0, %v337_v51  ;;  %v338_v56 = vmax.f32 %v334_v52, 0.0  ;;  %v274_v57 = vadd.f32 %v399_v53, %v79_v45  ;;  %v402_v58 = vadd.f32 %v401_v55, %v400_v54 }
 0x103   :  { %342 = vst.msk [vmem:[%s588_s4 + $0x8] sm:$0xff] %vm224_vm0, %v338_v56  ;;  %v323_v61 = vadd.f32 %v413_v29, %v274_v57  ;;  %v277_v62 = vadd.f32 %v402_v58, %v84_v59 }
 0x105   :  { %v335_v0 = vadd.f32 %v331_v60, %v323_v61  ;;  %v326_v1 = vadd.f32 %v414_v31, %v277_v62 }
 0x107   :  { %v339_v2 = vmax.f32 %v335_v0, 0.0  ;;  %v336_v3 = vadd.f32 %v332_v63, %v326_v1 }
 0x109   :  { %343 = vst.msk [vmem:[%s588_s4 + $0x10] sm:$0xff] %vm224_vm0, %v339_v2  ;;  %v340_v4 = vmax.f32 %v336_v3, 0.0 }
 0x10b   :  { %344 = vst.msk [vmem:[%s588_s4 + $0x18] sm:$0xff] %vm224_vm0, %v340_v4 }

// kernel: backbone_forward.29
= control target key start
LH: loop header
LB: loop body
LE: loop exit
PB: predicated region body
PF: predicated region fallthrough
CT: control target
= control target key end

     0   :  { %v577_v1 = vmov 0   ;;  %vm70_vm0 = vcmask 130048   ;;  %vm332_vm1 = vcmask 261120   ;;  %s736_s0 = inlined_call_operand.vmem [shape: bf16[288,32], index: 0, kind: input, shape index: {}]   ;;  %s737_s3 = inlined_call_operand.vmem [shape: bf16[16,32], index: 3, kind: input, shape index: {}]   ;;  %s738_s4 = inlined_call_operand.vmem [shape: bf16[32,16], index: 4, kind: input, shape index: {}]   ;;  %s739_s1 = inlined_call_operand.vmem [shape: bf16[32,288], index: 1, kind: input, shape index: {}]   ;;  %s740_s2 = inlined_call_operand.vmem [shape: f32[32,1], index: 2, kind: input, shape index: {}]   ;;  %s741_s5 = inlined_call_operand.vmem [shape: f32[32,1], index: 5, kind: input, shape index: {}]   ;;  %s742_s6 = inlined_call_operand.vmem [shape: f32[32,32], index: 6, kind: output, shape index: {}]  }
   0x1   :  { %v548_v0 = vld [vmem:[%s736_s0 + $0x40] sm:$0xff]   ;;  %547 = vset.pattern.permute.xlu1 %v577_v1  ;;  %546 = vset.pattern.permute.xlu0 %v577_v1  ;;  %v550_v3 = vld [vmem:[%s736_s0 + $0x48] sm:$0xff]   ;;  %v552_v5 = vld [vmem:[%s736_s0 + $0x50] sm:$0xff]  }
   0x2   :  { %v549_v2 = vld [vmem:[%s736_s0] sm:$0xff]   ;;  %487 = vmatprep.subr.bf16.mxu1 %v548_v0  ;;  %v551_v4 = vld [vmem:[%s736_s0 + $0x8] sm:$0xff]   ;;  %v553_v6 = vld [vmem:[%s736_s0 + $0x10] sm:$0xff]  }
   0x3   :  { %488 = vmatpush3.bf16.msra.mxu1 %v549_v2  ;;  %v554_v7 = vld [vmem:[%s736_s0 + $0x58] sm:$0xff]   ;;  %v556_v8 = vld [vmem:[%s737_s3] sm:$0xff]   ;;  %v560_v12 = vld [vmem:[%s738_s4 + $0x8] sm:$0xff]  }
   0x4   :  { %489 = vmatprep.subr.bf16.mxu1 %v550_v3  ;;  %v555_v9 = vld [vmem:[%s736_s0 + $0x18] sm:$0xff]   ;;  %519 = vmatprep.subr.bf16.mxu0 %v556_v8  ;;  %v557_v10 = vld [vmem:[%s736_s0 + $0x60] sm:$0xff]   ;;  %v561_v15 = vld [vmem:[%s736_s0 + $0x68] sm:$0xff]  }
   0x5   :  { %520 = vmatpush3.bf16.msra.mxu0 %v556_v8  ;;  %v559_v11 = vld [vmem:[%s738_s4] sm:$0xff]   ;;  %v566_v16 = vld [vmem:[%s736_s0 + $0x88] sm:$0xff]   ;;  %v564_v18 = vld [vmem:[%s736_s0 + $0x70] sm:$0xff]  }
   0x6   :  { %521 = vmatprep.mubr.msk.bf16.mxu0 %vm70_vm0, %v559_v11  ;;  %v558_v13 = vld [vmem:[%s736_s0 + $0x20] sm:$0xff]   ;;  %v562_v17 = vld [vmem:[%s736_s0 + $0x28] sm:$0xff]   ;;  %v565_v19 = vld [vmem:[%s736_s0 + $0x30] sm:$0xff]  }
   0x7   :  { %490 = vmatpush3.bf16.msra.mxu1 %v551_v4  ;;  %v563_v14 = vld [vmem:[%s736_s0 + $0x80] sm:$0xff]   ;;  %v569_v20 = vld [vmem:[%s739_s1 + $0x8] ss:$12 sps:$4 sm:$0xff]   ;;  %v567_v21 = vld [vmem:[%s736_s0 + $0x78] sm:$0xff]  }
   0x8   :  { %491 = vmatprep.subr.bf16.mxu1 %v552_v5  ;;  %522 = vmatmul.mubr.msk.bf16.vlgmr.msra.gmra.mrb[0].mxu0 %vm70_vm0, %v560_v12  ;;  %v572_v22 = vld [vmem:[%s739_s1 + $0x4] ss:$12 sps:$4 sm:$0xff]   ;;  %v573_v23 = vld [vmem:[%s739_s1 + $0x20] ss:$12 sps:$4 sm:$0xff]   ;;  %v568_v26 = vld [vmem:[%s736_s0 + $0x38] sm:$0xff]  }
   0x9   :  { %525 = vmatprep.subr.bf16.mxu0 %v563_v14  ;;  %529 = vmatprep.mubr.msk.bf16.mxu0 %vm332_vm1, %v569_v20  ;;  %v172_v24 = vld [vmem:[%s740_s2 + $0x10] sm:$0xff]  ;;  %v170_v25 = vld [vmem:[%s740_s2] sm:$0xff]  ;;  %v173_v27 = vld [vmem:[%s740_s2 + $0x18] sm:$0xff] }
   0xa   :  { %526 = vmatpush3.bf16.msra.mxu0 %v563_v14  ;;  %371 = vmatprep.mubr.bf16.mxu1 %v572_v22  ;;  %v171_v28 = vld [vmem:[%s740_s2 + $0x8] sm:$0xff]  ;;  %v30_v32 = vld [vmem:[%s741_s5] sm:$0xff]  ;;  %v33_v33 = vld [vmem:[%s741_s5 + $0x18] sm:$0xff] }
   0xb   :  { %492 = vmatpush3.bf16.msra.mxu1 %v553_v6  ;;  %527 = vmatprep.subr.bf16.mxu0 %v566_v16  ;;  %v570_v29 = vld [vmem:[%s739_s1] ss:$12 sps:$4 sm:$0xff]   ;;  %v574_v30 = vld [vmem:[%s739_s1 + $0x1c] ss:$12 sps:$4 sm:$0xff]   ;;  %v32_v34 = vld [vmem:[%s741_s5 + $0x10] sm:$0xff] }
   0xc   :  { %493 = vmatprep.subr.bf16.mxu1 %v554_v7  ;;  %186 = vperm.xlu1 %547, %v172_v24   ;;  %v31_v31 = vld [vmem:[%s741_s5 + $0x8] sm:$0xff]  ;;  %v576_v35 = vld [vmem:[%s739_s1 + $0x18] ss:$12 sps:$4 sm:$0xff]  }
   0xd   :  { %176 = vperm.xlu0 %546, %v170_v25  }
   0xe   :  { %528 = vmatpush3.bf16.msra.mxu0 %v566_v16 }
   0xf   :  { %494 = vmatpush3.bf16.msra.mxu1 %v555_v9 }
  0x10   :  { %495 = vmatprep.subr.bf16.mxu1 %v557_v10  ;;  %191 = vperm.xlu1 %547, %v173_v27  }
  0x11   :  { %181 = vperm.xlu0 %546, %v171_v28  }
  0x13   :  { %496 = vmatpush3.bf16.msra.mxu1 %v558_v13 }
  0x14   :  { %497 = vmatprep.subr.bf16.mxu1 %v561_v15  ;;  %530 = vmatmul.mubr.msk.bf16.vlgmr.msra.gmra.mrb[0].mxu0 %vm332_vm1, %v573_v23 }
  0x15   :  { %41 = vperm.xlu1 %547, %v31_v31   ;;  %36 = vperm.xlu0 %546, %v30_v32  }
  0x17   :  { %498 = vmatpush3.bf16.msra.mxu1 %v562_v17 }
  0x18   :  { %499 = vmatprep.subr.bf16.mxu1 %v564_v18 }
  0x19   :  { %51 = vperm.xlu1 %547, %v33_v33   ;;  %46 = vperm.xlu0 %546, %v32_v34  }
  0x1b   :  { %500 = vmatpush3.bf16.msra.mxu1 %v565_v19 }
  0x1c   :  { %501 = vmatprep.subr.bf16.mxu1 %v567_v21 }
  0x1f   :  { %502 = vmatpush3.bf16.msra.mxu1 %v568_v26 }
  0x22   :  { %372 = vmatmul.mubr.bf16.vlgmr.msra.gmra.mrb[0].mxu1 %v570_v29 }
  0x23   :  { %379 = vmatprep.mubr.bf16.mxu1 %v574_v30 }
  0x2a   :  { %380 = vmatmul.mubr.bf16.gmra.mrb[4].mxu1 %v576_v35 }
  0x8b   :  { %v187_v40 = vpop.permute.xlu1 %186 }
  0x8c   :  { %v177_v37 = vpop.permute.xlu0 %176 }
  0x8f   :  { %v192_v44 = vpop.permute.xlu1 %191 }
  0x90   :  { %v182_v42 = vpop.permute.xlu0 %181 }
  0x94   :  { %v37_v51 = vpop.permute.xlu0 %36  ;;  %v42_v54 = vpop.permute.xlu1 %41 }
  0x98   :  { %v47_v3 = vpop.permute.xlu0 %46  ;;  %v52_v6 = vpop.permute.xlu1 %51 }
  0xe7   :  { %v531_v36 = vpop.f32.mrb[0].mxu0 }
  0xe8   :  { %v422_v38 = vpop.f32.mrb[1].mxu0 }
  0xe9   :  { %v532_v39 = vpop.f32.mrb[2].mxu0 }
  0xea   :  { %v425_v41 = vpop.f32.mrb[3].mxu0 }
  0xf5   :  { %v503_v43 = vpop.f32.mrb[0].mxu1 }
  0xf6   :  { %v504_v45 = vpop.f32.mrb[1].mxu1 }
  0xf7   :  { %v505_v46 = vadd.f32 %v504_v45, %v503_v43  ;;  %v506_v47 = vpop.f32.mrb[2].mxu1 }
  0xf8   :  { %v507_v48 = vpop.f32.mrb[3].mxu1 }
  0xf9   :  { %v374_v49 = vadd.f32 %v505_v46, %v177_v37  ;;  %v508_v50 = vadd.f32 %v507_v48, %v506_v47 }
  0xfb   :  { %v535_v52 = vadd.f32 %v374_v49, %v37_v51  ;;  %v377_v53 = vadd.f32 %v508_v50, %v182_v42 }
  0xfd   :  { %v536_v55 = vadd.f32 %v535_v52, %v422_v38  ;;  %v539_v56 = vadd.f32 %v377_v53, %v42_v54  ;;  %v509_v57 = vpop.f32.mrb[4].mxu1 }
  0xfe   :  { %v510_v58 = vpop.f32.mrb[5].mxu1 }
  0xff   :  { %v441_v59 = vmax.f32 %v536_v55, 0.0  ;;  %v540_v60 = vadd.f32 %v539_v56, %v425_v41  ;;  %v511_v61 = vadd.f32 %v510_v58, %v509_v57  ;;  %v512_v62 = vpop.f32.mrb[6].mxu1 }
 0x100   :  { %v513_v63 = vpop.f32.mrb[7].mxu1 }
 0x101   :  { %445 = vst.msk [vmem:[%s742_s6] sm:$0xff] %vm332_vm1, %v441_v59  ;;  %v442_v0 = vmax.f32 %v540_v60, 0.0  ;;  %v382_v1 = vadd.f32 %v511_v61, %v187_v40  ;;  %v514_v2 = vadd.f32 %v513_v63, %v512_v62 }
 0x103   :  { %446 = vst.msk [vmem:[%s742_s6 + $0x8] sm:$0xff] %vm332_vm1, %v442_v0  ;;  %v533_v4 = vadd.f32 %v382_v1, %v47_v3  ;;  %v385_v5 = vadd.f32 %v514_v2, %v192_v44 }
 0x105   :  { %v534_v7 = vadd.f32 %v533_v4, %v531_v36  ;;  %v537_v8 = vadd.f32 %v385_v5, %v52_v6 }
 0x107   :  { %v443_v9 = vmax.f32 %v534_v7, 0.0  ;;  %v538_v10 = vadd.f32 %v537_v8, %v532_v39 }
 0x109   :  { %447 = vst.msk [vmem:[%s742_s6 + $0x10] sm:$0xff] %vm332_vm1, %v443_v9  ;;  %v444_v11 = vmax.f32 %v538_v10, 0.0 }
 0x10b   :  { %448 = vst.msk [vmem:[%s742_s6 + $0x18] sm:$0xff] %vm332_vm1, %v444_v11 }

// kernel: backbone_forward.32
= control target key start
LH: loop header
LB: loop body
LE: loop exit
PB: predicated region body
PF: predicated region fallthrough
CT: control target
= control target key end

     0   :  { %v592_v1 = vmov 0   ;;  %vm283_vm0 = vcmask 261120   ;;  %vm434_vm1 = vcmask 64512   ;;  %s763_s0 = inlined_call_operand.vmem [shape: bf16[288,8], index: 0, kind: input, shape index: {}]   ;;  %s764_s1 = inlined_call_operand.vmem [shape: bf16[64,288], index: 1, kind: input, shape index: {}]   ;;  %s765_s2 = inlined_call_operand.vmem [shape: f32[64,1], index: 2, kind: input, shape index: {}]   ;;  %s766_s3 = inlined_call_operand.vmem [shape: f32[64,8], index: 3, kind: output, shape index: {}]  }
   0x1   :  { %v558_v0 = vld [vmem:[%s763_s0 + $0x40] sm:$0xff]   ;;  %557 = vset.pattern.permute.xlu1 %v592_v1  ;;  %556 = vset.pattern.permute.xlu0 %v592_v1  ;;  %v560_v3 = vld [vmem:[%s763_s0 + $0x48] sm:$0xff]   ;;  %v562_v5 = vld [vmem:[%s763_s0 + $0x50] sm:$0xff]  }
   0x2   :  { %v559_v2 = vld [vmem:[%s763_s0] sm:$0xff]   ;;  %481 = vmatprep.subr.bf16.mxu0 %v558_v0  ;;  %539 = vmatprep.subr.bf16.mxu1 %v558_v0  ;;  %v561_v4 = vld [vmem:[%s763_s0 + $0x8] sm:$0xff]   ;;  %v563_v6 = vld [vmem:[%s763_s0 + $0x10] sm:$0xff]  }
   0x3   :  { %482 = vmatpush3.bf16.msra.mxu0 %v559_v2  ;;  %547 = vmatpush3.bf16.msra.mxu1 %v559_v2  ;;  %v564_v7 = vld [vmem:[%s763_s0 + $0x58] sm:$0xff]   ;;  %v566_v9 = vld [vmem:[%s763_s0 + $0x60] sm:$0xff]   ;;  %v568_v11 = vld [vmem:[%s763_s0 + $0x68] sm:$0xff]  }
   0x4   :  { %483 = vmatprep.subr.bf16.mxu0 %v560_v3  ;;  %540 = vmatprep.subr.bf16.mxu1 %v560_v3  ;;  %v565_v8 = vld [vmem:[%s763_s0 + $0x18] sm:$0xff]   ;;  %v567_v10 = vld [vmem:[%s763_s0 + $0x20] sm:$0xff]   ;;  %v569_v14 = vld [vmem:[%s763_s0 + $0x28] sm:$0xff]  }
   0x5   :  { %v576_v12 = vld [vmem:[%s764_s1 + $0x4] ss:$12 sps:$4 sm:$0xff]   ;;  %v579_v13 = vld [vmem:[%s764_s1 + $0x4c] ss:$12 sps:$4 sm:$0xff]   ;;  %v577_v23 = vld [vmem:[%s764_s1 + $0x48] ss:$12 sps:$4 sm:$0xff]  }
   0x6   :  { %v570_v15 = vld [vmem:[%s763_s0 + $0x70] sm:$0xff]   ;;  %328 = vmatprep.mubr.bf16.mxu0 %v576_v12  ;;  %352 = vmatprep.mubr.bf16.mxu1 %v579_v13  ;;  %v572_v17 = vld [vmem:[%s763_s0 + $0x78] sm:$0xff]   ;;  %v67_v20 = vld [vmem:[%s765_s2] sm:$0xff] }
   0x7   :  { %484 = vmatpush3.bf16.msra.mxu0 %v561_v4  ;;  %548 = vmatpush3.bf16.msra.mxu1 %v561_v4  ;;  %v571_v16 = vld [vmem:[%s763_s0 + $0x30] sm:$0xff]   ;;  %v573_v18 = vld [vmem:[%s763_s0 + $0x38] sm:$0xff]   ;;  %v580_v21 = vld [vmem:[%s763_s0 + $0x80] sm:$0xff]  }
   0x8   :  { %485 = vmatprep.subr.bf16.mxu0 %v562_v5  ;;  %541 = vmatprep.subr.bf16.mxu1 %v562_v5  ;;  %v69_v19 = vld [vmem:[%s765_s2 + $0x10] sm:$0xff]  ;;  %v574_v22 = vld [vmem:[%s764_s1] ss:$12 sps:$4 sm:$0xff]   ;;  %v70_v24 = vld [vmem:[%s765_s2 + $0x18] sm:$0xff] }
   0x9   :  { %87 = vperm.xlu1 %557, %v69_v19   ;;  %77 = vperm.xlu0 %556, %v67_v20   ;;  %v68_v25 = vld [vmem:[%s765_s2 + $0x8] sm:$0xff]  ;;  %v71_v30 = vld [vmem:[%s765_s2 + $0x20] sm:$0xff]  ;;  %v74_v33 = vld [vmem:[%s765_s2 + $0x38] sm:$0xff] }
   0xa   :  { %v582_v26 = vld [vmem:[%s764_s1 + $0x1c] ss:$12 sps:$4 sm:$0xff]   ;;  %v585_v31 = vld [vmem:[%s764_s1 + $0x18] ss:$12 sps:$4 sm:$0xff]   ;;  %v586_v32 = vld [vmem:[%s764_s1 + $0x20] ss:$12 sps:$4 sm:$0xff]  }
   0xb   :  { %486 = vmatpush3.bf16.msra.mxu0 %v563_v6  ;;  %549 = vmatpush3.bf16.msra.mxu1 %v563_v6  ;;  %v581_v27 = vld [vmem:[%s763_s0 + $0x88] sm:$0xff]   ;;  %v73_v34 = vld [vmem:[%s765_s2 + $0x30] sm:$0xff]  ;;  %v589_v36 = vld [vmem:[%s764_s1 + $0x38] ss:$12 sps:$4 sm:$0xff]  }
   0xc   :  { %487 = vmatprep.subr.bf16.mxu0 %v564_v7  ;;  %542 = vmatprep.subr.bf16.mxu1 %v564_v7  ;;  %v584_v28 = vld [vmem:[%s764_s1 + $0x8] ss:$12 sps:$4 sm:$0xff]   ;;  %v590_v37 = vld [vmem:[%s764_s1 + $0x30] ss:$12 sps:$4 sm:$0xff]  }
   0xd   :  { %92 = vperm.xlu1 %557, %v70_v24   ;;  %82 = vperm.xlu0 %556, %v68_v25   ;;  %v72_v29 = vld [vmem:[%s765_s2 + $0x28] sm:$0xff]  ;;  %v587_v35 = vld [vmem:[%s764_s1 + $0x34] ss:$12 sps:$4 sm:$0xff]   ;;  %v591_v38 = vld [vmem:[%s764_s1 + $0x50] ss:$12 sps:$4 sm:$0xff]  }
   0xf   :  { %488 = vmatpush3.bf16.msra.mxu0 %v565_v8  ;;  %550 = vmatpush3.bf16.msra.mxu1 %v565_v8 }
  0x10   :  { %489 = vmatprep.subr.bf16.mxu0 %v566_v9  ;;  %543 = vmatprep.subr.bf16.mxu1 %v566_v9 }
  0x11   :  { %102 = vperm.xlu1 %557, %v72_v29   ;;  %97 = vperm.xlu0 %556, %v71_v30  }
  0x13   :  { %490 = vmatpush3.bf16.msra.mxu0 %v567_v10  ;;  %551 = vmatpush3.bf16.msra.mxu1 %v567_v10 }
  0x14   :  { %491 = vmatprep.subr.bf16.mxu0 %v568_v11  ;;  %544 = vmatprep.subr.bf16.mxu1 %v568_v11 }
  0x15   :  { %112 = vperm.xlu1 %557, %v74_v33   ;;  %107 = vperm.xlu0 %556, %v73_v34  }
  0x17   :  { %492 = vmatpush3.bf16.msra.mxu0 %v569_v14  ;;  %552 = vmatpush3.bf16.msra.mxu1 %v569_v14 }
  0x18   :  { %493 = vmatprep.subr.bf16.mxu0 %v570_v15  ;;  %545 = vmatprep.subr.bf16.mxu1 %v570_v15 }
  0x1b   :  { %494 = vmatpush3.bf16.msra.mxu0 %v571_v16  ;;  %553 = vmatpush3.bf16.msra.mxu1 %v571_v16 }
  0x1c   :  { %495 = vmatprep.subr.bf16.mxu0 %v572_v17  ;;  %546 = vmatprep.subr.bf16.mxu1 %v572_v17 }
  0x1f   :  { %496 = vmatpush3.bf16.msra.mxu0 %v573_v18  ;;  %554 = vmatpush3.bf16.msra.mxu1 %v573_v18 }
  0x20   :  { %527 = vmatprep.subr.bf16.mxu1 %v580_v21 }
  0x22   :  { %329 = vmatmul.mubr.bf16.vlgmr.msra.gmra.mrb[0].mxu0 %v574_v22  ;;  %353 = vmatmul.mubr.bf16.vlgmr.msra.gmra.mrb[0].mxu1 %v577_v23 }
  0x23   :  { %528 = vmatpush3.bf16.msra.mxu1 %v580_v21  ;;  %336 = vmatprep.mubr.bf16.mxu0 %v582_v26 }
  0x24   :  { %529 = vmatprep.subr.bf16.mxu1 %v581_v27  ;;  %531 = vmatprep.mubr.msk.bf16.mxu1 %vm283_vm0, %v584_v28 }
  0x27   :  { %530 = vmatpush3.bf16.msra.mxu1 %v581_v27 }
  0x2a   :  { %337 = vmatmul.mubr.bf16.gmra.mrb[4].mxu0 %v585_v31  ;;  %532 = vmatmul.mubr.msk.bf16.vlgmr.msra.gmra.mrb[4].mxu1 %vm283_vm0, %v586_v32 }
  0x2b   :  { %344 = vmatprep.mubr.bf16.mxu0 %v587_v35  ;;  %535 = vmatprep.mubr.msk.bf16.mxu1 %vm283_vm0, %v589_v36 }
  0x32   :  { %345 = vmatmul.mubr.bf16.gmra.mrb[8].mxu0 %v590_v37  ;;  %536 = vmatmul.mubr.msk.bf16.gmra.mrb[8].mxu1 %vm283_vm0, %v591_v38 }
  0x88   :  { %v88_v39 = vpop.permute.xlu1 %87  ;;  %v78_v40 = vpop.permute.xlu0 %77 }
  0x8c   :  { %v93_v41 = vpop.permute.xlu1 %92  ;;  %v83_v42 = vpop.permute.xlu0 %82 }
  0x90   :  { %v98_v55 = vpop.permute.xlu0 %97  ;;  %v103_v56 = vpop.permute.xlu1 %102 }
  0x94   :  { %v108_v5 = vpop.permute.xlu0 %107  ;;  %v113_v10 = vpop.permute.xlu1 %112 }
  0xf5   :  { %v497_v43 = vpop.f32.mrb[0].mxu0  ;;  %v515_v44 = vpop.f32.mrb[0].mxu1 }
  0xf6   :  { %v498_v45 = vpop.f32.mrb[1].mxu0  ;;  %v516_v46 = vpop.f32.mrb[1].mxu1 }
  0xf7   :  { %v499_v47 = vadd.f32 %v498_v45, %v497_v43  ;;  %v500_v48 = vpop.f32.mrb[2].mxu0  ;;  %v517_v49 = vadd.f32 %v516_v46, %v515_v44  ;;  %v518_v50 = vpop.f32.mrb[2].mxu1 }
  0xf8   :  { %v501_v51 = vpop.f32.mrb[3].mxu0  ;;  %v519_v52 = vpop.f32.mrb[3].mxu1 }
  0xf9   :  { %v502_v53 = vadd.f32 %v501_v51, %v500_v48  ;;  %v520_v54 = vadd.f32 %v519_v52, %v518_v50  ;;  %v331_v59 = vadd.f32 %v499_v47, %v78_v40  ;;  %v355_v14 = vadd.f32 %v517_v49, %v108_v5 }
  0xfb   :  { %v334_v2 = vadd.f32 %v502_v53, %v83_v42  ;;  %v358_v19 = vadd.f32 %v520_v54, %v113_v10 }
  0xfd   :  { %v503_v57 = vpop.f32.mrb[4].mxu0  ;;  %v533_v58 = vpop.f32.mrb[4].mxu1 }
  0xfe   :  { %v504_v60 = vpop.f32.mrb[5].mxu0  ;;  %v395_v61 = vpop.f32.mrb[5].mxu1 }
  0xff   :  { %v505_v62 = vadd.f32 %v504_v60, %v503_v57  ;;  %v396_v63 = vadd.f32 %v395_v61, %v331_v59  ;;  %v506_v0 = vpop.f32.mrb[6].mxu0  ;;  %v534_v1 = vpop.f32.mrb[6].mxu1 }
 0x100   :  { %v507_v3 = vpop.f32.mrb[7].mxu0  ;;  %v398_v4 = vpop.f32.mrb[7].mxu1 }
 0x101   :  { %v339_v6 = vadd.f32 %v505_v62, %v88_v39  ;;  %v426_v7 = vmax.f32 %v396_v63, 0.0  ;;  %v508_v8 = vadd.f32 %v507_v3, %v506_v0  ;;  %v399_v9 = vadd.f32 %v398_v4, %v334_v2 }
 0x103   :  { %v404_v11 = vadd.f32 %v533_v58, %v339_v6  ;;  %435 = vst.msk [vmem:[%s766_s3] sm:$0xff] %vm434_vm1, %v426_v7  ;;  %v342_v12 = vadd.f32 %v508_v8, %v93_v41  ;;  %v427_v13 = vmax.f32 %v399_v9, 0.0 }
 0x105   :  { %v428_v15 = vmax.f32 %v404_v11, 0.0  ;;  %v407_v16 = vadd.f32 %v534_v1, %v342_v12  ;;  %436 = vst.msk [vmem:[%s766_s3 + $0x8] sm:$0xff] %vm434_vm1, %v427_v13  ;;  %v509_v17 = vpop.f32.mrb[8].mxu0  ;;  %v537_v18 = vpop.f32.mrb[8].mxu1 }
 0x106   :  { %v420_v20 = vadd.f32 %v537_v18, %v355_v14  ;;  %v510_v21 = vpop.f32.mrb[9].mxu0  ;;  %v411_v22 = vpop.f32.mrb[9].mxu1 }
 0x107   :  { %437 = vst.msk [vmem:[%s766_s3 + $0x10] sm:$0xff] %vm434_vm1, %v428_v15  ;;  %v429_v23 = vmax.f32 %v407_v16, 0.0  ;;  %v511_v24 = vadd.f32 %v510_v21, %v509_v17  ;;  %v512_v25 = vpop.f32.mrb[10].mxu0  ;;  %v538_v26 = vpop.f32.mrb[10].mxu1 }
 0x108   :  { %v432_v27 = vmax.f32 %v420_v20, 0.0  ;;  %v423_v28 = vadd.f32 %v538_v26, %v358_v19  ;;  %v513_v29 = vpop.f32.mrb[11].mxu0  ;;  %v414_v30 = vpop.f32.mrb[11].mxu1 }
 0x109   :  { %438 = vst.msk [vmem:[%s766_s3 + $0x18] sm:$0xff] %vm434_vm1, %v429_v23  ;;  %v347_v31 = vadd.f32 %v511_v24, %v98_v55  ;;  %v514_v32 = vadd.f32 %v513_v29, %v512_v25 }
 0x10a   :  { %441 = vst.msk [vmem:[%s766_s3 + $0x30] sm:$0xff] %vm434_vm1, %v432_v27  ;;  %v433_v33 = vmax.f32 %v423_v28, 0.0 }
 0x10b   :  { %v412_v34 = vadd.f32 %v411_v22, %v347_v31  ;;  %v350_v35 = vadd.f32 %v514_v32, %v103_v56 }
 0x10c   :  { %442 = vst.msk [vmem:[%s766_s3 + $0x38] sm:$0xff] %vm434_vm1, %v433_v33 }
 0x10d   :  { %v430_v36 = vmax.f32 %v412_v34, 0.0  ;;  %v415_v37 = vadd.f32 %v414_v30, %v350_v35 }
 0x10f   :  { %439 = vst.msk [vmem:[%s766_s3 + $0x20] sm:$0xff] %vm434_vm1, %v430_v36  ;;  %v431_v38 = vmax.f32 %v415_v37, 0.0 }
 0x111   :  { %440 = vst.msk [vmem:[%s766_s3 + $0x28] sm:$0xff] %vm434_vm1, %v431_v38 }

// kernel: backbone_forward.33
= control target key start
LH: loop header
LB: loop body
LE: loop exit
PB: predicated region body
PF: predicated region fallthrough
CT: control target
= control target key end

     0   :  { %v1180_v1 = vmov 0   ;;  %vm116_vm0 = vcmask 261120   ;;  %vm654_vm1 = vcmask 523264   ;;  %vm878_vm2 = vcmask 64512   ;;  %s1511_s3 = inlined_call_operand.vmem [shape: bf16[32,8], index: 3, kind: input, shape index: {}]   ;;  %s1512_s0 = inlined_call_operand.vmem [shape: bf16[576,8], index: 0, kind: input, shape index: {}]   ;;  %s1513_s4 = inlined_call_operand.vmem [shape: bf16[64,32], index: 4, kind: input, shape index: {}]   ;;  %s1514_s1 = inlined_call_operand.vmem [shape: bf16[64,576], index: 1, kind: input, shape index: {}]   ;;  %s1515_s2 = inlined_call_operand.vmem [shape: f32[64,1], index: 2, kind: input, shape index: {}]   ;;  %s1516_s5 = inlined_call_operand.vmem [shape: f32[64,1], index: 5, kind: input, shape index: {}]   ;;  %s1517_s6 = inlined_call_operand.vmem [shape: f32[64,8], index: 6, kind: output, shape index: {}]  }
   0x1   :  { %v1110_v0 = vld [vmem:[%s1511_s3] sm:$0xff]   ;;  %1109 = vset.pattern.permute.xlu1 %v1180_v1  ;;  %1108 = vset.pattern.permute.xlu0 %v1180_v1  ;;  %v1113_v4 = vld [vmem:[%s1511_s3 + $0x8] sm:$0xff]   ;;  %v1119_v10 = vld [vmem:[%s1512_s0 + $0xd0] sm:$0xff]  }
   0x2   :  { %v1111_v2 = vld [vmem:[%s1512_s0 + $0xc0] sm:$0xff]   ;;  %1055 = vmatprep.subr.bf16.mxu1 %v1110_v0  ;;  %v1114_v5 = vld [vmem:[%s1512_s0 + $0xc8] sm:$0xff]   ;;  %v1121_v12 = vld [vmem:[%s1512_s0 + $0x90] sm:$0xff]  }
   0x3   :  { %v1112_v3 = vld [vmem:[%s1512_s0 + $0x80] sm:$0xff]   ;;  %1007 = vmatprep.subr.bf16.mxu0 %v1111_v2  ;;  %1056 = vmatpush3.bf16.msra.mxu1 %v1110_v0  ;;  %v1115_v6 = vld [vmem:[%s1512_s0 + $0x88] sm:$0xff]   ;;  %v1123_v14 = vld [vmem:[%s1512_s0 + $0xd8] sm:$0xff]  }
   0x4   :  { %1008 = vmatpush3.bf16.msra.mxu0 %v1112_v3  ;;  %1057 = vmatprep.subr.bf16.mxu1 %v1113_v4  ;;  %v1116_v7 = vld [vmem:[%s1513_s4] sm:$0xff]   ;;  %v1117_v8 = vld [vmem:[%s1513_s4 + $0x8] sm:$0xff]   ;;  %v1125_v16 = vld [vmem:[%s1512_s0 + $0x98] sm:$0xff]  }
   0x5   :  { %1009 = vmatprep.subr.bf16.mxu0 %v1114_v5  ;;  %1059 = vmatprep.mubr.msk.bf16.mxu1 %vm116_vm0, %v1116_v7  ;;  %v1118_v9 = vld [vmem:[%s1512_s0 + $0x40] sm:$0xff]   ;;  %v1122_v13 = vld [vmem:[%s1512_s0 + $0x48] sm:$0xff]   ;;  %v1126_v17 = vld [vmem:[%s1512_s0 + $0x50] sm:$0xff]  }
   0x6   :  { %v1120_v11 = vld [vmem:[%s1512_s0] sm:$0xff]   ;;  %v1124_v15 = vld [vmem:[%s1512_s0 + $0x8] sm:$0xff]   ;;  %v1128_v19 = vld [vmem:[%s1512_s0 + $0x10] sm:$0xff]  }
   0x7   :  { %1058 = vmatpush3.bf16.msra.mxu1 %v1113_v4  ;;  %v1127_v18 = vld [vmem:[%s1512_s0 + $0xe0] sm:$0xff]   ;;  %v1130_v21 = vld [vmem:[%s1512_s0 + $0x58] sm:$0xff]   ;;  %v1131_v22 = vld [vmem:[%s1512_s0 + $0xe8] sm:$0xff]  }
   0x8   :  { %1010 = vmatpush3.bf16.msra.mxu0 %v1115_v6  ;;  %967 = vmatprep.subr.bf16.mxu1 %v1118_v9  ;;  %v1129_v20 = vld [vmem:[%s1512_s0 + $0xa0] sm:$0xff]   ;;  %v1132_v23 = vld [vmem:[%s1512_s0 + $0x18] sm:$0xff]   ;;  %v1133_v24 = vld [vmem:[%s1512_s0 + $0xa8] sm:$0xff]  }
   0x9   :  { %1011 = vmatprep.subr.bf16.mxu0 %v1119_v10  ;;  %v1134_v25 = vld [vmem:[%s1512_s0 + $0x60] sm:$0xff]   ;;  %v1135_v26 = vld [vmem:[%s1512_s0 + $0xf0] sm:$0xff]   ;;  %v1138_v29 = vld [vmem:[%s1512_s0 + $0x68] sm:$0xff]  }
   0xa   :  { %1060 = vmatmul.mubr.msk.bf16.vlgmr.msra.gmra.mrb[0].mxu1 %vm116_vm0, %v1117_v8  ;;  %v1136_v27 = vld [vmem:[%s1512_s0 + $0x20] sm:$0xff]   ;;  %v1137_v28 = vld [vmem:[%s1512_s0 + $0xb0] sm:$0xff]   ;;  %v1139_v30 = vld [vmem:[%s1512_s0 + $0xf8] sm:$0xff]  }
   0xb   :  { %968 = vmatpush3.bf16.msra.mxu1 %v1120_v11  ;;  %v1140_v31 = vld [vmem:[%s1513_s4 + $0x10] sm:$0xff]   ;;  %v1141_v32 = vld [vmem:[%s1512_s0 + $0x28] sm:$0xff]   ;;  %v1142_v33 = vld [vmem:[%s1512_s0 + $0xb8] sm:$0xff]  }
   0xc   :  { %1012 = vmatpush3.bf16.msra.mxu0 %v1121_v12  ;;  %969 = vmatprep.subr.bf16.mxu1 %v1122_v13  ;;  %v1143_v34 = vld [vmem:[%s1513_s4 + $0x18] sm:$0xff]   ;;  %v1146_v36 = vld [vmem:[%s1514_s1 + $0xc] ss:$20 sps:$4 sm:$0xff]   ;;  %v1147_v37 = vld [vmem:[%s1512_s0 + $0x70] sm:$0xff]  }
   0xd   :  { %1013 = vmatprep.subr.bf16.mxu0 %v1123_v14  ;;  %1063 = vmatprep.mubr.msk.bf16.mxu1 %vm116_vm0, %v1140_v31  ;;  %v1144_v35 = vld [vmem:[%s1514_s1 + $0x8] ss:$20 sps:$4 sm:$0xff]   ;;  %v1148_v38 = vld [vmem:[%s1512_s0 + $0x100] sm:$0xff]   ;;  %v1149_v39 = vld [vmem:[%s1512_s0 + $0x30] sm:$0xff]  }
   0xe   :  { %764 = vmatprep.mubr.bf16.mxu0 %v1146_v36  ;;  %v1150_v40 = vld [vmem:[%s1512_s0 + $0x78] sm:$0xff]   ;;  %v1152_v42 = vld [vmem:[%s1514_s1] ss:$20 sps:$4 sm:$0xff]   ;;  %v1157_v45 = vld [vmem:[%s1514_s1 + $0x30] ss:$20 sps:$4 sm:$0xff]  }
   0xf   :  { %970 = vmatpush3.bf16.msra.mxu1 %v1124_v15  ;;  %v1151_v41 = vld [vmem:[%s1512_s0 + $0x38] sm:$0xff]   ;;  %v1155_v44 = vld [vmem:[%s1514_s1 + $0x34] ss:$20 sps:$4 sm:$0xff]   ;;  %v1159_v47 = vld [vmem:[%s1514_s1 + $0x2c] ss:$20 sps:$4 sm:$0xff]  }
  0x10   :  { %1014 = vmatpush3.bf16.msra.mxu0 %v1125_v16  ;;  %971 = vmatprep.subr.bf16.mxu1 %v1126_v17  ;;  %v1154_v43 = vld [vmem:[%s1514_s1 + $0x4] ss:$20 sps:$4 sm:$0xff]   ;;  %v1158_v46 = vld [vmem:[%s1512_s0 + $0x108] sm:$0xff]   ;;  %v1161_v48 = vld [vmem:[%s1514_s1 + $0x5c] ss:$20 sps:$4 sm:$0xff]  }
  0x11   :  { %1015 = vmatprep.subr.bf16.mxu0 %v1127_v18  ;;  %v1165_v49 = vld [vmem:[%s1512_s0 + $0x110] sm:$0xff]   ;;  %v1163_v50 = vld [vmem:[%s1514_s1 + $0x28] ss:$20 sps:$4 sm:$0xff]   ;;  %v1164_v51 = vld [vmem:[%s1514_s1 + $0x58] ss:$20 sps:$4 sm:$0xff]  }
  0x12   :  { %1064 = vmatmul.mubr.msk.bf16.gmra.mrb[4].mxu1 %vm116_vm0, %v1143_v34  ;;  %v1168_v52 = vld [vmem:[%s1514_s1 + $0x84] ss:$20 sps:$4 sm:$0xff]   ;;  %v1166_v54 = vld [vmem:[%s1514_s1 + $0x54] ss:$20 sps:$4 sm:$0xff]   ;;  %v1173_v62 = vld [vmem:[%s1514_s1 + $0x7c] ss:$20 sps:$4 sm:$0xff]  }
  0x13   :  { %972 = vmatpush3.bf16.msra.mxu1 %v1128_v19  ;;  %699 = vmatprep.mubr.bf16.mxu1 %v1154_v43  ;;  %v1172_v53 = vld [vmem:[%s1512_s0 + $0x118] sm:$0xff]   ;;  %v292_v55 = vld [vmem:[%s1515_s2 + $0x10] sm:$0xff]  ;;  %v290_v56 = vld [vmem:[%s1515_s2] sm:$0xff] }
  0x14   :  { %1016 = vmatpush3.bf16.msra.mxu0 %v1129_v20  ;;  %973 = vmatprep.subr.bf16.mxu1 %v1130_v21  ;;  %v1171_v57 = vld [vmem:[%s1514_s1 + $0x80] ss:$20 sps:$4 sm:$0xff]   ;;  %v293_v58 = vld [vmem:[%s1515_s2 + $0x18] sm:$0xff]  ;;  %v1170_v59 = vld [vmem:[%s1514_s1 + $0x50] ss:$20 sps:$4 sm:$0xff]  }
  0x15   :  { %1017 = vmatprep.subr.bf16.mxu0 %v1131_v22  ;;  %310 = vperm.xlu1 %1109, %v292_v55   ;;  %v1175_v60 = vld [vmem:[%s1514_s1 + $0x10] ss:$20 sps:$4 sm:$0xff]   ;;  %v291_v61 = vld [vmem:[%s1515_s2 + $0x8] sm:$0xff]  ;;  %v297_v2 = vld [vmem:[%s1515_s2 + $0x38] sm:$0xff] }
  0x16   :  { %300 = vperm.xlu0 %1108, %v290_v56   ;;  %v295_v63 = vld [vmem:[%s1515_s2 + $0x28] sm:$0xff]  ;;  %v294_v0 = vld [vmem:[%s1515_s2 + $0x20] sm:$0xff]  ;;  %v296_v5 = vld [vmem:[%s1515_s2 + $0x30] sm:$0xff] }
  0x17   :  { %974 = vmatpush3.bf16.msra.mxu1 %v1132_v23  ;;  %v1177_v1 = vld [vmem:[%s1514_s1 + $0x38] ss:$20 sps:$4 sm:$0xff]   ;;  %v1178_v4 = vld [vmem:[%s1514_s1 + $0x60] ss:$20 sps:$4 sm:$0xff]   ;;  %v1179_v8 = vld [vmem:[%s1514_s1 + $0x88] ss:$20 sps:$4 sm:$0xff]  }
  0x18   :  { %1018 = vmatpush3.bf16.msra.mxu0 %v1133_v24  ;;  %975 = vmatprep.subr.bf16.mxu1 %v1134_v25  ;;  %v1176_v3 = vld [vmem:[%s1514_s1 + $0x78] ss:$20 sps:$4 sm:$0xff]   ;;  %v36_v7 = vld [vmem:[%s1516_s5] sm:$0xff]  ;;  %v38_v10 = vld [vmem:[%s1516_s5 + $0x10] sm:$0xff] }
  0x19   :  { %1019 = vmatprep.subr.bf16.mxu0 %v1135_v26  ;;  %315 = vperm.xlu1 %1109, %v293_v58   ;;  %v37_v6 = vld [vmem:[%s1516_s5 + $0x8] sm:$0xff]  ;;  %v39_v9 = vld [vmem:[%s1516_s5 + $0x18] sm:$0xff]  ;;  %v40_v12 = vld [vmem:[%s1516_s5 + $0x20] sm:$0xff] }
  0x1a   :  { %305 = vperm.xlu0 %1108, %v291_v61   ;;  %v41_v11 = vld [vmem:[%s1516_s5 + $0x28] sm:$0xff]  ;;  %v43_v13 = vld [vmem:[%s1516_s5 + $0x38] sm:$0xff]  ;;  %v42_v14 = vld [vmem:[%s1516_s5 + $0x30] sm:$0xff] }
  0x1b   :  { %976 = vmatpush3.bf16.msra.mxu1 %v1136_v27 }
  0x1c   :  { %1020 = vmatpush3.bf16.msra.mxu0 %v1137_v28  ;;  %977 = vmatprep.subr.bf16.mxu1 %v1138_v29 }
  0x1d   :  { %1021 = vmatprep.subr.bf16.mxu0 %v1139_v30  ;;  %325 = vperm.xlu1 %1109, %v295_v63  }
  0x1e   :  { %320 = vperm.xlu0 %1108, %v294_v0  }
  0x1f   :  { %978 = vmatpush3.bf16.msra.mxu1 %v1141_v32 }
  0x20   :  { %1022 = vmatpush3.bf16.msra.mxu0 %v1142_v33  ;;  %979 = vmatprep.subr.bf16.mxu1 %v1147_v37 }
  0x21   :  { %1067 = vmatprep.subr.bf16.mxu0 %v1148_v38  ;;  %335 = vperm.xlu1 %1109, %v297_v2  }
  0x22   :  { %330 = vperm.xlu0 %1108, %v296_v5  }
  0x23   :  { %765 = vmatmul.mubr.bf16.vlgmr.msra.gmra.mrb[0].mxu0 %v1144_v35  ;;  %980 = vmatpush3.bf16.msra.mxu1 %v1149_v39 }
  0x24   :  { %1068 = vmatpush3.bf16.msra.mxu0 %v1148_v38  ;;  %981 = vmatprep.subr.bf16.mxu1 %v1150_v40 }
  0x25   :  { %772 = vmatprep.mubr.bf16.mxu0 %v1155_v44  ;;  %1069 = vmatprep.subr.bf16.mxu0 %v1158_v46 }
  0x26   :  { %51 = vperm.xlu1 %1109, %v37_v6   ;;  %46 = vperm.xlu0 %1108, %v36_v7  }
  0x27   :  { %982 = vmatpush3.bf16.msra.mxu1 %v1151_v41 }
  0x28   :  { %1070 = vmatpush3.bf16.msra.mxu0 %v1158_v46 }
  0x29   :  { %1071 = vmatprep.subr.bf16.mxu0 %v1165_v49 }
  0x2a   :  { %700 = vmatmul.mubr.bf16.vlgmr.msra.gmra.mrb[8].mxu1 %v1152_v42  ;;  %61 = vperm.xlu1 %1109, %v39_v9  }
  0x2b   :  { %773 = vmatmul.mubr.bf16.gmra.mrb[4].mxu0 %v1157_v45  ;;  %707 = vmatprep.mubr.bf16.mxu1 %v1159_v47 }
  0x2c   :  { %780 = vmatprep.mubr.bf16.mxu0 %v1161_v48  ;;  %1072 = vmatpush3.bf16.msra.mxu0 %v1165_v49 }
  0x2d   :  { %1073 = vmatprep.subr.bf16.mxu0 %v1172_v53  ;;  %56 = vperm.xlu0 %1108, %v38_v10  }
  0x2e   :  { %71 = vperm.xlu1 %1109, %v41_v11  }
  0x30   :  { %1074 = vmatpush3.bf16.msra.mxu0 %v1172_v53 }
  0x31   :  { %66 = vperm.xlu0 %1108, %v40_v12  }
  0x32   :  { %708 = vmatmul.mubr.bf16.gmra.mrb[12].mxu1 %v1163_v50  ;;  %81 = vperm.xlu1 %1109, %v43_v13  }
  0x33   :  { %781 = vmatmul.mubr.bf16.gmra.mrb[8].mxu0 %v1164_v51  ;;  %715 = vmatprep.mubr.bf16.mxu1 %v1166_v54 }
  0x34   :  { %788 = vmatprep.mubr.bf16.mxu0 %v1168_v52 }
  0x35   :  { %76 = vperm.xlu0 %1108, %v42_v14  }
  0x3a   :  { %716 = vmatmul.mubr.bf16.gmra.mrb[16].mxu1 %v1170_v59 }
  0x3b   :  { %789 = vmatmul.mubr.bf16.gmra.mrb[12].mxu0 %v1171_v57  ;;  %723 = vmatprep.mubr.bf16.mxu1 %v1173_v62 }
  0x3c   :  { %1075 = vmatprep.mubr.msk.bf16.mxu0 %vm654_vm1, %v1175_v60 }
  0x42   :  { %724 = vmatmul.mubr.bf16.gmra.mrb[20].mxu1 %v1176_v3 }
  0x43   :  { %1076 = vmatmul.mubr.msk.bf16.vlgmr.msra.gmra.mrb[16].mxu0 %vm654_vm1, %v1177_v1 }
  0x44   :  { %1079 = vmatprep.mubr.msk.bf16.mxu0 %vm654_vm1, %v1178_v4 }
  0x4b   :  { %1080 = vmatmul.mubr.msk.bf16.gmra.mrb[20].mxu0 %vm654_vm1, %v1179_v8 }
  0x94   :  { %v311_v19 = vpop.permute.xlu1 %310 }
  0x95   :  { %v301_v20 = vpop.permute.xlu0 %300 }
  0x98   :  { %v316_v21 = vpop.permute.xlu1 %315 }
  0x99   :  { %v306_v22 = vpop.permute.xlu0 %305 }
  0x9c   :  { %v1466_v28 = vpop.permute.xlu1 %325 }
  0x9d   :  { %v321_v30 = vpop.permute.xlu0 %320 }
  0xa0   :  { %v1468_v35 = vpop.permute.xlu1 %335 }
  0xa1   :  { %v1470_v36 = vpop.permute.xlu0 %330 }
  0xa5   :  { %v47_v50 = vpop.permute.xlu0 %46  ;;  %v52_v54 = vpop.permute.xlu1 %51 }
  0xa9   :  { %v62_v9 = vpop.permute.xlu1 %61 }
  0xac   :  { %v57_v4 = vpop.permute.xlu0 %56 }
  0xdd   :  { %v1061_v15 = vpop.f32.mrb[0].mxu1 }
  0xde   :  { %v163_v16 = vpop.f32.mrb[1].mxu1  ;;  %v172_v10 = vadd.f32 %v1061_v15, %v57_v4  ;;  %v67_v15 = vpop.permute.xlu0 %66 }
  0xdf   :  { %v1062_v17 = vpop.f32.mrb[2].mxu1  ;;  %v164_v51 = vadd.f32 %v163_v16, %v47_v50 }
  0xe0   :  { %v166_v18 = vpop.f32.mrb[3].mxu1  ;;  %v175_v14 = vadd.f32 %v1062_v17, %v62_v9 }
  0xe1   :  { %v167_v56 = vadd.f32 %v166_v18, %v52_v54 }
  0xe5   :  { %v1458_v23 = vpop.f32.mrb[4].mxu1 }
  0xe6   :  { %v1460_v24 = vpop.f32.mrb[5].mxu1 }
  0xe7   :  { %v1462_v25 = vpop.f32.mrb[6].mxu1 }
  0xe8   :  { %v1464_v27 = vpop.f32.mrb[7].mxu1 }
  0xf6   :  { %v1023_v26 = vpop.f32.mrb[0].mxu0 }
  0xf7   :  { %v1024_v29 = vpop.f32.mrb[1].mxu0 }
  0xf8   :  { %v1025_v31 = vadd.f32 %v1024_v29, %v1023_v26  ;;  %v1026_v32 = vpop.f32.mrb[2].mxu0 }
  0xf9   :  { %v1027_v33 = vpop.f32.mrb[3].mxu0 }
  0xfa   :  { %v1028_v34 = vadd.f32 %v1027_v33, %v1026_v32 }
  0xfd   :  { %v983_v38 = vpop.f32.mrb[8].mxu1 }
  0xfe   :  { %v1029_v37 = vpop.f32.mrb[4].mxu0  ;;  %v984_v40 = vpop.f32.mrb[9].mxu1 }
  0xff   :  { %v1030_v39 = vpop.f32.mrb[5].mxu0  ;;  %v985_v43 = vadd.f32 %v984_v40, %v983_v38  ;;  %v986_v44 = vpop.f32.mrb[10].mxu1 }
 0x100   :  { %v1031_v41 = vadd.f32 %v1030_v39, %v1029_v37  ;;  %v1032_v42 = vpop.f32.mrb[6].mxu0  ;;  %v987_v46 = vpop.f32.mrb[11].mxu1 }
 0x101   :  { %v1033_v45 = vpop.f32.mrb[7].mxu0  ;;  %v702_v48 = vadd.f32 %v985_v43, %v301_v20  ;;  %v988_v49 = vadd.f32 %v987_v46, %v986_v44 }
 0x102   :  { %v1034_v47 = vadd.f32 %v1033_v45, %v1032_v42  ;;  %v72_v42 = vpop.permute.xlu1 %71 }
 0x103   :  { %v705_v52 = vadd.f32 %v988_v49, %v306_v22  ;;  %v767_v53 = vadd.f32 %v1025_v31, %v702_v48  ;;  %v183_v44 = vadd.f32 %v1464_v27, %v72_v42 }
 0x105   :  { %v989_v57 = vpop.f32.mrb[12].mxu1  ;;  %v1087_v59 = vadd.f32 %v767_v53, %v164_v51  ;;  %v770_v60 = vadd.f32 %v1028_v34, %v705_v52 }
 0x106   :  { %v1035_v55 = vpop.f32.mrb[8].mxu0  ;;  %v990_v61 = vpop.f32.mrb[13].mxu1 }
 0x107   :  { %v1036_v58 = vpop.f32.mrb[9].mxu0  ;;  %v991_v0 = vadd.f32 %v990_v61, %v989_v57  ;;  %v992_v1 = vpop.f32.mrb[14].mxu1  ;;  %v1093_v3 = vadd.f32 %v770_v60, %v167_v56 }
 0x108   :  { %v1037_v62 = vadd.f32 %v1036_v58, %v1035_v55  ;;  %v1038_v63 = vpop.f32.mrb[10].mxu0  ;;  %v993_v5 = vpop.f32.mrb[15].mxu1 }
 0x109   :  { %v1039_v2 = vpop.f32.mrb[11].mxu0  ;;  %v710_v7 = vadd.f32 %v991_v0, %v311_v19  ;;  %v994_v8 = vadd.f32 %v993_v5, %v992_v1  ;;  %v77_v56 = vpop.permute.xlu0 %76 }
 0x10a   :  { %v1040_v6 = vadd.f32 %v1039_v2, %v1038_v63  ;;  %v188_v0 = vadd.f32 %v1458_v23, %v77_v56 }
 0x10b   :  { %v713_v11 = vadd.f32 %v994_v8, %v316_v21  ;;  %v775_v12 = vadd.f32 %v1031_v41, %v710_v7  ;;  %v180_v21 = vadd.f32 %v1460_v24, %v67_v15 }
 0x10d   :  { %v995_v16 = vpop.f32.mrb[16].mxu1  ;;  %v1084_v20 = vadd.f32 %v775_v12, %v172_v10  ;;  %v778_v22 = vadd.f32 %v1034_v47, %v713_v11 }
 0x10e   :  { %v1041_v13 = vpop.f32.mrb[12].mxu0  ;;  %v996_v26 = vpop.f32.mrb[17].mxu1 }
 0x10f   :  { %v1042_v18 = vpop.f32.mrb[13].mxu0  ;;  %v997_v32 = vadd.f32 %v996_v26, %v995_v16  ;;  %v998_v33 = vpop.f32.mrb[18].mxu1  ;;  %v1090_v37 = vadd.f32 %v778_v22, %v175_v14 }
 0x110   :  { %v1043_v29 = vadd.f32 %v1042_v18, %v1041_v13  ;;  %v1044_v31 = vpop.f32.mrb[14].mxu0  ;;  %v999_v38 = vpop.f32.mrb[19].mxu1 }
 0x111   :  { %v1045_v34 = vpop.f32.mrb[15].mxu0  ;;  %v718_v39 = vadd.f32 %v997_v32, %v321_v30  ;;  %v1000_v40 = vadd.f32 %v999_v38, %v998_v33 }
 0x112   :  { %v1046_v19 = vadd.f32 %v1045_v34, %v1044_v31 }
 0x113   :  { %v721_v17 = vadd.f32 %v1000_v40, %v1466_v28  ;;  %v783_v41 = vadd.f32 %v1037_v62, %v718_v39  ;;  %v82_v62 = vpop.permute.xlu1 %81 }
 0x115   :  { %v1001_v45 = vpop.f32.mrb[20].mxu1  ;;  %v1099_v48 = vadd.f32 %v783_v41, %v180_v21  ;;  %v786_v49 = vadd.f32 %v1040_v6, %v721_v17 }
 0x116   :  { %v1077_v43 = vpop.f32.mrb[16].mxu0  ;;  %v1002_v50 = vpop.f32.mrb[21].mxu1 }
 0x117   :  { %v1085_v46 = vadd.f32 %v1084_v20, %v1077_v43  ;;  %v831_v47 = vpop.f32.mrb[17].mxu0  ;;  %v1003_v53 = vadd.f32 %v1002_v50, %v1001_v45  ;;  %v1004_v54 = vpop.f32.mrb[22].mxu1  ;;  %v1105_v28 = vadd.f32 %v786_v49, %v183_v44 }
 0x118   :  { %v1088_v51 = vadd.f32 %v1087_v59, %v831_v47  ;;  %v1078_v30 = vpop.f32.mrb[18].mxu0  ;;  %v1005_v58 = vpop.f32.mrb[23].mxu1 }
 0x119   :  { %v872_v52 = vmax.f32 %v1085_v46, 0.0  ;;  %v1091_v24 = vadd.f32 %v1090_v37, %v1078_v30  ;;  %v834_v55 = vpop.f32.mrb[19].mxu0  ;;  %v726_v27 = vadd.f32 %v1003_v53, %v1470_v36  ;;  %v1006_v59 = vadd.f32 %v1005_v58, %v1004_v54 }
 0x11a   :  { %v870_v57 = vmax.f32 %v1088_v51, 0.0  ;;  %v1094_v60 = vadd.f32 %v1093_v3, %v834_v55  ;;  %v191_v3 = vadd.f32 %v1462_v25, %v82_v62 }
 0x11b   :  { %881 = vst.msk [vmem:[%s1517_s6 + $0x10] sm:$0xff] %vm878_vm2, %v872_v52  ;;  %v873_v61 = vmax.f32 %v1091_v24, 0.0  ;;  %v729_v1 = vadd.f32 %v1006_v59, %v1468_v35  ;;  %v791_v2 = vadd.f32 %v1043_v29, %v726_v27 }
 0x11c   :  { %879 = vst.msk [vmem:[%s1517_s6] sm:$0xff] %vm878_vm2, %v870_v57  ;;  %v871_v63 = vmax.f32 %v1094_v60, 0.0 }
 0x11d   :  { %882 = vst.msk [vmem:[%s1517_s6 + $0x18] sm:$0xff] %vm878_vm2, %v873_v61  ;;  %v1096_v4 = vadd.f32 %v791_v2, %v188_v0  ;;  %v794_v6 = vadd.f32 %v1046_v19, %v729_v1 }
 0x11e   :  { %880 = vst.msk [vmem:[%s1517_s6 + $0x8] sm:$0xff] %vm878_vm2, %v871_v63  ;;  %v1081_v36 = vpop.f32.mrb[20].mxu0 }
 0x11f   :  { %v847_v5 = vpop.f32.mrb[21].mxu0  ;;  %v1097_v8 = vadd.f32 %v1096_v4, %v1081_v36  ;;  %v1102_v9 = vadd.f32 %v794_v6, %v191_v3 }
 0x120   :  { %v1100_v23 = vadd.f32 %v1099_v48, %v847_v5  ;;  %v1082_v7 = vpop.f32.mrb[22].mxu0 }
 0x121   :  { %v850_v10 = vpop.f32.mrb[23].mxu0  ;;  %v876_v35 = vmax.f32 %v1097_v8, 0.0  ;;  %v1103_v13 = vadd.f32 %v1102_v9, %v1082_v7 }
 0x122   :  { %v874_v11 = vmax.f32 %v1100_v23, 0.0  ;;  %v1106_v12 = vadd.f32 %v1105_v28, %v850_v10 }
 0x123   :  { %885 = vst.msk [vmem:[%s1517_s6 + $0x30] sm:$0xff] %vm878_vm2, %v876_v35  ;;  %v877_v25 = vmax.f32 %v1103_v13, 0.0 }
 0x124   :  { %883 = vst.msk [vmem:[%s1517_s6 + $0x20] sm:$0xff] %vm878_vm2, %v874_v11  ;;  %v875_v14 = vmax.f32 %v1106_v12, 0.0 }
 0x125   :  { %886 = vst.msk [vmem:[%s1517_s6 + $0x38] sm:$0xff] %vm878_vm2, %v877_v25 }
 0x126   :  { %884 = vst.msk [vmem:[%s1517_s6 + $0x28] sm:$0xff] %vm878_vm2, %v875_v14 }

// kernel: backbone_forward.34
= control target key start
LH: loop header
LB: loop body
LE: loop exit
PB: predicated region body
PF: predicated region fallthrough
CT: control target
= control target key end

     0   :  { %v943_v1 = vmov 0   ;;  %vm475_vm0 = vcmask 523264   ;;  %vm691_vm1 = vcmask 64512   ;;  %s1198_s0 = inlined_call_operand.vmem [shape: bf16[576,8], index: 0, kind: input, shape index: {}]   ;;  %s1199_s1 = inlined_call_operand.vmem [shape: bf16[64,576], index: 1, kind: input, shape index: {}]   ;;  %s1200_s2 = inlined_call_operand.vmem [shape: f32[64,1], index: 2, kind: input, shape index: {}]   ;;  %s1201_s3 = inlined_call_operand.vmem [shape: f32[64,8], index: 3, kind: output, shape index: {}]  }
   0x1   :  { %v879_v0 = vld [vmem:[%s1198_s0 + $0x40] sm:$0xff]   ;;  %877 = vset.pattern.permute.xlu0 %v943_v1  ;;  %878 = vset.pattern.permute.xlu1 %v943_v1  ;;  %v883_v5 = vld [vmem:[%s1198_s0 + $0x48] sm:$0xff]   ;;  %v887_v9 = vld [vmem:[%s1198_s0 + $0x50] sm:$0xff]  }
   0x2   :  { %v880_v2 = vld [vmem:[%s1198_s0 + $0xc0] sm:$0xff]   ;;  %764 = vmatprep.subr.bf16.mxu0 %v879_v0  ;;  %v884_v6 = vld [vmem:[%s1198_s0 + $0xc8] sm:$0xff]   ;;  %v888_v10 = vld [vmem:[%s1198_s0 + $0xd0] sm:$0xff]  }
   0x3   :  { %v881_v3 = vld [vmem:[%s1198_s0] sm:$0xff]   ;;  %804 = vmatprep.subr.bf16.mxu1 %v880_v2  ;;  %v885_v7 = vld [vmem:[%s1198_s0 + $0x8] sm:$0xff]   ;;  %v889_v11 = vld [vmem:[%s1198_s0 + $0x10] sm:$0xff]  }
   0x4   :  { %v882_v4 = vld [vmem:[%s1198_s0 + $0x80] sm:$0xff]   ;;  %765 = vmatpush3.bf16.msra.mxu0 %v881_v3  ;;  %v886_v8 = vld [vmem:[%s1198_s0 + $0x88] sm:$0xff]   ;;  %v890_v12 = vld [vmem:[%s1198_s0 + $0x90] sm:$0xff]  }
   0x5   :  { %805 = vmatpush3.bf16.msra.mxu1 %v882_v4  ;;  %766 = vmatprep.subr.bf16.mxu0 %v883_v5  ;;  %v891_v13 = vld [vmem:[%s1198_s0 + $0x58] sm:$0xff]   ;;  %v895_v17 = vld [vmem:[%s1198_s0 + $0x60] sm:$0xff]   ;;  %v899_v21 = vld [vmem:[%s1198_s0 + $0x68] sm:$0xff]  }
   0x6   :  { %806 = vmatprep.subr.bf16.mxu1 %v884_v6  ;;  %v892_v14 = vld [vmem:[%s1198_s0 + $0xd8] sm:$0xff]   ;;  %v896_v18 = vld [vmem:[%s1198_s0 + $0xe0] sm:$0xff]   ;;  %v900_v22 = vld [vmem:[%s1198_s0 + $0xe8] sm:$0xff]  }
   0x7   :  { %v893_v15 = vld [vmem:[%s1198_s0 + $0x18] sm:$0xff]   ;;  %v897_v19 = vld [vmem:[%s1198_s0 + $0x20] sm:$0xff]   ;;  %v901_v23 = vld [vmem:[%s1198_s0 + $0x28] sm:$0xff]  }
   0x8   :  { %767 = vmatpush3.bf16.msra.mxu0 %v885_v7  ;;  %v894_v16 = vld [vmem:[%s1198_s0 + $0x98] sm:$0xff]   ;;  %v898_v20 = vld [vmem:[%s1198_s0 + $0xa0] sm:$0xff]   ;;  %v902_v24 = vld [vmem:[%s1198_s0 + $0xa8] sm:$0xff]  }
   0x9   :  { %807 = vmatpush3.bf16.msra.mxu1 %v886_v8  ;;  %768 = vmatprep.subr.bf16.mxu0 %v887_v9  ;;  %v903_v25 = vld [vmem:[%s1198_s0 + $0x70] sm:$0xff]   ;;  %v907_v29 = vld [vmem:[%s1198_s0 + $0x78] sm:$0xff]   ;;  %v916_v36 = vld [vmem:[%s1199_s1 + $0xc] ss:$20 sps:$4 sm:$0xff]  }
   0xa   :  { %808 = vmatprep.subr.bf16.mxu1 %v888_v10  ;;  %v904_v26 = vld [vmem:[%s1198_s0 + $0xf0] sm:$0xff]   ;;  %v908_v30 = vld [vmem:[%s1198_s0 + $0xf8] sm:$0xff]   ;;  %v917_v37 = vld [vmem:[%s1198_s0 + $0x100] sm:$0xff]   ;;  %585 = vmatprep.mubr.bf16.mxu1 %v916_v36 }
   0xb   :  { %v905_v27 = vld [vmem:[%s1198_s0 + $0x30] sm:$0xff]   ;;  %v909_v31 = vld [vmem:[%s1198_s0 + $0x38] sm:$0xff]   ;;  %v918_v38 = vld [vmem:[%s1199_s1 + $0x2c] ss:$20 sps:$4 sm:$0xff]  }
   0xc   :  { %769 = vmatpush3.bf16.msra.mxu0 %v889_v11  ;;  %v906_v28 = vld [vmem:[%s1198_s0 + $0xb0] sm:$0xff]   ;;  %v910_v32 = vld [vmem:[%s1198_s0 + $0xb8] sm:$0xff]   ;;  %v924_v40 = vld [vmem:[%s1198_s0 + $0x108] sm:$0xff]  }
   0xd   :  { %809 = vmatpush3.bf16.msra.mxu1 %v890_v12  ;;  %770 = vmatprep.subr.bf16.mxu0 %v891_v13  ;;  %v911_v33 = vld [vmem:[%s1199_s1] ss:$20 sps:$4 sm:$0xff]   ;;  %v913_v34 = vld [vmem:[%s1199_s1 + $0x4] ss:$20 sps:$4 sm:$0xff]   ;;  %v914_v35 = vld [vmem:[%s1199_s1 + $0x8] ss:$20 sps:$4 sm:$0xff]  }
   0xe   :  { %810 = vmatprep.subr.bf16.mxu1 %v892_v14  ;;  %520 = vmatprep.mubr.bf16.mxu0 %v913_v34  ;;  %v920_v39 = vld [vmem:[%s1199_s1 + $0x34] ss:$20 sps:$4 sm:$0xff]   ;;  %v923_v42 = vld [vmem:[%s1199_s1 + $0x30] ss:$20 sps:$4 sm:$0xff]   ;;  %v938_v46 = vld [vmem:[%s1198_s0 + $0x118] sm:$0xff]  }
   0xf   :  { %v922_v41 = vld [vmem:[%s1199_s1 + $0x28] ss:$20 sps:$4 sm:$0xff]   ;;  %v931_v45 = vld [vmem:[%s1198_s0 + $0x110] sm:$0xff]   ;;  %v930_v48 = vld [vmem:[%s1199_s1 + $0x58] ss:$20 sps:$4 sm:$0xff]  }
  0x10   :  { %771 = vmatpush3.bf16.msra.mxu0 %v893_v15  ;;  %v925_v43 = vld [vmem:[%s1199_s1 + $0x54] ss:$20 sps:$4 sm:$0xff]   ;;  %v927_v44 = vld [vmem:[%s1199_s1 + $0x5c] ss:$20 sps:$4 sm:$0xff]   ;;  %v934_v50 = vld [vmem:[%s1199_s1 + $0x84] ss:$20 sps:$4 sm:$0xff]  }
  0x11   :  { %811 = vmatpush3.bf16.msra.mxu1 %v894_v16  ;;  %772 = vmatprep.subr.bf16.mxu0 %v895_v17  ;;  %v929_v47 = vld [vmem:[%s1199_s1 + $0x50] ss:$20 sps:$4 sm:$0xff]   ;;  %v112_v53 = vld [vmem:[%s1200_s2 + $0x8] sm:$0xff]  ;;  %v114_v54 = vld [vmem:[%s1200_s2 + $0x18] sm:$0xff] }
  0x12   :  { %812 = vmatprep.subr.bf16.mxu1 %v896_v18  ;;  %v932_v49 = vld [vmem:[%s1199_s1 + $0x7c] ss:$20 sps:$4 sm:$0xff]   ;;  %v111_v51 = vld [vmem:[%s1200_s2] sm:$0xff]  ;;  %v936_v55 = vld [vmem:[%s1199_s1 + $0x78] ss:$20 sps:$4 sm:$0xff]  }
  0x13   :  { %v113_v52 = vld [vmem:[%s1200_s2 + $0x10] sm:$0xff]  ;;  %121 = vperm.xlu0 %877, %v111_v51   ;;  %v115_v58 = vld [vmem:[%s1200_s2 + $0x20] sm:$0xff]  ;;  %v116_v60 = vld [vmem:[%s1200_s2 + $0x28] sm:$0xff] }
  0x14   :  { %773 = vmatpush3.bf16.msra.mxu0 %v897_v19  ;;  %131 = vperm.xlu1 %878, %v113_v52   ;;  %v937_v56 = vld [vmem:[%s1199_s1 + $0x80] ss:$20 sps:$4 sm:$0xff]   ;;  %v939_v57 = vld [vmem:[%s1199_s1 + $0x10] ss:$20 sps:$4 sm:$0xff]   ;;  %v118_v62 = vld [vmem:[%s1200_s2 + $0x38] sm:$0xff] }
  0x15   :  { %813 = vmatpush3.bf16.msra.mxu1 %v898_v20  ;;  %774 = vmatprep.subr.bf16.mxu0 %v899_v21  ;;  %v940_v59 = vld [vmem:[%s1199_s1 + $0x60] ss:$20 sps:$4 sm:$0xff]   ;;  %v941_v63 = vld [vmem:[%s1199_s1 + $0x38] ss:$20 sps:$4 sm:$0xff]   ;;  %v942_v0 = vld [vmem:[%s1199_s1 + $0x88] ss:$20 sps:$4 sm:$0xff]  }
  0x16   :  { %814 = vmatprep.subr.bf16.mxu1 %v900_v22  ;;  %v117_v61 = vld [vmem:[%s1200_s2 + $0x30] sm:$0xff] }
  0x17   :  { %126 = vperm.xlu0 %877, %v112_v53  }
  0x18   :  { %775 = vmatpush3.bf16.msra.mxu0 %v901_v23  ;;  %136 = vperm.xlu1 %878, %v114_v54  }
  0x19   :  { %815 = vmatpush3.bf16.msra.mxu1 %v902_v24  ;;  %776 = vmatprep.subr.bf16.mxu0 %v903_v25 }
  0x1a   :  { %816 = vmatprep.subr.bf16.mxu1 %v904_v26 }
  0x1b   :  { %141 = vperm.xlu0 %877, %v115_v58  }
  0x1c   :  { %777 = vmatpush3.bf16.msra.mxu0 %v905_v27  ;;  %146 = vperm.xlu1 %878, %v116_v60  }
  0x1d   :  { %817 = vmatpush3.bf16.msra.mxu1 %v906_v28  ;;  %778 = vmatprep.subr.bf16.mxu0 %v907_v29 }
  0x1e   :  { %818 = vmatprep.subr.bf16.mxu1 %v908_v30 }
  0x1f   :  { %151 = vperm.xlu0 %877, %v117_v61  }
  0x20   :  { %779 = vmatpush3.bf16.msra.mxu0 %v909_v31  ;;  %156 = vperm.xlu1 %878, %v118_v62  }
  0x21   :  { %819 = vmatpush3.bf16.msra.mxu1 %v910_v32  ;;  %852 = vmatprep.subr.bf16.mxu0 %v917_v37 }
  0x22   :  { %868 = vmatprep.subr.bf16.mxu1 %v917_v37 }
  0x23   :  { %521 = vmatmul.mubr.bf16.vlgmr.msra.gmra.mrb[0].mxu0 %v911_v33 }
  0x24   :  { %586 = vmatmul.mubr.bf16.vlgmr.msra.gmra.mrb[0].mxu1 %v914_v35  ;;  %853 = vmatpush3.bf16.msra.mxu0 %v917_v37 }
  0x25   :  { %872 = vmatpush3.bf16.msra.mxu1 %v917_v37  ;;  %528 = vmatprep.mubr.bf16.mxu0 %v918_v38 }
  0x26   :  { %593 = vmatprep.mubr.bf16.mxu1 %v920_v39  ;;  %854 = vmatprep.subr.bf16.mxu0 %v924_v40 }
  0x27   :  { %869 = vmatprep.subr.bf16.mxu1 %v924_v40 }
  0x28   :  { %855 = vmatpush3.bf16.msra.mxu0 %v924_v40 }
  0x29   :  { %873 = vmatpush3.bf16.msra.mxu1 %v924_v40  ;;  %856 = vmatprep.subr.bf16.mxu0 %v931_v45 }
  0x2a   :  { %870 = vmatprep.subr.bf16.mxu1 %v931_v45 }
  0x2b   :  { %529 = vmatmul.mubr.bf16.gmra.mrb[4].mxu0 %v922_v41 }
  0x2c   :  { %594 = vmatmul.mubr.bf16.gmra.mrb[4].mxu1 %v923_v42  ;;  %536 = vmatprep.mubr.bf16.mxu0 %v925_v43 }
  0x2d   :  { %601 = vmatprep.mubr.bf16.mxu1 %v927_v44  ;;  %857 = vmatpush3.bf16.msra.mxu0 %v931_v45 }
  0x2e   :  { %874 = vmatpush3.bf16.msra.mxu1 %v931_v45  ;;  %858 = vmatprep.subr.bf16.mxu0 %v938_v46 }
  0x2f   :  { %871 = vmatprep.subr.bf16.mxu1 %v938_v46 }
  0x31   :  { %859 = vmatpush3.bf16.msra.mxu0 %v938_v46 }
  0x32   :  { %875 = vmatpush3.bf16.msra.mxu1 %v938_v46 }
  0x33   :  { %537 = vmatmul.mubr.bf16.gmra.mrb[8].mxu0 %v929_v47 }
  0x34   :  { %602 = vmatmul.mubr.bf16.gmra.mrb[8].mxu1 %v930_v48  ;;  %544 = vmatprep.mubr.bf16.mxu0 %v932_v49 }
  0x35   :  { %609 = vmatprep.mubr.bf16.mxu1 %v934_v50 }
  0x3b   :  { %545 = vmatmul.mubr.bf16.gmra.mrb[12].mxu0 %v936_v55 }
  0x3c   :  { %610 = vmatmul.mubr.bf16.gmra.mrb[12].mxu1 %v937_v56  ;;  %860 = vmatprep.mubr.msk.bf16.mxu0 %vm475_vm0, %v939_v57 }
  0x3d   :  { %864 = vmatprep.mubr.msk.bf16.mxu1 %vm475_vm0, %v940_v59 }
  0x43   :  { %861 = vmatmul.mubr.msk.bf16.vlgmr.msra.gmra.mrb[16].mxu0 %vm475_vm0, %v941_v63 }
  0x44   :  { %865 = vmatmul.mubr.msk.bf16.vlgmr.msra.gmra.mrb[16].mxu1 %vm475_vm0, %v942_v0 }
  0x92   :  { %v122_v1 = vpop.permute.xlu0 %121 }
  0x93   :  { %v132_v18 = vpop.permute.xlu1 %131 }
  0x96   :  { %v127_v3 = vpop.permute.xlu0 %126 }
  0x97   :  { %v137_v33 = vpop.permute.xlu1 %136 }
  0x9a   :  { %v142_v36 = vpop.permute.xlu0 %141 }
  0x9b   :  { %v147_v50 = vpop.permute.xlu1 %146 }
  0x9e   :  { %v152_v54 = vpop.permute.xlu0 %151 }
  0xf6   :  { %v780_v2 = vpop.f32.mrb[0].mxu0 }
  0xf7   :  { %v820_v4 = vpop.f32.mrb[0].mxu1  ;;  %v781_v5 = vpop.f32.mrb[1].mxu0 }
  0xf8   :  { %v782_v6 = vadd.f32 %v781_v5, %v780_v2  ;;  %v821_v7 = vpop.f32.mrb[1].mxu1  ;;  %v783_v8 = vpop.f32.mrb[2].mxu0 }
  0xf9   :  { %v822_v9 = vadd.f32 %v821_v7, %v820_v4  ;;  %v823_v10 = vpop.f32.mrb[2].mxu1  ;;  %v784_v11 = vpop.f32.mrb[3].mxu0 }
  0xfa   :  { %v523_v12 = vadd.f32 %v782_v6, %v122_v1  ;;  %v785_v13 = vadd.f32 %v784_v11, %v783_v8  ;;  %v824_v14 = vpop.f32.mrb[3].mxu1  ;;  %v157_v4 = vpop.permute.xlu1 %156 }
  0xfb   :  { %v825_v15 = vadd.f32 %v824_v14, %v823_v10 }
  0xfc   :  { %v526_v16 = vadd.f32 %v785_v13, %v127_v3  ;;  %v1160_v17 = vadd.f32 %v822_v9, %v523_v12 }
  0xfe   :  { %v786_v19 = vpop.f32.mrb[4].mxu0  ;;  %v1162_v20 = vadd.f32 %v825_v15, %v526_v16 }
  0xff   :  { %v826_v21 = vpop.f32.mrb[4].mxu1  ;;  %v787_v22 = vpop.f32.mrb[5].mxu0 }
 0x100   :  { %v788_v23 = vadd.f32 %v787_v22, %v786_v19  ;;  %v827_v24 = vpop.f32.mrb[5].mxu1  ;;  %v789_v25 = vpop.f32.mrb[6].mxu0 }
 0x101   :  { %v828_v26 = vadd.f32 %v827_v24, %v826_v21  ;;  %v829_v27 = vpop.f32.mrb[6].mxu1  ;;  %v790_v28 = vpop.f32.mrb[7].mxu0 }
 0x102   :  { %v531_v29 = vadd.f32 %v788_v23, %v132_v18  ;;  %v791_v30 = vadd.f32 %v790_v28, %v789_v25  ;;  %v830_v31 = vpop.f32.mrb[7].mxu1 }
 0x103   :  { %v831_v32 = vadd.f32 %v830_v31, %v829_v27 }
 0x104   :  { %v534_v34 = vadd.f32 %v791_v30, %v137_v33  ;;  %v596_v35 = vadd.f32 %v828_v26, %v531_v29 }
 0x106   :  { %v792_v37 = vpop.f32.mrb[8].mxu0  ;;  %v599_v38 = vadd.f32 %v831_v32, %v534_v34 }
 0x107   :  { %v832_v39 = vpop.f32.mrb[8].mxu1  ;;  %v793_v40 = vpop.f32.mrb[9].mxu0 }
 0x108   :  { %v794_v41 = vadd.f32 %v793_v40, %v792_v37  ;;  %v833_v42 = vpop.f32.mrb[9].mxu1  ;;  %v795_v43 = vpop.f32.mrb[10].mxu0 }
 0x109   :  { %v834_v44 = vadd.f32 %v833_v42, %v832_v39  ;;  %v835_v45 = vpop.f32.mrb[10].mxu1  ;;  %v796_v46 = vpop.f32.mrb[11].mxu0 }
 0x10a   :  { %v539_v47 = vadd.f32 %v794_v41, %v142_v36  ;;  %v797_v48 = vadd.f32 %v796_v46, %v795_v43  ;;  %v836_v49 = vpop.f32.mrb[11].mxu1 }
 0x10b   :  { %v837_v51 = vadd.f32 %v836_v49, %v835_v45 }
 0x10c   :  { %v542_v52 = vadd.f32 %v797_v48, %v147_v50  ;;  %v604_v53 = vadd.f32 %v834_v44, %v539_v47 }
 0x10e   :  { %v798_v55 = vpop.f32.mrb[12].mxu0  ;;  %v607_v56 = vadd.f32 %v837_v51, %v542_v52 }
 0x10f   :  { %v838_v57 = vpop.f32.mrb[12].mxu1  ;;  %v799_v58 = vpop.f32.mrb[13].mxu0 }
 0x110   :  { %v800_v59 = vadd.f32 %v799_v58, %v798_v55  ;;  %v839_v60 = vpop.f32.mrb[13].mxu1  ;;  %v801_v61 = vpop.f32.mrb[14].mxu0 }
 0x111   :  { %v840_v62 = vadd.f32 %v839_v60, %v838_v57  ;;  %v841_v63 = vpop.f32.mrb[14].mxu1  ;;  %v802_v0 = vpop.f32.mrb[15].mxu0 }
 0x112   :  { %v547_v1 = vadd.f32 %v800_v59, %v152_v54  ;;  %v803_v2 = vadd.f32 %v802_v0, %v801_v61  ;;  %v842_v3 = vpop.f32.mrb[15].mxu1 }
 0x113   :  { %v843_v5 = vadd.f32 %v842_v3, %v841_v63 }
 0x114   :  { %v550_v6 = vadd.f32 %v803_v2, %v157_v4  ;;  %v612_v7 = vadd.f32 %v840_v62, %v547_v1 }
 0x116   :  { %v862_v8 = vpop.f32.mrb[16].mxu0  ;;  %v615_v9 = vadd.f32 %v843_v5, %v550_v6 }
 0x117   :  { %v661_v10 = vadd.f32 %v862_v8, %v596_v35  ;;  %v866_v11 = vpop.f32.mrb[16].mxu1  ;;  %v652_v12 = vpop.f32.mrb[17].mxu0 }
 0x118   :  { %v677_v13 = vadd.f32 %v866_v11, %v612_v7  ;;  %v653_v14 = vadd.f32 %v652_v12, %v1160_v17  ;;  %v668_v15 = vpop.f32.mrb[17].mxu1  ;;  %v863_v16 = vpop.f32.mrb[18].mxu0 }
 0x119   :  { %v685_v18 = vmax.f32 %v661_v10, 0.0  ;;  %v669_v19 = vadd.f32 %v668_v15, %v604_v53  ;;  %v664_v21 = vadd.f32 %v863_v16, %v599_v38  ;;  %v867_v22 = vpop.f32.mrb[18].mxu1  ;;  %v655_v23 = vpop.f32.mrb[19].mxu0 }
 0x11a   :  { %v689_v24 = vmax.f32 %v677_v13, 0.0  ;;  %v683_v25 = vmax.f32 %v653_v14, 0.0  ;;  %v680_v26 = vadd.f32 %v867_v22, %v615_v9  ;;  %v656_v27 = vadd.f32 %v655_v23, %v1162_v20  ;;  %v671_v28 = vpop.f32.mrb[19].mxu1 }
 0x11b   :  { %694 = vst.msk [vmem:[%s1201_s3 + $0x10] sm:$0xff] %vm691_vm1, %v685_v18  ;;  %v687_v29 = vmax.f32 %v669_v19, 0.0  ;;  %v686_v17 = vmax.f32 %v664_v21, 0.0  ;;  %v672_v30 = vadd.f32 %v671_v28, %v607_v56 }
 0x11c   :  { %698 = vst.msk [vmem:[%s1201_s3 + $0x30] sm:$0xff] %vm691_vm1, %v689_v24  ;;  %692 = vst.msk [vmem:[%s1201_s3] sm:$0xff] %vm691_vm1, %v683_v25  ;;  %v690_v20 = vmax.f32 %v680_v26, 0.0  ;;  %v684_v31 = vmax.f32 %v656_v27, 0.0 }
 0x11d   :  { %696 = vst.msk [vmem:[%s1201_s3 + $0x20] sm:$0xff] %vm691_vm1, %v687_v29  ;;  %695 = vst.msk [vmem:[%s1201_s3 + $0x18] sm:$0xff] %vm691_vm1, %v686_v17  ;;  %v688_v32 = vmax.f32 %v672_v30, 0.0 }
 0x11e   :  { %699 = vst.msk [vmem:[%s1201_s3 + $0x38] sm:$0xff] %vm691_vm1, %v690_v20  ;;  %693 = vst.msk [vmem:[%s1201_s3 + $0x8] sm:$0xff] %vm691_vm1, %v684_v31 }
 0x11f   :  { %697 = vst.msk [vmem:[%s1201_s3 + $0x28] sm:$0xff] %vm691_vm1, %v688_v32 }

// kernel: backbone_forward.35
= control target key start
LH: loop header
LB: loop body
LE: loop exit
PB: predicated region body
PF: predicated region fallthrough
CT: control target
= control target key end

     0   :  { %v1119_v1 = vmov 0   ;;  %vm481_vm0 = vcmask 523264   ;;  %vm714_vm1 = vcmask 64512   ;;  %vm844_vm2 = vcmask 15360   ;;  %s1416_s0 = inlined_call_operand.vmem [shape: bf16[576,8], index: 0, kind: input, shape index: {}]   ;;  %s1417_s1 = inlined_call_operand.vmem [shape: bf16[64,576], index: 1, kind: input, shape index: {}]   ;;  %s1418_s2 = inlined_call_operand.vmem [shape: f32[64,1], index: 2, kind: input, shape index: {}]   ;;  %s1419_s4 = inlined_call_operand.vmem [shape: f32[8,2], index: 4, kind: input, shape index: {}]   ;;  %s1420_s3 = inlined_call_operand.vmem [shape: f32[64,8], index: 3, kind: input, shape index: {}]   ;;  %s1421_s5 = inlined_call_operand.vmem [shape: f32[64,2], index: 5, kind: output, shape index: {}]  }
   0x1   :  { %v1055_v0 = vld [vmem:[%s1416_s0 + $0x40] sm:$0xff]   ;;  %1053 = vset.pattern.permute.xlu0 %v1119_v1  ;;  %1054 = vset.pattern.permute.xlu1 %v1119_v1  ;;  %v1059_v5 = vld [vmem:[%s1416_s0 + $0x48] sm:$0xff]   ;;  %v1063_v9 = vld [vmem:[%s1416_s0 + $0x50] sm:$0xff]  }
   0x2   :  { %v1056_v2 = vld [vmem:[%s1416_s0] sm:$0xff]   ;;  %925 = vmatprep.subr.bf16.mxu0 %v1055_v0  ;;  %v1060_v6 = vld [vmem:[%s1416_s0 + $0x8] sm:$0xff]   ;;  %v1064_v10 = vld [vmem:[%s1416_s0 + $0x10] sm:$0xff]  }
   0x3   :  { %v1057_v3 = vld [vmem:[%s1416_s0 + $0xc0] sm:$0xff]   ;;  %926 = vmatpush3.bf16.msra.mxu0 %v1056_v2  ;;  %v1061_v7 = vld [vmem:[%s1416_s0 + $0xc8] sm:$0xff]   ;;  %v1065_v11 = vld [vmem:[%s1416_s0 + $0xd0] sm:$0xff]  }
   0x4   :  { %v1058_v4 = vld [vmem:[%s1416_s0 + $0x80] sm:$0xff]   ;;  %965 = vmatprep.subr.bf16.mxu1 %v1057_v3  ;;  %927 = vmatprep.subr.bf16.mxu0 %v1059_v5  ;;  %v1062_v8 = vld [vmem:[%s1416_s0 + $0x88] sm:$0xff]   ;;  %v1066_v12 = vld [vmem:[%s1416_s0 + $0x90] sm:$0xff]  }
   0x5   :  { %966 = vmatpush3.bf16.msra.mxu1 %v1058_v4  ;;  %v1067_v13 = vld [vmem:[%s1416_s0 + $0x58] sm:$0xff]   ;;  %v1071_v17 = vld [vmem:[%s1416_s0 + $0x60] sm:$0xff]   ;;  %v1075_v21 = vld [vmem:[%s1416_s0 + $0x68] sm:$0xff]  }
   0x6   :  { %967 = vmatprep.subr.bf16.mxu1 %v1061_v7  ;;  %v1068_v14 = vld [vmem:[%s1416_s0 + $0x18] sm:$0xff]   ;;  %v1072_v18 = vld [vmem:[%s1416_s0 + $0x20] sm:$0xff]   ;;  %v1076_v22 = vld [vmem:[%s1416_s0 + $0x28] sm:$0xff]  }
   0x7   :  { %928 = vmatpush3.bf16.msra.mxu0 %v1060_v6  ;;  %v1069_v15 = vld [vmem:[%s1416_s0 + $0xd8] sm:$0xff]   ;;  %v1073_v19 = vld [vmem:[%s1416_s0 + $0xe0] sm:$0xff]   ;;  %v1077_v23 = vld [vmem:[%s1416_s0 + $0xe8] sm:$0xff]  }
   0x8   :  { %929 = vmatprep.subr.bf16.mxu0 %v1063_v9  ;;  %v1070_v16 = vld [vmem:[%s1416_s0 + $0x98] sm:$0xff]   ;;  %v1074_v20 = vld [vmem:[%s1416_s0 + $0xa0] sm:$0xff]   ;;  %v1078_v24 = vld [vmem:[%s1416_s0 + $0xa8] sm:$0xff]  }
   0x9   :  { %968 = vmatpush3.bf16.msra.mxu1 %v1062_v8  ;;  %v1079_v25 = vld [vmem:[%s1416_s0 + $0x70] sm:$0xff]   ;;  %v1083_v29 = vld [vmem:[%s1416_s0 + $0x78] sm:$0xff]   ;;  %v1090_v35 = vld [vmem:[%s1416_s0 + $0x100] sm:$0xff]  }
   0xa   :  { %969 = vmatprep.subr.bf16.mxu1 %v1065_v11  ;;  %v1080_v26 = vld [vmem:[%s1416_s0 + $0x30] sm:$0xff]   ;;  %v1084_v30 = vld [vmem:[%s1416_s0 + $0x38] sm:$0xff]   ;;  %v1093_v37 = vld [vmem:[%s1417_s1 + $0xc] ss:$20 sps:$4 sm:$0xff]  }
   0xb   :  { %930 = vmatpush3.bf16.msra.mxu0 %v1064_v10  ;;  %v1081_v27 = vld [vmem:[%s1416_s0 + $0xf0] sm:$0xff]   ;;  %v1085_v31 = vld [vmem:[%s1416_s0 + $0xf8] sm:$0xff]   ;;  %v1094_v38 = vld [vmem:[%s1417_s1 + $0x2c] ss:$20 sps:$4 sm:$0xff]   ;;  %591 = vmatprep.mubr.bf16.mxu1 %v1093_v37 }
   0xc   :  { %931 = vmatprep.subr.bf16.mxu0 %v1067_v13  ;;  %v1082_v28 = vld [vmem:[%s1416_s0 + $0xb0] sm:$0xff]   ;;  %v1088_v33 = vld [vmem:[%s1417_s1 + $0x4] ss:$20 sps:$4 sm:$0xff]   ;;  %v1091_v36 = vld [vmem:[%s1417_s1 + $0x8] ss:$20 sps:$4 sm:$0xff]  }
   0xd   :  { %970 = vmatpush3.bf16.msra.mxu1 %v1066_v12  ;;  %v1086_v32 = vld [vmem:[%s1417_s1] ss:$20 sps:$4 sm:$0xff]   ;;  %v1089_v34 = vld [vmem:[%s1416_s0 + $0xb8] sm:$0xff]   ;;  %526 = vmatprep.mubr.bf16.mxu0 %v1088_v33  ;;  %v1097_v39 = vld [vmem:[%s1416_s0 + $0x108] sm:$0xff]  }
   0xe   :  { %971 = vmatprep.subr.bf16.mxu1 %v1069_v15  ;;  %v1098_v40 = vld [vmem:[%s1417_s1 + $0x34] ss:$20 sps:$4 sm:$0xff]   ;;  %v1100_v44 = vld [vmem:[%s1417_s1 + $0x30] ss:$20 sps:$4 sm:$0xff]   ;;  %v1111_v46 = vld [vmem:[%s1416_s0 + $0x118] sm:$0xff]  }
   0xf   :  { %932 = vmatpush3.bf16.msra.mxu0 %v1068_v14  ;;  %v1096_v41 = vld [vmem:[%s1417_s1 + $0x28] ss:$20 sps:$4 sm:$0xff]   ;;  %v1104_v43 = vld [vmem:[%s1416_s0 + $0x110] sm:$0xff]   ;;  %v1107_v49 = vld [vmem:[%s1417_s1 + $0x58] ss:$20 sps:$4 sm:$0xff]  }
  0x10   :  { %933 = vmatprep.subr.bf16.mxu0 %v1071_v17  ;;  %v1101_v42 = vld [vmem:[%s1417_s1 + $0x54] ss:$20 sps:$4 sm:$0xff]   ;;  %v1105_v45 = vld [vmem:[%s1417_s1 + $0x5c] ss:$20 sps:$4 sm:$0xff]   ;;  %v117_v50 = vld [vmem:[%s1418_s2] sm:$0xff] }
  0x11   :  { %972 = vmatpush3.bf16.msra.mxu1 %v1070_v16  ;;  %v1103_v47 = vld [vmem:[%s1417_s1 + $0x50] ss:$20 sps:$4 sm:$0xff]   ;;  %127 = vperm.xlu0 %1053, %v117_v50   ;;  %v118_v53 = vld [vmem:[%s1418_s2 + $0x8] sm:$0xff]  ;;  %v120_v54 = vld [vmem:[%s1418_s2 + $0x18] sm:$0xff] }
  0x12   :  { %973 = vmatprep.subr.bf16.mxu1 %v1073_v19  ;;  %v1108_v48 = vld [vmem:[%s1417_s1 + $0x7c] ss:$20 sps:$4 sm:$0xff]   ;;  %v1112_v51 = vld [vmem:[%s1417_s1 + $0x84] ss:$20 sps:$4 sm:$0xff]   ;;  %v122_v58 = vld [vmem:[%s1418_s2 + $0x28] sm:$0xff] }
  0x13   :  { %934 = vmatpush3.bf16.msra.mxu0 %v1072_v18  ;;  %v119_v52 = vld [vmem:[%s1418_s2 + $0x10] sm:$0xff]  ;;  %v1110_v55 = vld [vmem:[%s1417_s1 + $0x78] ss:$20 sps:$4 sm:$0xff]   ;;  %v121_v57 = vld [vmem:[%s1418_s2 + $0x20] sm:$0xff] }
  0x14   :  { %935 = vmatprep.subr.bf16.mxu0 %v1075_v21  ;;  %137 = vperm.xlu1 %1054, %v119_v52   ;;  %v1115_v56 = vld [vmem:[%s1417_s1 + $0x10] ss:$20 sps:$4 sm:$0xff]   ;;  %v1114_v59 = vld [vmem:[%s1417_s1 + $0x80] ss:$20 sps:$4 sm:$0xff]   ;;  %v124_v61 = vld [vmem:[%s1418_s2 + $0x38] sm:$0xff] }
  0x15   :  { %974 = vmatpush3.bf16.msra.mxu1 %v1074_v20  ;;  %132 = vperm.xlu0 %1053, %v118_v53   ;;  %v123_v60 = vld [vmem:[%s1418_s2 + $0x30] sm:$0xff]  ;;  %v1116_v62 = vld [vmem:[%s1417_s1 + $0x38] ss:$20 sps:$4 sm:$0xff]   ;;  %v1118_v0 = vld [vmem:[%s1417_s1 + $0x88] ss:$20 sps:$4 sm:$0xff]  }
  0x16   :  { %975 = vmatprep.subr.bf16.mxu1 %v1077_v23  ;;  %v1117_v63 = vld [vmem:[%s1417_s1 + $0x60] ss:$20 sps:$4 sm:$0xff]  }
  0x17   :  { %936 = vmatpush3.bf16.msra.mxu0 %v1076_v22  ;;  %v713_v1 = vld [vmem:[%s1419_s4] sm:$0xff] }
  0x18   :  { %937 = vmatprep.subr.bf16.mxu0 %v1079_v25  ;;  %142 = vperm.xlu1 %1054, %v120_v54  }
  0x19   :  { %976 = vmatpush3.bf16.msra.mxu1 %v1078_v24  ;;  %147 = vperm.xlu0 %1053, %v121_v57  }
  0x1a   :  { %977 = vmatprep.subr.bf16.mxu1 %v1081_v27 }
  0x1b   :  { %938 = vmatpush3.bf16.msra.mxu0 %v1080_v26 }
  0x1c   :  { %939 = vmatprep.subr.bf16.mxu0 %v1083_v29  ;;  %152 = vperm.xlu1 %1054, %v122_v58  }
  0x1d   :  { %978 = vmatpush3.bf16.msra.mxu1 %v1082_v28  ;;  %157 = vperm.xlu0 %1053, %v123_v60  }
  0x1e   :  { %979 = vmatprep.subr.bf16.mxu1 %v1085_v31 }
  0x1f   :  { %940 = vmatpush3.bf16.msra.mxu0 %v1084_v30 }
  0x20   :  { %1022 = vmatprep.subr.bf16.mxu0 %v1090_v35  ;;  %162 = vperm.xlu1 %1054, %v124_v61  }
  0x21   :  { %980 = vmatpush3.bf16.msra.mxu1 %v1089_v34 }
  0x22   :  { %527 = vmatmul.mubr.bf16.vlgmr.msra.gmra.mrb[0].mxu0 %v1086_v32  ;;  %1038 = vmatprep.subr.mxu1 %v713_v1 }
  0x23   :  { %1023 = vmatpush3.bf16.msra.mxu0 %v1090_v35  ;;  %534 = vmatprep.mubr.bf16.mxu0 %v1094_v38 }
  0x24   :  { %592 = vmatmul.mubr.bf16.vlgmr.msra.gmra.mrb[0].mxu1 %v1091_v36  ;;  %1024 = vmatprep.subr.bf16.mxu0 %v1097_v39 }
  0x25   :  { %599 = vmatprep.mubr.bf16.mxu1 %v1098_v40  ;;  %1039 = vmatpush3.msra.mxu1 %v713_v1 }
  0x27   :  { %1025 = vmatpush3.bf16.msra.mxu0 %v1097_v39 }
  0x28   :  { %1026 = vmatprep.subr.bf16.mxu0 %v1104_v43 }
  0x2a   :  { %535 = vmatmul.mubr.bf16.gmra.mrb[4].mxu0 %v1096_v41 }
  0x2b   :  { %542 = vmatprep.mubr.bf16.mxu0 %v1101_v42  ;;  %1027 = vmatpush3.bf16.msra.mxu0 %v1104_v43 }
  0x2c   :  { %600 = vmatmul.mubr.bf16.gmra.mrb[4].mxu1 %v1100_v44  ;;  %1028 = vmatprep.subr.bf16.mxu0 %v1111_v46 }
  0x2d   :  { %607 = vmatprep.mubr.bf16.mxu1 %v1105_v45 }
  0x2f   :  { %1029 = vmatpush3.bf16.msra.mxu0 %v1111_v46 }
  0x32   :  { %543 = vmatmul.mubr.bf16.gmra.mrb[8].mxu0 %v1103_v47 }
  0x33   :  { %550 = vmatprep.mubr.bf16.mxu0 %v1108_v48 }
  0x34   :  { %608 = vmatmul.mubr.bf16.gmra.mrb[8].mxu1 %v1107_v49 }
  0x35   :  { %615 = vmatprep.mubr.bf16.mxu1 %v1112_v51 }
  0x3a   :  { %551 = vmatmul.mubr.bf16.gmra.mrb[12].mxu0 %v1110_v55 }
  0x3b   :  { %1030 = vmatprep.mubr.msk.bf16.mxu0 %vm481_vm0, %v1115_v56 }
  0x3c   :  { %616 = vmatmul.mubr.bf16.gmra.mrb[12].mxu1 %v1114_v59 }
  0x42   :  { %1031 = vmatmul.mubr.msk.bf16.vlgmr.msra.gmra.mrb[16].mxu0 %vm481_vm0, %v1116_v62 }
  0x43   :  { %1034 = vmatprep.mubr.msk.bf16.mxu0 %vm481_vm0, %v1117_v63 }
  0x4a   :  { %1035 = vmatmul.mubr.msk.bf16.gmra.mrb[20].mxu0 %vm481_vm0, %v1118_v0 }
  0x90   :  { %v128_v2 = vpop.permute.xlu0 %127 }
  0x93   :  { %v138_v13 = vpop.permute.xlu1 %137 }
  0x94   :  { %v133_v7 = vpop.permute.xlu0 %132 }
  0x97   :  { %v143_v25 = vpop.permute.xlu1 %142 }
  0x98   :  { %v148_v39 = vpop.permute.xlu0 %147 }
  0x9b   :  { %v153_v43 = vpop.permute.xlu1 %152 }
  0x9c   :  { %v158_v57 = vpop.permute.xlu0 %157 }
  0x9f   :  { %v163_v61 = vpop.permute.xlu1 %162 }
  0xf5   :  { %v941_v3 = vpop.f32.mrb[0].mxu0 }
  0xf6   :  { %v942_v4 = vpop.f32.mrb[1].mxu0 }
  0xf7   :  { %v943_v5 = vadd.f32 %v942_v4, %v941_v3  ;;  %v944_v6 = vpop.f32.mrb[2].mxu0  ;;  %v981_v8 = vpop.f32.mrb[0].mxu1 }
  0xf8   :  { %v945_v9 = vpop.f32.mrb[3].mxu0  ;;  %v982_v12 = vpop.f32.mrb[1].mxu1 }
  0xf9   :  { %v529_v10 = vadd.f32 %v943_v5, %v128_v2  ;;  %v946_v11 = vadd.f32 %v945_v9, %v944_v6  ;;  %v983_v14 = vadd.f32 %v982_v12, %v981_v8  ;;  %v984_v15 = vpop.f32.mrb[2].mxu1  ;;  %v689_v12 = vld [vmem:[%s1420_s3] sm:$0xff] }
  0xfa   :  { %v985_v17 = vpop.f32.mrb[3].mxu1 }
  0xfb   :  { %v532_v16 = vadd.f32 %v946_v11, %v133_v7  ;;  %v986_v18 = vadd.f32 %v985_v17, %v984_v15  ;;  %v594_v19 = vadd.f32 %v983_v14, %v529_v10  ;;  %v691_v14 = vld [vmem:[%s1420_s3 + $0x10] sm:$0xff] }
  0xfd   :  { %v947_v20 = vpop.f32.mrb[4].mxu0  ;;  %v1349_v22 = vadd.f32 %v986_v18, %v532_v16 }
  0xfe   :  { %v948_v21 = vpop.f32.mrb[5].mxu0 }
  0xff   :  { %v949_v23 = vadd.f32 %v948_v21, %v947_v20  ;;  %v950_v24 = vpop.f32.mrb[6].mxu0  ;;  %v987_v26 = vpop.f32.mrb[4].mxu1  ;;  %v690_v20 = vld [vmem:[%s1420_s3 + $0x8] sm:$0xff] }
 0x100   :  { %v951_v27 = vpop.f32.mrb[7].mxu0  ;;  %v988_v30 = vpop.f32.mrb[5].mxu1 }
 0x101   :  { %v537_v28 = vadd.f32 %v949_v23, %v138_v13  ;;  %v952_v29 = vadd.f32 %v951_v27, %v950_v24  ;;  %v989_v31 = vadd.f32 %v988_v30, %v987_v26  ;;  %v990_v32 = vpop.f32.mrb[6].mxu1 }
 0x102   :  { %v991_v34 = vpop.f32.mrb[7].mxu1 }
 0x103   :  { %v540_v33 = vadd.f32 %v952_v29, %v143_v25  ;;  %v992_v35 = vadd.f32 %v991_v34, %v990_v32  ;;  %v602_v36 = vadd.f32 %v989_v31, %v537_v28  ;;  %v692_v25 = vld [vmem:[%s1420_s3 + $0x18] sm:$0xff] }
 0x105   :  { %v953_v37 = vpop.f32.mrb[8].mxu0  ;;  %v605_v40 = vadd.f32 %v992_v35, %v540_v33  ;;  %v695_v33 = vld [vmem:[%s1420_s3 + $0x30] sm:$0xff] }
 0x106   :  { %v954_v38 = vpop.f32.mrb[9].mxu0 }
 0x107   :  { %v955_v41 = vadd.f32 %v954_v38, %v953_v37  ;;  %v956_v42 = vpop.f32.mrb[10].mxu0  ;;  %v993_v44 = vpop.f32.mrb[8].mxu1  ;;  %v694_v38 = vld [vmem:[%s1420_s3 + $0x28] sm:$0xff] }
 0x108   :  { %v957_v45 = vpop.f32.mrb[11].mxu0  ;;  %v994_v48 = vpop.f32.mrb[9].mxu1 }
 0x109   :  { %v545_v46 = vadd.f32 %v955_v41, %v148_v39  ;;  %v958_v47 = vadd.f32 %v957_v45, %v956_v42  ;;  %v995_v49 = vadd.f32 %v994_v48, %v993_v44  ;;  %v996_v50 = vpop.f32.mrb[10].mxu1 }
 0x10a   :  { %v997_v52 = vpop.f32.mrb[11].mxu1 }
 0x10b   :  { %v548_v51 = vadd.f32 %v958_v47, %v153_v43  ;;  %v998_v53 = vadd.f32 %v997_v52, %v996_v50  ;;  %v610_v54 = vadd.f32 %v995_v49, %v545_v46  ;;  %v696_v43 = vld [vmem:[%s1420_s3 + $0x38] sm:$0xff] }
 0x10d   :  { %v959_v55 = vpop.f32.mrb[12].mxu0  ;;  %v613_v58 = vadd.f32 %v998_v53, %v548_v51 }
 0x10e   :  { %v960_v56 = vpop.f32.mrb[13].mxu0 }
 0x10f   :  { %v961_v59 = vadd.f32 %v960_v56, %v959_v55  ;;  %v962_v60 = vpop.f32.mrb[14].mxu0  ;;  %v999_v62 = vpop.f32.mrb[12].mxu1 }
 0x110   :  { %v963_v63 = vpop.f32.mrb[15].mxu0  ;;  %v1000_v2 = vpop.f32.mrb[13].mxu1 }
 0x111   :  { %v553_v0 = vadd.f32 %v961_v59, %v158_v57  ;;  %v964_v1 = vadd.f32 %v963_v63, %v962_v60  ;;  %v1001_v3 = vadd.f32 %v1000_v2, %v999_v62  ;;  %v1002_v4 = vpop.f32.mrb[14].mxu1 }
 0x112   :  { %v1003_v6 = vpop.f32.mrb[15].mxu1 }
 0x113   :  { %v556_v5 = vadd.f32 %v964_v1, %v163_v61  ;;  %v1004_v7 = vadd.f32 %v1003_v6, %v1002_v4  ;;  %v618_v8 = vadd.f32 %v1001_v3, %v553_v0 }
 0x115   :  { %v1032_v9 = vpop.f32.mrb[16].mxu0  ;;  %v621_v13 = vadd.f32 %v1004_v7, %v556_v5 }
 0x116   :  { %v667_v10 = vadd.f32 %v1032_v9, %v602_v36  ;;  %v658_v11 = vpop.f32.mrb[17].mxu0 }
 0x117   :  { %v659_v15 = vadd.f32 %v658_v11, %v594_v19  ;;  %v1033_v16 = vpop.f32.mrb[18].mxu0 }
 0x118   :  { %v670_v17 = vadd.f32 %v1033_v16, %v605_v40  ;;  %v661_v18 = vpop.f32.mrb[19].mxu0  ;;  %v699_v24 = vadd.f32 %v691_v14, %v667_v10 }
 0x119   :  { %v697_v21 = vadd.f32 %v689_v12, %v659_v15  ;;  %v662_v23 = vadd.f32 %v661_v18, %v1349_v22  ;;  %v693_v22 = vld [vmem:[%s1420_s3 + $0x20] sm:$0xff] }
 0x11a   :  { %v700_v28 = vadd.f32 %v692_v25, %v670_v17  ;;  %v707_v30 = vmax.f32 %v699_v24, 0.0 }
 0x11b   :  { %v705_v26 = vmax.f32 %v697_v21, 0.0  ;;  %v698_v27 = vadd.f32 %v690_v20, %v662_v23 }
 0x11c   :  { %v708_v39 = vmax.f32 %v700_v28, 0.0 }
 0x11d   :  { %v706_v19 = vmax.f32 %v698_v27, 0.0  ;;  %v1036_v29 = vpop.f32.mrb[20].mxu0  ;;  %1040 = vmatprep.mubr.msk.f32.mxu1 %vm714_vm1, %v705_v26 }
 0x11e   :  { %v683_v31 = vadd.f32 %v1036_v29, %v618_v8  ;;  %v674_v32 = vpop.f32.mrb[21].mxu0 }
 0x11f   :  { %v675_v34 = vadd.f32 %v674_v32, %v610_v54  ;;  %v1037_v35 = vpop.f32.mrb[22].mxu0  ;;  %1041 = vmatmul.mubr.msk.f32.vlgmr.msra.gmra.mrb[16].mxu1 %vm714_vm1, %v706_v19 }
 0x120   :  { %v686_v36 = vadd.f32 %v1037_v35, %v621_v13  ;;  %v677_v37 = vpop.f32.mrb[23].mxu0  ;;  %1043 = vmatprep.mubr.msk.f32.mxu1 %vm714_vm1, %v707_v30  ;;  %v703_v42 = vadd.f32 %v695_v33, %v683_v31 }
 0x121   :  { %v701_v40 = vadd.f32 %v693_v22, %v675_v34  ;;  %v678_v41 = vadd.f32 %v677_v37, %v613_v58 }
 0x122   :  { %v704_v46 = vadd.f32 %v696_v43, %v686_v36  ;;  %v711_v48 = vmax.f32 %v703_v42, 0.0 }
 0x123   :  { %v709_v44 = vmax.f32 %v701_v40, 0.0  ;;  %v702_v45 = vadd.f32 %v694_v38, %v678_v41  ;;  %1044 = vmatmul.mubr.msk.f32.gmra.mrb[18].mxu1 %vm714_vm1, %v708_v39 }
 0x124   :  { %v712_v49 = vmax.f32 %v704_v46, 0.0 }
 0x125   :  { %v710_v47 = vmax.f32 %v702_v45, 0.0  ;;  %1046 = vmatprep.mubr.msk.f32.mxu1 %vm714_vm1, %v709_v44 }
 0x127   :  { %1047 = vmatmul.mubr.msk.f32.gmra.mrb[20].mxu1 %vm714_vm1, %v710_v47 }
 0x128   :  { %1049 = vmatprep.mubr.msk.f32.mxu1 %vm714_vm1, %v711_v48 }
 0x12b   :  { %1050 = vmatmul.mubr.msk.f32.gmra.mrb[22].mxu1 %vm714_vm1, %v712_v49 }
 0x1f2   :  { %v1042_v50 = vpop.f32.mrb[16].mxu1 }
 0x1f3   :  { %846 = vst.msk [vmem:[%s1421_s5 + $0x8] sm:$0xff] %vm844_vm2, %v1042_v50  ;;  %v805_v51 = vpop.f32.mrb[17].mxu1 }
 0x1f4   :  { %845 = vst.msk [vmem:[%s1421_s5] sm:$0xff] %vm844_vm2, %v805_v51 }
 0x1f6   :  { %v1045_v52 = vpop.f32.mrb[18].mxu1 }
 0x1f7   :  { %848 = vst.msk [vmem:[%s1421_s5 + $0x18] sm:$0xff] %vm844_vm2, %v1045_v52  ;;  %v815_v53 = vpop.f32.mrb[19].mxu1 }
 0x1f8   :  { %847 = vst.msk [vmem:[%s1421_s5 + $0x10] sm:$0xff] %vm844_vm2, %v815_v53 }
 0x1fa   :  { %v1048_v54 = vpop.f32.mrb[20].mxu1 }
 0x1fb   :  { %850 = vst.msk [vmem:[%s1421_s5 + $0x28] sm:$0xff] %vm844_vm2, %v1048_v54  ;;  %v825_v55 = vpop.f32.mrb[21].mxu1 }
 0x1fc   :  { %849 = vst.msk [vmem:[%s1421_s5 + $0x20] sm:$0xff] %vm844_vm2, %v825_v55 }
 0x1fe   :  { %v1051_v56 = vpop.f32.mrb[22].mxu1 }
 0x1ff   :  { %852 = vst.msk [vmem:[%s1421_s5 + $0x38] sm:$0xff] %vm844_vm2, %v1051_v56  ;;  %v835_v57 = vpop.f32.mrb[23].mxu1 }
 0x200   :  { %851 = vst.msk [vmem:[%s1421_s5 + $0x30] sm:$0xff] %vm844_vm2, %v835_v57 }

</bundles_post_ra>
